<compile_context>
chip_gen: v7x
topology: tpu7x:2x2x1
jax: 0.10.0
libtpu: 0.0.40
codegen_flags: <defaults>
</compile_context>

<pallas_src>
import math

import jax
import jax.numpy as jnp
from jax import lax
from jax.experimental import pallas as pl
from jax.experimental.pallas import tpu as pltpu

EPS = 1e-5            # pooling epsilon (module-level EPS in the PyTorch code)
NEG_INF = -100000.0   # matches INF = torch.tensor(100000).float()
LN_EPS = 1e-5         # PyTorch nn.LayerNorm default eps
LANE = 128            # vreg lane width (same on v5e/v6e/v7x)


# ----------------- stage 1: masked pooling + GRU input projection (gridded) -----------------

def pool_project_kernel(hidden_ref, tok_mask_ref, wih_ref, bih_ref, gi_ref):
    """One (tn, L, Din) row tile: masked mean pool over tokens, then x @ W_ih."""
    h = hidden_ref[...].astype(jnp.float32)               # (tn, L, Din)  bf16 -> f32
    m = tok_mask_ref[...]                                  # (tn, L)
    num = jnp.sum(h * m[:, :, None], axis=1)               # (tn, Din)
    den = jnp.sum(m, axis=1, keepdims=True) + EPS
    pooled = num * pl.reciprocal(den, approx=True)         # EPS dominates approx error
    # input_dropout has p=0 -> identity
    gi_ref[...] = jnp.dot(pooled.astype(jnp.bfloat16), wih_ref[...],
                          preferred_element_type=jnp.float32) + bih_ref[...]


def _choose_row_tile(N, L, Din, budget_bytes=8 << 20):
    """Largest multiple-of-8 row tile that (a) fits a double-buffered bf16 hidden
    + f32 mask tile in the VMEM budget, (b) divides N, and (c) leaves >= 2 grid
    steps so the DMA pipeline (and the v7x megacore split) actually engages."""
    if N % 8 != 0:
        return N
    per_row = (L * Din * 2 + L * 4) * 2                    # bf16 hidden + f32 mask, x2 buffers
    tn = (budget_bytes // max(per_row, 1)) // 8 * 8
    cap = (N // 2) // 8 * 8 if N >= 16 else N
    tn = max(8, min(tn, cap, N))
    while tn > 8 and N % tn:
        tn -= 8
    return tn if N % tn == 0 else N


def pool_project(hidden, tok_mask, p):
    """Gridded pallas_call over the B*S row axis: pooled utterances -> gi = x @ W_ih + b."""
    N, L, Din = hidden.shape
    G6H = p['wih_pack'].shape[1]
    tn = _choose_row_tile(N, L, Din)
    grid = (N // tn,)

    flops = 2 * N * L * Din + 2 * N * Din * G6H
    bytes_accessed = (N * L * Din * 2 + N * L * 4          # hidden (bf16) + token mask
                      + Din * G6H * 2 + G6H * 4            # weights + bias
                      + N * G6H * 4)                       # gi output
    return pl.pallas_call(
        pool_project_kernel,
        out_shape=jax.ShapeDtypeStruct((N, G6H), jnp.float32),
        grid=grid,
        in_specs=[
            pl.BlockSpec((tn, L, Din), lambda i: (i, 0, 0)),
            pl.BlockSpec((tn, L), lambda i: (i, 0)),
            pl.BlockSpec((Din, G6H), lambda i: (0, 0)),
            pl.BlockSpec((1, G6H), lambda i: (0, 0)),
        ],
        out_specs=pl.BlockSpec((tn, G6H), lambda i: (i, 0)),
        compiler_params=pltpu.CompilerParams(
            dimension_semantics=("parallel",),              # v7x: split rows across both TCs
            vmem_limit_bytes=48 * 1024 * 1024),             # explicit; < v7x 64 MiB physical
        cost_estimate=pl.CostEstimate(flops=flops, transcendentals=N,
                                      bytes_accessed=bytes_accessed),
    )(hidden, tok_mask, p['wih_pack'], p['bih_pack'])


# ----------------- stage 2: GRU recurrence + attention + norms + head (grid-less) -----------------

def dialogue_head_kernel(gi_ref, dial_mask_ref, whh_ref, bhn_ref,
                         n1w_ref, n1b_ref, qkw_ref, qkb_ref,
                         n2w_ref, n2b_ref, hw_ref, hb_ref, out_ref):
    """BiGRU -> norm1 -> SDP attention -> concat -> norm2 -> head (+softmax over dim 0)."""
    B, S, G6H = gi_ref.shape
    H = G6H // 6
    D2 = 2 * H
    N = B * S

    gi = gi_ref[...]                                        # (B, S, 6H) [fwd r z n | bwd r z n]
    whh = whh_ref[...]                                      # (2H, 6H) block-diag(whh_f, whh_b)
    # only b_hn remains per-step (b_hr, b_hz folded into gi at pack time)
    bhn_f = jnp.broadcast_to(bhn_ref[...][:, 0:H], (B, H))
    bhn_b = jnp.broadcast_to(bhn_ref[...][:, H:D2], (B, H))

    def gates(gi_t, gh_t, bhn, h_prev):
        # TODO(synk): with H < 128 these gate slices are intra-vreg; pad each gate to a
        # 128-lane boundary at pack time to remove the per-step lane shuffles.
        r = jax.nn.sigmoid(gi_t[:, 0:H] + gh_t[:, 0:H])
        z = jax.nn.sigmoid(gi_t[:, H:2 * H] + gh_t[:, H:2 * H])
        n = jnp.tanh(gi_t[:, 2 * H:3 * H] + r * (gh_t[:, 2 * H:3 * H] + bhn))
        return (1.0 - z) * n + z * h_prev

    # Interleaved fwd/bwd recurrence: one block-diagonal hh matmul per step,
    # per-step outputs kept register-resident (no masked VMEM stores).
    # TODO(synk): for S >> 16 switch to lax.fori_loop(..., unroll=k) with a
    # lane-dense (S, B*2H) scratch to bound vreg live ranges.
    h_cat = jnp.zeros((B, D2), jnp.float32)                 # [h_fwd | h_bwd]
    fwd_outs, bwd_outs = [], []
    for t in range(S):
        tb = S - 1 - t
        gh = jnp.dot(h_cat, whh, preferred_element_type=jnp.float32)   # (B, 6H)
        h_f = gates(gi[:, t, 0:3 * H], gh[:, 0:3 * H], bhn_f, h_cat[:, 0:H])
        h_b = gates(gi[:, tb, 3 * H:6 * H], gh[:, 3 * H:6 * H], bhn_b, h_cat[:, H:D2])
        h_cat = jnp.concatenate([h_f, h_b], axis=1)
        fwd_outs.append(h_f)
        bwd_outs.append(h_b)

    rnn = jnp.concatenate([jnp.stack(fwd_outs, axis=1),
                           jnp.stack(bwd_outs[::-1], axis=1)], axis=-1)   # (B, S, 2H)

    def layernorm(v, w, b):
        mu = jnp.mean(v, axis=-1, keepdims=True)
        var = jnp.mean((v - mu) ** 2, axis=-1, keepdims=True)
        return (v - mu) * lax.rsqrt(var + LN_EPS) * w + b

    # per-token linear ops on flattened (N, d) views -> bigger MXU ops
    rnn2 = rnn.reshape(N, D2)
    x2 = layernorm(rnn2, n1w_ref[...], n1b_ref[...])        # norm1

    # fused Q/K projection: one (N, 2H) @ (2H, 4H) matmul
    qk = jnp.dot(x2, qkw_ref[...], preferred_element_type=jnp.float32) + qkb_ref[...]
    q = qk[:, 0:D2].reshape(B, S, D2)
    k = qk[:, D2:2 * D2].reshape(B, S, D2)
    x3 = x2.reshape(B, S, D2)                               # value == normed rnn output

    score = jnp.einsum('bqd,bkd->bqk', q, k,
                       preferred_element_type=jnp.float32) * (1.0 / math.sqrt(D2))
    # mask expands along the LAST axis (masks whole query rows), exactly like
    # the PyTorch code (padded key positions are still attended to).
    valid = dial_mask_ref[...][:, :, None] > 0.5
    score = jnp.where(valid, score, NEG_INF)

    score = score - jnp.max(score, axis=-1, keepdims=True)
    e = jnp.exp(score)
    attn = e / jnp.sum(e, axis=-1, keepdims=True)           # exact division (fidelity)

    context = jnp.einsum('bqk,bkd->bqd', attn, x3,
                         preferred_element_type=jnp.float32)
    # attention_dropout has p=0 -> identity

    cat = jnp.concatenate([context, rnn], axis=-1)          # (B, S, 4H), attention_concat
    cat2 = layernorm(cat.reshape(N, 2 * D2), n2w_ref[...], n2b_ref[...])   # norm2

    # head weights zero-padded to a lane-dense (multiple-of-128) output width
    logits = jnp.dot(cat2, hw_ref[...], preferred_element_type=jnp.float32) + hb_ref[...]
    logits = logits.reshape(B, S, -1)                       # (B, S, OUT_PAD)

    # nn.Softmax() with dim=None on a 3-D tensor applies softmax over dim 0
    # (batch), per torch.nn.functional._get_softmax_dim -- reproduced exactly.
    logits = logits - jnp.max(logits, axis=0, keepdims=True)
    e2 = jnp.exp(logits)
    out_ref[...] = e2 / jnp.sum(e2, axis=0, keepdims=True)  # exact division (fidelity)


def dialogue_head(gi, dial_mask, p):
    """Grid-less pallas_call: everything here is a few hundred KiB, VMEM-resident."""
    B, S = dial_mask.shape
    out_pad = p['hw_pad'].shape[1]

    def vmem():
        return pl.BlockSpec(memory_space=pltpu.MemorySpace.VMEM)

    return pl.pallas_call(
        dialogue_head_kernel,
        out_shape=jax.ShapeDtypeStruct((B, S, out_pad), jnp.float32),
        in_specs=[vmem() for _ in range(12)],
        out_specs=vmem(),
        compiler_params=pltpu.CompilerParams(vmem_limit_bytes=32 * 1024 * 1024),
    )(gi, dial_mask, p['whh_pack'], p['bhn_pack'],
      p['n1w'], p['n1b'], p['qkw'], p['qkb'], p['n2w'], p['n2b'],
      p['hw_pad'], p['hb_pad'])


# ----------------------------- parameters -----------------------------

def init_params(key, input_size, rnn_hidden_size, output_size):
    """Canonical (PyTorch-layout, pre-transposed) parameters."""
    H = rnn_hidden_size
    dim = 2 * H
    final = 4 * H
    ks = jax.random.split(key, 14)

    def uni(k, shape, scale):
        return jax.random.uniform(k, shape, jnp.float32, -scale, scale)

    s_gru = 1.0 / math.sqrt(H)
    s_att = 1.0 / math.sqrt(dim)
    s_head = 1.0 / math.sqrt(final)
    return {
        # GRU weights, pre-transposed so kernels compute x @ W; gate order (r, z, n)
        'wih_f': uni(ks[0], (input_size, 3 * H), s_gru),
        'whh_f': uni(ks[1], (H, 3 * H), s_gru),
        'bih_f': uni(ks[2], (1, 3 * H), s_gru),
        'bhh_f': uni(ks[3], (1, 3 * H), s_gru),
        'wih_b': uni(ks[4], (input_size, 3 * H), s_gru),
        'whh_b': uni(ks[5], (H, 3 * H), s_gru),
        'bih_b': uni(ks[6], (1, 3 * H), s_gru),
        'bhh_b': uni(ks[7], (1, 3 * H), s_gru),
        # LayerNorms
        'n1w': jnp.ones((1, dim), jnp.float32),
        'n1b': jnp.zeros((1, dim), jnp.float32),
        'n2w': jnp.ones((1, final), jnp.float32),
        'n2b': jnp.zeros((1, final), jnp.float32),
        # attention projections (pre-transposed)
        'qw': uni(ks[8], (dim, dim), s_att),
        'qb': uni(ks[9], (1, dim), s_att),
        'kw': uni(ks[10], (dim, dim), s_att),
        'kb': uni(ks[11], (1, dim), s_att),
        # head
        'hw': uni(ks[12], (final, output_size), s_head),
        'hb': uni(ks[13], (1, output_size), s_head),
    }


def pack_params(p, output_size):
    """Pack canonical params into the fused-kernel layout (done once, in JAX)."""
    H = p['whh_f'].shape[0]
    final = p['hw'].shape[0]
    out_pad = ((output_size + LANE - 1) // LANE) * LANE

    def fold(bih, bhh):
        # fold b_hr, b_hz into the hoisted input-side bias; b_hn must stay
        # inside the r * (W_hn h + b_hn) term, so it is kept separately.
        return bih + jnp.concatenate([bhh[:, 0:2 * H],
                                      jnp.zeros((1, H), jnp.float32)], axis=1)

    # block-diagonal hidden-hidden weight: one matmul drives BOTH directions
    whh_pack = jnp.zeros((2 * H, 6 * H), jnp.float32)
    whh_pack = whh_pack.at[0:H, 0:3 * H].set(p['whh_f'])
    whh_pack = whh_pack.at[H:2 * H, 3 * H:6 * H].set(p['whh_b'])

    return {
        # input projection for both GRU directions fused: [fwd r z n | bwd r z n]
        'wih_pack': jnp.concatenate([p['wih_f'], p['wih_b']],
                                    axis=1).astype(jnp.bfloat16),         # (Din, 6H) bf16
        'bih_pack': jnp.concatenate([fold(p['bih_f'], p['bhh_f']),
                                     fold(p['bih_b'], p['bhh_b'])], axis=1),  # (1, 6H)
        'whh_pack': whh_pack,                                              # (2H, 6H)
        'bhn_pack': jnp.concatenate([p['bhh_f'][:, 2 * H:3 * H],
                                     p['bhh_b'][:, 2 * H:3 * H]], axis=1),  # (1, 2H)
        'n1w': p['n1w'], 'n1b': p['n1b'],
        'n2w': p['n2w'], 'n2b': p['n2b'],
        # fused Q/K projection
        'qkw': jnp.concatenate([p['qw'], p['kw']], axis=1),               # (2H, 4H)
        'qkb': jnp.concatenate([p['qb'], p['kb']], axis=1),               # (1, 4H)
        # head padded to a lane-dense output width (sliced back in the wrapper)
        'hw_pad': jnp.zeros((final, out_pad), jnp.float32).at[:, :output_size].set(p['hw']),
        'hb_pad': jnp.zeros((1, out_pad), jnp.float32).at[:, :output_size].set(p['hb']),
    }


# ----------------------------- forward (glue) -----------------------------

def net_forward(packed, input_ids, attention_masks, input_lengths,
                emb_table, max_utt_len, output_size):
    B, S, L = input_ids.shape
    # TODO(synk): BertModel('bert-base-uncased') has no clean Pallas equivalent; a
    # deterministic embedding lookup stands in for bert(...).last_hidden_state.
    flat_ids = input_ids.reshape(-1, max_utt_len)
    flat_mask = attention_masks.reshape(-1, max_utt_len).astype(jnp.float32)
    hidden = emb_table[flat_ids].astype(jnp.bfloat16)        # (B*S, L, D_in) bf16: halves DMA

    # dialogue-level mask: indexes < input_lengths
    idx = jnp.arange(S)[None, :]
    dial_mask = (idx < input_lengths[:, None]).astype(jnp.float32)   # (B, S)

    gi = pool_project(hidden, flat_mask, packed)                     # (B*S, 6H), pipelined
    out_pad = dialogue_head(gi.reshape(B, S, gi.shape[1]), dial_mask, packed)  # (B, S, OUT_PAD)
    return out_pad[..., :output_size]                                # (B, S, OUT)


# ----------------------------- demo -----------------------------

if __name__ == "__main__":
    B, S, L = 2, 8, 16        # batch, dialogue length, MAX_UTTERANCE_LEN
    VOCAB = 50
    D_IN = 32                 # stand-in "BERT" hidden size == GRU input_size
    H = 32                    # rnn_hidden_size
    OUT = 10                  # output_size

    key = jax.random.PRNGKey(0)
    k_ids, k_len, k_emb, k_params = jax.random.split(key, 4)

    input_ids = jax.random.randint(k_ids, (B, S, L), 0, VOCAB, dtype=jnp.int32)
    tok_valid = jax.random.randint(k_len, (B, S), 1, L + 1)
    attention_masks = (jnp.arange(L)[None, None, :] < tok_valid[:, :, None]).astype(jnp.int32)
    input_lengths = jnp.array([S, S // 2], dtype=jnp.int32)

    emb_table = 0.1 * jax.random.normal(k_emb, (VOCAB, D_IN), jnp.float32)
    params = init_params(k_params, D_IN, H, OUT)
    packed = pack_params(params, OUT)

    forward = jax.jit(net_forward, static_argnames=('max_utt_len', 'output_size'))
    out = forward(packed, input_ids, attention_masks, input_lengths,
                  emb_table, max_utt_len=L, output_size=OUT)
    out = jax.block_until_ready(out)

    assert out.shape == (B, S, OUT)
    assert bool(jnp.all(jnp.isfinite(out)))
    print("KERNEL_OK")
</pallas_src>

<mosaic_0001>
module attributes {stable_mosaic.version = 11 : i64} {
  func.func @pool_project_kernel(%arg0: i32, %arg1: memref<8x16x32xbf16, #tpu.memory_space<vmem>>, %arg2: memref<8x16xf32, #tpu.memory_space<vmem>>, %arg3: memref<32x192xbf16, #tpu.memory_space<vmem>>, %arg4: memref<1x192xf32, #tpu.memory_space<vmem>>, %arg5: memref<8x192xf32, #tpu.memory_space<vmem>>) attributes {dimension_semantics = [#tpu.dimension_semantics<parallel>], iteration_bounds = array<i64: 2>, scalar_prefetch = 0 : i64, scratch_operands = 0 : i64, tpu.core_type = #tpu.core_type<tc>, window_params = [{transform_indices = @transform_0, window_bounds = array<i64: 8, 16, 32>}, {transform_indices = @transform_1, window_bounds = array<i64: 8, 16>}, {pipeline_mode = #tpu.pipeline_mode<synchronous>, transform_indices = @transform_2, window_bounds = array<i64: 32, 192>}, {pipeline_mode = #tpu.pipeline_mode<synchronous>, transform_indices = @transform_3, window_bounds = array<i64: 1, 192>}, {transform_indices = @transform_4, window_bounds = array<i64: 8, 192>}]} {
    %c0 = arith.constant 0 : index
    %c0_0 = arith.constant 0 : index
    %c0_1 = arith.constant 0 : index
    %0 = vector.load %arg1[%c0, %c0_0, %c0_1] : memref<8x16x32xbf16, #tpu.memory_space<vmem>>, vector<8x16x32xbf16>
    %1 = arith.extf %0 : vector<8x16x32xbf16> to vector<8x16x32xf32>
    %c0_2 = arith.constant 0 : index
    %c0_3 = arith.constant 0 : index
    %2 = vector.load %arg2[%c0_2, %c0_3] : memref<8x16xf32, #tpu.memory_space<vmem>>, vector<8x16xf32>
    %3 = vector.shape_cast %2 : vector<8x16xf32> to vector<8x16x1xf32>
    %4 = vector.broadcast %3 : vector<8x16x1xf32> to vector<8x16x32xf32>
    %5 = arith.mulf %1, %4 : vector<8x16x32xf32>
    %cst = arith.constant dense<0.000000e+00> : vector<8x32xf32>
    %6 = vector.multi_reduction <add>, %5, %cst [1] : vector<8x16x32xf32> to vector<8x32xf32>
    %cst_4 = arith.constant dense<0.000000e+00> : vector<8xf32>
    %7 = vector.multi_reduction <add>, %2, %cst_4 [1] : vector<8x16xf32> to vector<8xf32>
    %8 = vector.shape_cast %7 : vector<8xf32> to vector<8x1xf32>
    %cst_5 = arith.constant 9.99999974E-6 : f32
    %9 = vector.broadcast %cst_5 : f32 to vector<8x1xf32>
    %10 = arith.addf %8, %9 : vector<8x1xf32>
    %11 = tpu.reciprocal %10 {approx = true} : vector<8x1xf32> -> vector<8x1xf32>
    %12 = vector.broadcast %11 : vector<8x1xf32> to vector<8x32xf32>
    %13 = arith.mulf %6, %12 : vector<8x32xf32>
    %14 = arith.truncf %13 : vector<8x32xf32> to vector<8x32xbf16>
    %c0_6 = arith.constant 0 : index
    %c0_7 = arith.constant 0 : index
    %15 = vector.load %arg3[%c0_6, %c0_7] : memref<32x192xbf16, #tpu.memory_space<vmem>>, vector<32x192xbf16>
    %cst_8 = arith.constant dense<0.000000e+00> : vector<8x192xf32>
    %16 = tpu.matmul %14, %15, %cst_8 {dimension_numbers = #tpu.dot_dimension_numbers<[1], [0], [0], [1], [0, 0, 1, 1], [], []>} : vector<8x32xbf16>, vector<32x192xbf16>, vector<8x192xf32> -> vector<8x192xf32>
    %c0_9 = arith.constant 0 : index
    %c0_10 = arith.constant 0 : index
    %17 = vector.load %arg4[%c0_9, %c0_10] : memref<1x192xf32, #tpu.memory_space<vmem>>, vector<1x192xf32>
    %18 = vector.broadcast %17 : vector<1x192xf32> to vector<8x192xf32>
    %19 = arith.addf %16, %18 : vector<8x192xf32>
    %c0_11 = arith.constant 0 : index
    %c0_12 = arith.constant 0 : index
    %20 = vector.load %arg5[%c0_11, %c0_12] : memref<8x192xf32, #tpu.memory_space<vmem>>, vector<8x192xf32>
    tpu.vector_store %arg5[%c0_11, %c0_12], %19 {strides = array<i32>} : memref<8x192xf32, #tpu.memory_space<vmem>>, vector<8x192xf32>,
    return
  }
  func.func @transform_0(%arg0: i32) -> (i32, i32, i32) {
    %c0_i32 = arith.constant 0 : i32
    %c0_i32_0 = arith.constant 0 : i32
    %c0_i32_1 = arith.constant 0 : i32
    return %arg0, %c0_i32, %c0_i32_0 : i32, i32, i32
  }
  func.func @transform_1(%arg0: i32) -> (i32, i32) {
    %c0_i32 = arith.constant 0 : i32
    %c0_i32_0 = arith.constant 0 : i32
    return %arg0, %c0_i32 : i32, i32
  }
  func.func @transform_2(%arg0: i32) -> (i32, i32) {
    %c0_i32 = arith.constant 0 : i32
    %c0_i32_0 = arith.constant 0 : i32
    %c0_i32_1 = arith.constant 0 : i32
    return %c0_i32, %c0_i32_0 : i32, i32
  }
  func.func @transform_3(%arg0: i32) -> (i32, i32) {
    %c0_i32 = arith.constant 0 : i32
    %c0_i32_0 = arith.constant 0 : i32
    %c0_i32_1 = arith.constant 0 : i32
    return %c0_i32, %c0_i32_0 : i32, i32
  }
  func.func @transform_4(%arg0: i32) -> (i32, i32) {
    %c0_i32 = arith.constant 0 : i32
    %c0_i32_0 = arith.constant 0 : i32
    return %arg0, %c0_i32 : i32, i32
  }
}

module attributes {stable_mosaic.version = 11 : i64} {
  func.func @dialogue_head_kernel(%arg0: memref<2x8x192xf32, #tpu.memory_space<vmem>>, %arg1: memref<2x8xf32, #tpu.memory_space<vmem>>, %arg2: memref<64x192xf32, #tpu.memory_space<vmem>>, %arg3: memref<1x64xf32, #tpu.memory_space<vmem>>, %arg4: memref<1x64xf32, #tpu.memory_space<vmem>>, %arg5: memref<1x64xf32, #tpu.memory_space<vmem>>, %arg6: memref<64x128xf32, #tpu.memory_space<vmem>>, %arg7: memref<1x128xf32, #tpu.memory_space<vmem>>, %arg8: memref<1x128xf32, #tpu.memory_space<vmem>>, %arg9: memref<1x128xf32, #tpu.memory_space<vmem>>, %arg10: memref<128x128xf32, #tpu.memory_space<vmem>>, %arg11: memref<1x128xf32, #tpu.memory_space<vmem>>, %arg12: memref<2x8x128xf32, #tpu.memory_space<vmem>>) attributes {dimension_semantics = [], scalar_prefetch = 0 : i64, scratch_operands = 0 : i64, tpu.core_type = #tpu.core_type<tc>} {
    %c0 = arith.constant 0 : index
    %c0_0 = arith.constant 0 : index
    %c0_1 = arith.constant 0 : index
    %0 = vector.load %arg0[%c0, %c0_0, %c0_1] : memref<2x8x192xf32, #tpu.memory_space<vmem>>, vector<2x8x192xf32>
    %c0_2 = arith.constant 0 : index
    %c0_3 = arith.constant 0 : index
    %1 = vector.load %arg2[%c0_2, %c0_3] : memref<64x192xf32, #tpu.memory_space<vmem>>, vector<64x192xf32>
    %c0_4 = arith.constant 0 : index
    %c0_5 = arith.constant 0 : index
    %2 = vector.load %arg3[%c0_4, %c0_5] : memref<1x64xf32, #tpu.memory_space<vmem>>, vector<1x64xf32>
    %3 = vector.extract_strided_slice %2 {offsets = [0, 0], sizes = [1, 32], strides = [1, 1]} : vector<1x64xf32> to vector<1x32xf32>
    %4 = vector.shape_cast %3 : vector<1x32xf32> to vector<1x32xf32>
    %5 = vector.broadcast %4 : vector<1x32xf32> to vector<2x32xf32>
    %c0_6 = arith.constant 0 : index
    %c0_7 = arith.constant 0 : index
    %6 = vector.load %arg3[%c0_6, %c0_7] : memref<1x64xf32, #tpu.memory_space<vmem>>, vector<1x64xf32>
    %7 = vector.extract_strided_slice %6 {offsets = [0, 32], sizes = [1, 32], strides = [1, 1]} : vector<1x64xf32> to vector<1x32xf32>
    %8 = vector.shape_cast %7 : vector<1x32xf32> to vector<1x32xf32>
    %9 = vector.broadcast %8 : vector<1x32xf32> to vector<2x32xf32>
    %cst = arith.constant 0.000000e+00 : f32
    %10 = vector.broadcast %cst : f32 to vector<2x64xf32>
    %cst_8 = arith.constant dense<0.000000e+00> : vector<2x192xf32>
    %11 = tpu.matmul %10, %1, %cst_8 {dimension_numbers = #tpu.dot_dimension_numbers<[1], [0], [0], [1], [0, 0, 1, 1], [], []>} : vector<2x64xf32>, vector<64x192xf32>, vector<2x192xf32> -> vector<2x192xf32>
    %12 = vector.extract_strided_slice %0 {offsets = [0, 0, 0], sizes = [2, 1, 96], strides = [1, 1, 1]} : vector<2x8x192xf32> to vector<2x1x96xf32>
    %13 = vector.shape_cast %12 : vector<2x1x96xf32> to vector<2x96xf32>
    %14 = vector.extract_strided_slice %11 {offsets = [0, 0], sizes = [2, 96], strides = [1, 1]} : vector<2x192xf32> to vector<2x96xf32>
    %15 = vector.extract_strided_slice %10 {offsets = [0, 0], sizes = [2, 32], strides = [1, 1]} : vector<2x64xf32> to vector<2x32xf32>
    %16 = vector.extract_strided_slice %13 {offsets = [0, 0], sizes = [2, 32], strides = [1, 1]} : vector<2x96xf32> to vector<2x32xf32>
    %17 = vector.extract_strided_slice %14 {offsets = [0, 0], sizes = [2, 32], strides = [1, 1]} : vector<2x96xf32> to vector<2x32xf32>
    %18 = arith.addf %16, %17 : vector<2x32xf32>
    %19 = arith.negf %18 : vector<2x32xf32>
    %20 = math.exp %19 : vector<2x32xf32>
    %cst_9 = arith.constant 1.000000e+00 : f32
    %21 = vector.broadcast %cst_9 : f32 to vector<2x32xf32>
    %22 = arith.addf %21, %20 : vector<2x32xf32>
    %23 = arith.divf %21, %22 : vector<2x32xf32>
    %24 = vector.extract_strided_slice %13 {offsets = [0, 32], sizes = [2, 32], strides = [1, 1]} : vector<2x96xf32> to vector<2x32xf32>
    %25 = vector.extract_strided_slice %14 {offsets = [0, 32], sizes = [2, 32], strides = [1, 1]} : vector<2x96xf32> to vector<2x32xf32>
    %26 = arith.addf %24, %25 : vector<2x32xf32>
    %27 = arith.negf %26 : vector<2x32xf32>
    %28 = math.exp %27 : vector<2x32xf32>
    %cst_10 = arith.constant 1.000000e+00 : f32
    %29 = vector.broadcast %cst_10 : f32 to vector<2x32xf32>
    %30 = arith.addf %29, %28 : vector<2x32xf32>
    %31 = arith.divf %29, %30 : vector<2x32xf32>
    %32 = vector.extract_strided_slice %13 {offsets = [0, 64], sizes = [2, 32], strides = [1, 1]} : vector<2x96xf32> to vector<2x32xf32>
    %33 = vector.extract_strided_slice %14 {offsets = [0, 64], sizes = [2, 32], strides = [1, 1]} : vector<2x96xf32> to vector<2x32xf32>
    %34 = arith.addf %33, %5 : vector<2x32xf32>
    %35 = arith.mulf %23, %34 : vector<2x32xf32>
    %36 = arith.addf %32, %35 : vector<2x32xf32>
    %37 = math.tanh %36 : vector<2x32xf32>
    %cst_11 = arith.constant 1.000000e+00 : f32
    %38 = vector.broadcast %cst_11 : f32 to vector<2x32xf32>
    %39 = arith.subf %38, %31 : vector<2x32xf32>
    %40 = arith.mulf %39, %37 : vector<2x32xf32>
    %41 = arith.mulf %31, %15 : vector<2x32xf32>
    %42 = arith.addf %40, %41 : vector<2x32xf32>
    %43 = vector.extract_strided_slice %0 {offsets = [0, 7, 96], sizes = [2, 1, 96], strides = [1, 1, 1]} : vector<2x8x192xf32> to vector<2x1x96xf32>
    %44 = vector.shape_cast %43 : vector<2x1x96xf32> to vector<2x96xf32>
    %45 = vector.extract_strided_slice %11 {offsets = [0, 96], sizes = [2, 96], strides = [1, 1]} : vector<2x192xf32> to vector<2x96xf32>
    %46 = vector.extract_strided_slice %10 {offsets = [0, 32], sizes = [2, 32], strides = [1, 1]} : vector<2x64xf32> to vector<2x32xf32>
    %47 = vector.extract_strided_slice %44 {offsets = [0, 0], sizes = [2, 32], strides = [1, 1]} : vector<2x96xf32> to vector<2x32xf32>
    %48 = vector.extract_strided_slice %45 {offsets = [0, 0], sizes = [2, 32], strides = [1, 1]} : vector<2x96xf32> to vector<2x32xf32>
    %49 = arith.addf %47, %48 : vector<2x32xf32>
    %50 = arith.negf %49 : vector<2x32xf32>
    %51 = math.exp %50 : vector<2x32xf32>
    %cst_12 = arith.constant 1.000000e+00 : f32
    %52 = vector.broadcast %cst_12 : f32 to vector<2x32xf32>
    %53 = arith.addf %52, %51 : vector<2x32xf32>
    %54 = arith.divf %52, %53 : vector<2x32xf32>
    %55 = vector.extract_strided_slice %44 {offsets = [0, 32], sizes = [2, 32], strides = [1, 1]} : vector<2x96xf32> to vector<2x32xf32>
    %56 = vector.extract_strided_slice %45 {offsets = [0, 32], sizes = [2, 32], strides = [1, 1]} : vector<2x96xf32> to vector<2x32xf32>
    %57 = arith.addf %55, %56 : vector<2x32xf32>
    %58 = arith.negf %57 : vector<2x32xf32>
    %59 = math.exp %58 : vector<2x32xf32>
    %cst_13 = arith.constant 1.000000e+00 : f32
    %60 = vector.broadcast %cst_13 : f32 to vector<2x32xf32>
    %61 = arith.addf %60, %59 : vector<2x32xf32>
    %62 = arith.divf %60, %61 : vector<2x32xf32>
    %63 = vector.extract_strided_slice %44 {offsets = [0, 64], sizes = [2, 32], strides = [1, 1]} : vector<2x96xf32> to vector<2x32xf32>
    %64 = vector.extract_strided_slice %45 {offsets = [0, 64], sizes = [2, 32], strides = [1, 1]} : vector<2x96xf32> to vector<2x32xf32>
    %65 = arith.addf %64, %9 : vector<2x32xf32>
    %66 = arith.mulf %54, %65 : vector<2x32xf32>
    %67 = arith.addf %63, %66 : vector<2x32xf32>
    %68 = math.tanh %67 : vector<2x32xf32>
    %cst_14 = arith.constant 1.000000e+00 : f32
    %69 = vector.broadcast %cst_14 : f32 to vector<2x32xf32>
    %70 = arith.subf %69, %62 : vector<2x32xf32>
    %71 = arith.mulf %70, %68 : vector<2x32xf32>
    %72 = arith.mulf %62, %46 : vector<2x32xf32>
    %73 = arith.addf %71, %72 : vector<2x32xf32>
    %74 = tpu.concatenate %42, %73 in 1 : vector<2x32xf32>, vector<2x32xf32> -> vector<2x64xf32>
    %cst_15 = arith.constant dense<0.000000e+00> : vector<2x192xf32>
    %75 = tpu.matmul %74, %1, %cst_15 {dimension_numbers = #tpu.dot_dimension_numbers<[1], [0], [0], [1], [0, 0, 1, 1], [], []>} : vector<2x64xf32>, vector<64x192xf32>, vector<2x192xf32> -> vector<2x192xf32>
    %76 = vector.extract_strided_slice %0 {offsets = [0, 1, 0], sizes = [2, 1, 96], strides = [1, 1, 1]} : vector<2x8x192xf32> to vector<2x1x96xf32>
    %77 = vector.shape_cast %76 : vector<2x1x96xf32> to vector<2x96xf32>
    %78 = vector.extract_strided_slice %75 {offsets = [0, 0], sizes = [2, 96], strides = [1, 1]} : vector<2x192xf32> to vector<2x96xf32>
    %79 = vector.extract_strided_slice %74 {offsets = [0, 0], sizes = [2, 32], strides = [1, 1]} : vector<2x64xf32> to vector<2x32xf32>
    %80 = vector.extract_strided_slice %77 {offsets = [0, 0], sizes = [2, 32], strides = [1, 1]} : vector<2x96xf32> to vector<2x32xf32>
    %81 = vector.extract_strided_slice %78 {offsets = [0, 0], sizes = [2, 32], strides = [1, 1]} : vector<2x96xf32> to vector<2x32xf32>
    %82 = arith.addf %80, %81 : vector<2x32xf32>
    %83 = arith.negf %82 : vector<2x32xf32>
    %84 = math.exp %83 : vector<2x32xf32>
    %cst_16 = arith.constant 1.000000e+00 : f32
    %85 = vector.broadcast %cst_16 : f32 to vector<2x32xf32>
    %86 = arith.addf %85, %84 : vector<2x32xf32>
    %87 = arith.divf %85, %86 : vector<2x32xf32>
    %88 = vector.extract_strided_slice %77 {offsets = [0, 32], sizes = [2, 32], strides = [1, 1]} : vector<2x96xf32> to vector<2x32xf32>
    %89 = vector.extract_strided_slice %78 {offsets = [0, 32], sizes = [2, 32], strides = [1, 1]} : vector<2x96xf32> to vector<2x32xf32>
    %90 = arith.addf %88, %89 : vector<2x32xf32>
    %91 = arith.negf %90 : vector<2x32xf32>
    %92 = math.exp %91 : vector<2x32xf32>
    %cst_17 = arith.constant 1.000000e+00 : f32
    %93 = vector.broadcast %cst_17 : f32 to vector<2x32xf32>
    %94 = arith.addf %93, %92 : vector<2x32xf32>
    %95 = arith.divf %93, %94 : vector<2x32xf32>
    %96 = vector.extract_strided_slice %77 {offsets = [0, 64], sizes = [2, 32], strides = [1, 1]} : vector<2x96xf32> to vector<2x32xf32>
    %97 = vector.extract_strided_slice %78 {offsets = [0, 64], sizes = [2, 32], strides = [1, 1]} : vector<2x96xf32> to vector<2x32xf32>
    %98 = arith.addf %97, %5 : vector<2x32xf32>
    %99 = arith.mulf %87, %98 : vector<2x32xf32>
    %100 = arith.addf %96, %99 : vector<2x32xf32>
    %101 = math.tanh %100 : vector<2x32xf32>
    %cst_18 = arith.constant 1.000000e+00 : f32
    %102 = vector.broadcast %cst_18 : f32 to vector<2x32xf32>
    %103 = arith.subf %102, %95 : vector<2x32xf32>
    %104 = arith.mulf %103, %101 : vector<2x32xf32>
    %105 = arith.mulf %95, %79 : vector<2x32xf32>
    %106 = arith.addf %104, %105 : vector<2x32xf32>
    %107 = vector.extract_strided_slice %0 {offsets = [0, 6, 96], sizes = [2, 1, 96], strides = [1, 1, 1]} : vector<2x8x192xf32> to vector<2x1x96xf32>
    %108 = vector.shape_cast %107 : vector<2x1x96xf32> to vector<2x96xf32>
    %109 = vector.extract_strided_slice %75 {offsets = [0, 96], sizes = [2, 96], strides = [1, 1]} : vector<2x192xf32> to vector<2x96xf32>
    %110 = vector.extract_strided_slice %74 {offsets = [0, 32], sizes = [2, 32], strides = [1, 1]} : vector<2x64xf32> to vector<2x32xf32>
    %111 = vector.extract_strided_slice %108 {offsets = [0, 0], sizes = [2, 32], strides = [1, 1]} : vector<2x96xf32> to vector<2x32xf32>
    %112 = vector.extract_strided_slice %109 {offsets = [0, 0], sizes = [2, 32], strides = [1, 1]} : vector<2x96xf32> to vector<2x32xf32>
    %113 = arith.addf %111, %112 : vector<2x32xf32>
    %114 = arith.negf %113 : vector<2x32xf32>
    %115 = math.exp %114 : vector<2x32xf32>
    %cst_19 = arith.constant 1.000000e+00 : f32
    %116 = vector.broadcast %cst_19 : f32 to vector<2x32xf32>
    %117 = arith.addf %116, %115 : vector<2x32xf32>
    %118 = arith.divf %116, %117 : vector<2x32xf32>
    %119 = vector.extract_strided_slice %108 {offsets = [0, 32], sizes = [2, 32], strides = [1, 1]} : vector<2x96xf32> to vector<2x32xf32>
    %120 = vector.extract_strided_slice %109 {offsets = [0, 32], sizes = [2, 32], strides = [1, 1]} : vector<2x96xf32> to vector<2x32xf32>
    %121 = arith.addf %119, %120 : vector<2x32xf32>
    %122 = arith.negf %121 : vector<2x32xf32>
    %123 = math.exp %122 : vector<2x32xf32>
    %cst_20 = arith.constant 1.000000e+00 : f32
    %124 = vector.broadcast %cst_20 : f32 to vector<2x32xf32>
    %125 = arith.addf %124, %123 : vector<2x32xf32>
    %126 = arith.divf %124, %125 : vector<2x32xf32>
    %127 = vector.extract_strided_slice %108 {offsets = [0, 64], sizes = [2, 32], strides = [1, 1]} : vector<2x96xf32> to vector<2x32xf32>
    %128 = vector.extract_strided_slice %109 {offsets = [0, 64], sizes = [2, 32], strides = [1, 1]} : vector<2x96xf32> to vector<2x32xf32>
    %129 = arith.addf %128, %9 : vector<2x32xf32>
    %130 = arith.mulf %118, %129 : vector<2x32xf32>
    %131 = arith.addf %127, %130 : vector<2x32xf32>
    %132 = math.tanh %131 : vector<2x32xf32>
    %cst_21 = arith.constant 1.000000e+00 : f32
    %133 = vector.broadcast %cst_21 : f32 to vector<2x32xf32>
    %134 = arith.subf %133, %126 : vector<2x32xf32>
    %135 = arith.mulf %134, %132 : vector<2x32xf32>
    %136 = arith.mulf %126, %110 : vector<2x32xf32>
    %137 = arith.addf %135, %136 : vector<2x32xf32>
    %138 = tpu.concatenate %106, %137 in 1 : vector<2x32xf32>, vector<2x32xf32> -> vector<2x64xf32>
    %cst_22 = arith.constant dense<0.000000e+00> : vector<2x192xf32>
    %139 = tpu.matmul %138, %1, %cst_22 {dimension_numbers = #tpu.dot_dimension_numbers<[1], [0], [0], [1], [0, 0, 1, 1], [], []>} : vector<2x64xf32>, vector<64x192xf32>, vector<2x192xf32> -> vector<2x192xf32>
    %140 = vector.extract_strided_slice %0 {offsets = [0, 2, 0], sizes = [2, 1, 96], strides = [1, 1, 1]} : vector<2x8x192xf32> to vector<2x1x96xf32>
    %141 = vector.shape_cast %140 : vector<2x1x96xf32> to vector<2x96xf32>
    %142 = vector.extract_strided_slice %139 {offsets = [0, 0], sizes = [2, 96], strides = [1, 1]} : vector<2x192xf32> to vector<2x96xf32>
    %143 = vector.extract_strided_slice %138 {offsets = [0, 0], sizes = [2, 32], strides = [1, 1]} : vector<2x64xf32> to vector<2x32xf32>
    %144 = vector.extract_strided_slice %141 {offsets = [0, 0], sizes = [2, 32], strides = [1, 1]} : vector<2x96xf32> to vector<2x32xf32>
    %145 = vector.extract_strided_slice %142 {offsets = [0, 0], sizes = [2, 32], strides = [1, 1]} : vector<2x96xf32> to vector<2x32xf32>
    %146 = arith.addf %144, %145 : vector<2x32xf32>
    %147 = arith.negf %146 : vector<2x32xf32>
    %148 = math.exp %147 : vector<2x32xf32>
    %cst_23 = arith.constant 1.000000e+00 : f32
    %149 = vector.broadcast %cst_23 : f32 to vector<2x32xf32>
    %150 = arith.addf %149, %148 : vector<2x32xf32>
    %151 = arith.divf %149, %150 : vector<2x32xf32>
    %152 = vector.extract_strided_slice %141 {offsets = [0, 32], sizes = [2, 32], strides = [1, 1]} : vector<2x96xf32> to vector<2x32xf32>
    %153 = vector.extract_strided_slice %142 {offsets = [0, 32], sizes = [2, 32], strides = [1, 1]} : vector<2x96xf32> to vector<2x32xf32>
    %154 = arith.addf %152, %153 : vector<2x32xf32>
    %155 = arith.negf %154 : vector<2x32xf32>
    %156 = math.exp %155 : vector<2x32xf32>
    %cst_24 = arith.constant 1.000000e+00 : f32
    %157 = vector.broadcast %cst_24 : f32 to vector<2x32xf32>
    %158 = arith.addf %157, %156 : vector<2x32xf32>
    %159 = arith.divf %157, %158 : vector<2x32xf32>
    %160 = vector.extract_strided_slice %141 {offsets = [0, 64], sizes = [2, 32], strides = [1, 1]} : vector<2x96xf32> to vector<2x32xf32>
    %161 = vector.extract_strided_slice %142 {offsets = [0, 64], sizes = [2, 32], strides = [1, 1]} : vector<2x96xf32> to vector<2x32xf32>
    %162 = arith.addf %161, %5 : vector<2x32xf32>
    %163 = arith.mulf %151, %162 : vector<2x32xf32>
    %164 = arith.addf %160, %163 : vector<2x32xf32>
    %165 = math.tanh %164 : vector<2x32xf32>
    %cst_25 = arith.constant 1.000000e+00 : f32
    %166 = vector.broadcast %cst_25 : f32 to vector<2x32xf32>
    %167 = arith.subf %166, %159 : vector<2x32xf32>
    %168 = arith.mulf %167, %165 : vector<2x32xf32>
    %169 = arith.mulf %159, %143 : vector<2x32xf32>
    %170 = arith.addf %168, %169 : vector<2x32xf32>
    %171 = vector.extract_strided_slice %0 {offsets = [0, 5, 96], sizes = [2, 1, 96], strides = [1, 1, 1]} : vector<2x8x192xf32> to vector<2x1x96xf32>
    %172 = vector.shape_cast %171 : vector<2x1x96xf32> to vector<2x96xf32>
    %173 = vector.extract_strided_slice %139 {offsets = [0, 96], sizes = [2, 96], strides = [1, 1]} : vector<2x192xf32> to vector<2x96xf32>
    %174 = vector.extract_strided_slice %138 {offsets = [0, 32], sizes = [2, 32], strides = [1, 1]} : vector<2x64xf32> to vector<2x32xf32>
    %175 = vector.extract_strided_slice %172 {offsets = [0, 0], sizes = [2, 32], strides = [1, 1]} : vector<2x96xf32> to vector<2x32xf32>
    %176 = vector.extract_strided_slice %173 {offsets = [0, 0], sizes = [2, 32], strides = [1, 1]} : vector<2x96xf32> to vector<2x32xf32>
    %177 = arith.addf %175, %176 : vector<2x32xf32>
    %178 = arith.negf %177 : vector<2x32xf32>
    %179 = math.exp %178 : vector<2x32xf32>
    %cst_26 = arith.constant 1.000000e+00 : f32
    %180 = vector.broadcast %cst_26 : f32 to vector<2x32xf32>
    %181 = arith.addf %180, %179 : vector<2x32xf32>
    %182 = arith.divf %180, %181 : vector<2x32xf32>
    %183 = vector.extract_strided_slice %172 {offsets = [0, 32], sizes = [2, 32], strides = [1, 1]} : vector<2x96xf32> to vector<2x32xf32>
    %184 = vector.extract_strided_slice %173 {offsets = [0, 32], sizes = [2, 32], strides = [1, 1]} : vector<2x96xf32> to vector<2x32xf32>
    %185 = arith.addf %183, %184 : vector<2x32xf32>
    %186 = arith.negf %185 : vector<2x32xf32>
    %187 = math.exp %186 : vector<2x32xf32>
    %cst_27 = arith.constant 1.000000e+00 : f32
    %188 = vector.broadcast %cst_27 : f32 to vector<2x32xf32>
    %189 = arith.addf %188, %187 : vector<2x32xf32>
    %190 = arith.divf %188, %189 : vector<2x32xf32>
    %191 = vector.extract_strided_slice %172 {offsets = [0, 64], sizes = [2, 32], strides = [1, 1]} : vector<2x96xf32> to vector<2x32xf32>
    %192 = vector.extract_strided_slice %173 {offsets = [0, 64], sizes = [2, 32], strides = [1, 1]} : vector<2x96xf32> to vector<2x32xf32>
    %193 = arith.addf %192, %9 : vector<2x32xf32>
    %194 = arith.mulf %182, %193 : vector<2x32xf32>
    %195 = arith.addf %191, %194 : vector<2x32xf32>
    %196 = math.tanh %195 : vector<2x32xf32>
    %cst_28 = arith.constant 1.000000e+00 : f32
    %197 = vector.broadcast %cst_28 : f32 to vector<2x32xf32>
    %198 = arith.subf %197, %190 : vector<2x32xf32>
    %199 = arith.mulf %198, %196 : vector<2x32xf32>
    %200 = arith.mulf %190, %174 : vector<2x32xf32>
    %201 = arith.addf %199, %200 : vector<2x32xf32>
    %202 = tpu.concatenate %170, %201 in 1 : vector<2x32xf32>, vector<2x32xf32> -> vector<2x64xf32>
    %cst_29 = arith.constant dense<0.000000e+00> : vector<2x192xf32>
    %203 = tpu.matmul %202, %1, %cst_29 {dimension_numbers = #tpu.dot_dimension_numbers<[1], [0], [0], [1], [0, 0, 1, 1], [], []>} : vector<2x64xf32>, vector<64x192xf32>, vector<2x192xf32> -> vector<2x192xf32>
    %204 = vector.extract_strided_slice %0 {offsets = [0, 3, 0], sizes = [2, 1, 96], strides = [1, 1, 1]} : vector<2x8x192xf32> to vector<2x1x96xf32>
    %205 = vector.shape_cast %204 : vector<2x1x96xf32> to vector<2x96xf32>
    %206 = vector.extract_strided_slice %203 {offsets = [0, 0], sizes = [2, 96], strides = [1, 1]} : vector<2x192xf32> to vector<2x96xf32>
    %207 = vector.extract_strided_slice %202 {offsets = [0, 0], sizes = [2, 32], strides = [1, 1]} : vector<2x64xf32> to vector<2x32xf32>
    %208 = vector.extract_strided_slice %205 {offsets = [0, 0], sizes = [2, 32], strides = [1, 1]} : vector<2x96xf32> to vector<2x32xf32>
    %209 = vector.extract_strided_slice %206 {offsets = [0, 0], sizes = [2, 32], strides = [1, 1]} : vector<2x96xf32> to vector<2x32xf32>
    %210 = arith.addf %208, %209 : vector<2x32xf32>
    %211 = arith.negf %210 : vector<2x32xf32>
    %212 = math.exp %211 : vector<2x32xf32>
    %cst_30 = arith.constant 1.000000e+00 : f32
    %213 = vector.broadcast %cst_30 : f32 to vector<2x32xf32>
    %214 = arith.addf %213, %212 : vector<2x32xf32>
    %215 = arith.divf %213, %214 : vector<2x32xf32>
    %216 = vector.extract_strided_slice %205 {offsets = [0, 32], sizes = [2, 32], strides = [1, 1]} : vector<2x96xf32> to vector<2x32xf32>
    %217 = vector.extract_strided_slice %206 {offsets = [0, 32], sizes = [2, 32], strides = [1, 1]} : vector<2x96xf32> to vector<2x32xf32>
    %218 = arith.addf %216, %217 : vector<2x32xf32>
    %219 = arith.negf %218 : vector<2x32xf32>
    %220 = math.exp %219 : vector<2x32xf32>
    %cst_31 = arith.constant 1.000000e+00 : f32
    %221 = vector.broadcast %cst_31 : f32 to vector<2x32xf32>
    %222 = arith.addf %221, %220 : vector<2x32xf32>
    %223 = arith.divf %221, %222 : vector<2x32xf32>
    %224 = vector.extract_strided_slice %205 {offsets = [0, 64], sizes = [2, 32], strides = [1, 1]} : vector<2x96xf32> to vector<2x32xf32>
    %225 = vector.extract_strided_slice %206 {offsets = [0, 64], sizes = [2, 32], strides = [1, 1]} : vector<2x96xf32> to vector<2x32xf32>
    %226 = arith.addf %225, %5 : vector<2x32xf32>
    %227 = arith.mulf %215, %226 : vector<2x32xf32>
    %228 = arith.addf %224, %227 : vector<2x32xf32>
    %229 = math.tanh %228 : vector<2x32xf32>
    %cst_32 = arith.constant 1.000000e+00 : f32
    %230 = vector.broadcast %cst_32 : f32 to vector<2x32xf32>
    %231 = arith.subf %230, %223 : vector<2x32xf32>
    %232 = arith.mulf %231, %229 : vector<2x32xf32>
    %233 = arith.mulf %223, %207 : vector<2x32xf32>
    %234 = arith.addf %232, %233 : vector<2x32xf32>
    %235 = vector.extract_strided_slice %0 {offsets = [0, 4, 96], sizes = [2, 1, 96], strides = [1, 1, 1]} : vector<2x8x192xf32> to vector<2x1x96xf32>
    %236 = vector.shape_cast %235 : vector<2x1x96xf32> to vector<2x96xf32>
    %237 = vector.extract_strided_slice %203 {offsets = [0, 96], sizes = [2, 96], strides = [1, 1]} : vector<2x192xf32> to vector<2x96xf32>
    %238 = vector.extract_strided_slice %202 {offsets = [0, 32], sizes = [2, 32], strides = [1, 1]} : vector<2x64xf32> to vector<2x32xf32>
    %239 = vector.extract_strided_slice %236 {offsets = [0, 0], sizes = [2, 32], strides = [1, 1]} : vector<2x96xf32> to vector<2x32xf32>
    %240 = vector.extract_strided_slice %237 {offsets = [0, 0], sizes = [2, 32], strides = [1, 1]} : vector<2x96xf32> to vector<2x32xf32>
    %241 = arith.addf %239, %240 : vector<2x32xf32>
    %242 = arith.negf %241 : vector<2x32xf32>
    %243 = math.exp %242 : vector<2x32xf32>
    %cst_33 = arith.constant 1.000000e+00 : f32
    %244 = vector.broadcast %cst_33 : f32 to vector<2x32xf32>
    %245 = arith.addf %244, %243 : vector<2x32xf32>
    %246 = arith.divf %244, %245 : vector<2x32xf32>
    %247 = vector.extract_strided_slice %236 {offsets = [0, 32], sizes = [2, 32], strides = [1, 1]} : vector<2x96xf32> to vector<2x32xf32>
    %248 = vector.extract_strided_slice %237 {offsets = [0, 32], sizes = [2, 32], strides = [1, 1]} : vector<2x96xf32> to vector<2x32xf32>
    %249 = arith.addf %247, %248 : vector<2x32xf32>
    %250 = arith.negf %249 : vector<2x32xf32>
    %251 = math.exp %250 : vector<2x32xf32>
    %cst_34 = arith.constant 1.000000e+00 : f32
    %252 = vector.broadcast %cst_34 : f32 to vector<2x32xf32>
    %253 = arith.addf %252, %251 : vector<2x32xf32>
    %254 = arith.divf %252, %253 : vector<2x32xf32>
    %255 = vector.extract_strided_slice %236 {offsets = [0, 64], sizes = [2, 32], strides = [1, 1]} : vector<2x96xf32> to vector<2x32xf32>
    %256 = vector.extract_strided_slice %237 {offsets = [0, 64], sizes = [2, 32], strides = [1, 1]} : vector<2x96xf32> to vector<2x32xf32>
    %257 = arith.addf %256, %9 : vector<2x32xf32>
    %258 = arith.mulf %246, %257 : vector<2x32xf32>
    %259 = arith.addf %255, %258 : vector<2x32xf32>
    %260 = math.tanh %259 : vector<2x32xf32>
    %cst_35 = arith.constant 1.000000e+00 : f32
    %261 = vector.broadcast %cst_35 : f32 to vector<2x32xf32>
    %262 = arith.subf %261, %254 : vector<2x32xf32>
    %263 = arith.mulf %262, %260 : vector<2x32xf32>
    %264 = arith.mulf %254, %238 : vector<2x32xf32>
    %265 = arith.addf %263, %264 : vector<2x32xf32>
    %266 = tpu.concatenate %234, %265 in 1 : vector<2x32xf32>, vector<2x32xf32> -> vector<2x64xf32>
    %cst_36 = arith.constant dense<0.000000e+00> : vector<2x192xf32>
    %267 = tpu.matmul %266, %1, %cst_36 {dimension_numbers = #tpu.dot_dimension_numbers<[1], [0], [0], [1], [0, 0, 1, 1], [], []>} : vector<2x64xf32>, vector<64x192xf32>, vector<2x192xf32> -> vector<2x192xf32>
    %268 = vector.extract_strided_slice %0 {offsets = [0, 4, 0], sizes = [2, 1, 96], strides = [1, 1, 1]} : vector<2x8x192xf32> to vector<2x1x96xf32>
    %269 = vector.shape_cast %268 : vector<2x1x96xf32> to vector<2x96xf32>
    %270 = vector.extract_strided_slice %267 {offsets = [0, 0], sizes = [2, 96], strides = [1, 1]} : vector<2x192xf32> to vector<2x96xf32>
    %271 = vector.extract_strided_slice %266 {offsets = [0, 0], sizes = [2, 32], strides = [1, 1]} : vector<2x64xf32> to vector<2x32xf32>
    %272 = vector.extract_strided_slice %269 {offsets = [0, 0], sizes = [2, 32], strides = [1, 1]} : vector<2x96xf32> to vector<2x32xf32>
    %273 = vector.extract_strided_slice %270 {offsets = [0, 0], sizes = [2, 32], strides = [1, 1]} : vector<2x96xf32> to vector<2x32xf32>
    %274 = arith.addf %272, %273 : vector<2x32xf32>
    %275 = arith.negf %274 : vector<2x32xf32>
    %276 = math.exp %275 : vector<2x32xf32>
    %cst_37 = arith.constant 1.000000e+00 : f32
    %277 = vector.broadcast %cst_37 : f32 to vector<2x32xf32>
    %278 = arith.addf %277, %276 : vector<2x32xf32>
    %279 = arith.divf %277, %278 : vector<2x32xf32>
    %280 = vector.extract_strided_slice %269 {offsets = [0, 32], sizes = [2, 32], strides = [1, 1]} : vector<2x96xf32> to vector<2x32xf32>
    %281 = vector.extract_strided_slice %270 {offsets = [0, 32], sizes = [2, 32], strides = [1, 1]} : vector<2x96xf32> to vector<2x32xf32>
    %282 = arith.addf %280, %281 : vector<2x32xf32>
    %283 = arith.negf %282 : vector<2x32xf32>
    %284 = math.exp %283 : vector<2x32xf32>
    %cst_38 = arith.constant 1.000000e+00 : f32
    %285 = vector.broadcast %cst_38 : f32 to vector<2x32xf32>
    %286 = arith.addf %285, %284 : vector<2x32xf32>
    %287 = arith.divf %285, %286 : vector<2x32xf32>
    %288 = vector.extract_strided_slice %269 {offsets = [0, 64], sizes = [2, 32], strides = [1, 1]} : vector<2x96xf32> to vector<2x32xf32>
    %289 = vector.extract_strided_slice %270 {offsets = [0, 64], sizes = [2, 32], strides = [1, 1]} : vector<2x96xf32> to vector<2x32xf32>
    %290 = arith.addf %289, %5 : vector<2x32xf32>
    %291 = arith.mulf %279, %290 : vector<2x32xf32>
    %292 = arith.addf %288, %291 : vector<2x32xf32>
    %293 = math.tanh %292 : vector<2x32xf32>
    %cst_39 = arith.constant 1.000000e+00 : f32
    %294 = vector.broadcast %cst_39 : f32 to vector<2x32xf32>
    %295 = arith.subf %294, %287 : vector<2x32xf32>
    %296 = arith.mulf %295, %293 : vector<2x32xf32>
    %297 = arith.mulf %287, %271 : vector<2x32xf32>
    %298 = arith.addf %296, %297 : vector<2x32xf32>
    %299 = vector.extract_strided_slice %0 {offsets = [0, 3, 96], sizes = [2, 1, 96], strides = [1, 1, 1]} : vector<2x8x192xf32> to vector<2x1x96xf32>
    %300 = vector.shape_cast %299 : vector<2x1x96xf32> to vector<2x96xf32>
    %301 = vector.extract_strided_slice %267 {offsets = [0, 96], sizes = [2, 96], strides = [1, 1]} : vector<2x192xf32> to vector<2x96xf32>
    %302 = vector.extract_strided_slice %266 {offsets = [0, 32], sizes = [2, 32], strides = [1, 1]} : vector<2x64xf32> to vector<2x32xf32>
    %303 = vector.extract_strided_slice %300 {offsets = [0, 0], sizes = [2, 32], strides = [1, 1]} : vector<2x96xf32> to vector<2x32xf32>
    %304 = vector.extract_strided_slice %301 {offsets = [0, 0], sizes = [2, 32], strides = [1, 1]} : vector<2x96xf32> to vector<2x32xf32>
    %305 = arith.addf %303, %304 : vector<2x32xf32>
    %306 = arith.negf %305 : vector<2x32xf32>
    %307 = math.exp %306 : vector<2x32xf32>
    %cst_40 = arith.constant 1.000000e+00 : f32
    %308 = vector.broadcast %cst_40 : f32 to vector<2x32xf32>
    %309 = arith.addf %308, %307 : vector<2x32xf32>
    %310 = arith.divf %308, %309 : vector<2x32xf32>
    %311 = vector.extract_strided_slice %300 {offsets = [0, 32], sizes = [2, 32], strides = [1, 1]} : vector<2x96xf32> to vector<2x32xf32>
    %312 = vector.extract_strided_slice %301 {offsets = [0, 32], sizes = [2, 32], strides = [1, 1]} : vector<2x96xf32> to vector<2x32xf32>
    %313 = arith.addf %311, %312 : vector<2x32xf32>
    %314 = arith.negf %313 : vector<2x32xf32>
    %315 = math.exp %314 : vector<2x32xf32>
    %cst_41 = arith.constant 1.000000e+00 : f32
    %316 = vector.broadcast %cst_41 : f32 to vector<2x32xf32>
    %317 = arith.addf %316, %315 : vector<2x32xf32>
    %318 = arith.divf %316, %317 : vector<2x32xf32>
    %319 = vector.extract_strided_slice %300 {offsets = [0, 64], sizes = [2, 32], strides = [1, 1]} : vector<2x96xf32> to vector<2x32xf32>
    %320 = vector.extract_strided_slice %301 {offsets = [0, 64], sizes = [2, 32], strides = [1, 1]} : vector<2x96xf32> to vector<2x32xf32>
    %321 = arith.addf %320, %9 : vector<2x32xf32>
    %322 = arith.mulf %310, %321 : vector<2x32xf32>
    %323 = arith.addf %319, %322 : vector<2x32xf32>
    %324 = math.tanh %323 : vector<2x32xf32>
    %cst_42 = arith.constant 1.000000e+00 : f32
    %325 = vector.broadcast %cst_42 : f32 to vector<2x32xf32>
    %326 = arith.subf %325, %318 : vector<2x32xf32>
    %327 = arith.mulf %326, %324 : vector<2x32xf32>
    %328 = arith.mulf %318, %302 : vector<2x32xf32>
    %329 = arith.addf %327, %328 : vector<2x32xf32>
    %330 = tpu.concatenate %298, %329 in 1 : vector<2x32xf32>, vector<2x32xf32> -> vector<2x64xf32>
    %cst_43 = arith.constant dense<0.000000e+00> : vector<2x192xf32>
    %331 = tpu.matmul %330, %1, %cst_43 {dimension_numbers = #tpu.dot_dimension_numbers<[1], [0], [0], [1], [0, 0, 1, 1], [], []>} : vector<2x64xf32>, vector<64x192xf32>, vector<2x192xf32> -> vector<2x192xf32>
    %332 = vector.extract_strided_slice %0 {offsets = [0, 5, 0], sizes = [2, 1, 96], strides = [1, 1, 1]} : vector<2x8x192xf32> to vector<2x1x96xf32>
    %333 = vector.shape_cast %332 : vector<2x1x96xf32> to vector<2x96xf32>
    %334 = vector.extract_strided_slice %331 {offsets = [0, 0], sizes = [2, 96], strides = [1, 1]} : vector<2x192xf32> to vector<2x96xf32>
    %335 = vector.extract_strided_slice %330 {offsets = [0, 0], sizes = [2, 32], strides = [1, 1]} : vector<2x64xf32> to vector<2x32xf32>
    %336 = vector.extract_strided_slice %333 {offsets = [0, 0], sizes = [2, 32], strides = [1, 1]} : vector<2x96xf32> to vector<2x32xf32>
    %337 = vector.extract_strided_slice %334 {offsets = [0, 0], sizes = [2, 32], strides = [1, 1]} : vector<2x96xf32> to vector<2x32xf32>
    %338 = arith.addf %336, %337 : vector<2x32xf32>
    %339 = arith.negf %338 : vector<2x32xf32>
    %340 = math.exp %339 : vector<2x32xf32>
    %cst_44 = arith.constant 1.000000e+00 : f32
    %341 = vector.broadcast %cst_44 : f32 to vector<2x32xf32>
    %342 = arith.addf %341, %340 : vector<2x32xf32>
    %343 = arith.divf %341, %342 : vector<2x32xf32>
    %344 = vector.extract_strided_slice %333 {offsets = [0, 32], sizes = [2, 32], strides = [1, 1]} : vector<2x96xf32> to vector<2x32xf32>
    %345 = vector.extract_strided_slice %334 {offsets = [0, 32], sizes = [2, 32], strides = [1, 1]} : vector<2x96xf32> to vector<2x32xf32>
    %346 = arith.addf %344, %345 : vector<2x32xf32>
    %347 = arith.negf %346 : vector<2x32xf32>
    %348 = math.exp %347 : vector<2x32xf32>
    %cst_45 = arith.constant 1.000000e+00 : f32
    %349 = vector.broadcast %cst_45 : f32 to vector<2x32xf32>
    %350 = arith.addf %349, %348 : vector<2x32xf32>
    %351 = arith.divf %349, %350 : vector<2x32xf32>
    %352 = vector.extract_strided_slice %333 {offsets = [0, 64], sizes = [2, 32], strides = [1, 1]} : vector<2x96xf32> to vector<2x32xf32>
    %353 = vector.extract_strided_slice %334 {offsets = [0, 64], sizes = [2, 32], strides = [1, 1]} : vector<2x96xf32> to vector<2x32xf32>
    %354 = arith.addf %353, %5 : vector<2x32xf32>
    %355 = arith.mulf %343, %354 : vector<2x32xf32>
    %356 = arith.addf %352, %355 : vector<2x32xf32>
    %357 = math.tanh %356 : vector<2x32xf32>
    %cst_46 = arith.constant 1.000000e+00 : f32
    %358 = vector.broadcast %cst_46 : f32 to vector<2x32xf32>
    %359 = arith.subf %358, %351 : vector<2x32xf32>
    %360 = arith.mulf %359, %357 : vector<2x32xf32>
    %361 = arith.mulf %351, %335 : vector<2x32xf32>
    %362 = arith.addf %360, %361 : vector<2x32xf32>
    %363 = vector.extract_strided_slice %0 {offsets = [0, 2, 96], sizes = [2, 1, 96], strides = [1, 1, 1]} : vector<2x8x192xf32> to vector<2x1x96xf32>
    %364 = vector.shape_cast %363 : vector<2x1x96xf32> to vector<2x96xf32>
    %365 = vector.extract_strided_slice %331 {offsets = [0, 96], sizes = [2, 96], strides = [1, 1]} : vector<2x192xf32> to vector<2x96xf32>
    %366 = vector.extract_strided_slice %330 {offsets = [0, 32], sizes = [2, 32], strides = [1, 1]} : vector<2x64xf32> to vector<2x32xf32>
    %367 = vector.extract_strided_slice %364 {offsets = [0, 0], sizes = [2, 32], strides = [1, 1]} : vector<2x96xf32> to vector<2x32xf32>
    %368 = vector.extract_strided_slice %365 {offsets = [0, 0], sizes = [2, 32], strides = [1, 1]} : vector<2x96xf32> to vector<2x32xf32>
    %369 = arith.addf %367, %368 : vector<2x32xf32>
    %370 = arith.negf %369 : vector<2x32xf32>
    %371 = math.exp %370 : vector<2x32xf32>
    %cst_47 = arith.constant 1.000000e+00 : f32
    %372 = vector.broadcast %cst_47 : f32 to vector<2x32xf32>
    %373 = arith.addf %372, %371 : vector<2x32xf32>
    %374 = arith.divf %372, %373 : vector<2x32xf32>
    %375 = vector.extract_strided_slice %364 {offsets = [0, 32], sizes = [2, 32], strides = [1, 1]} : vector<2x96xf32> to vector<2x32xf32>
    %376 = vector.extract_strided_slice %365 {offsets = [0, 32], sizes = [2, 32], strides = [1, 1]} : vector<2x96xf32> to vector<2x32xf32>
    %377 = arith.addf %375, %376 : vector<2x32xf32>
    %378 = arith.negf %377 : vector<2x32xf32>
    %379 = math.exp %378 : vector<2x32xf32>
    %cst_48 = arith.constant 1.000000e+00 : f32
    %380 = vector.broadcast %cst_48 : f32 to vector<2x32xf32>
    %381 = arith.addf %380, %379 : vector<2x32xf32>
    %382 = arith.divf %380, %381 : vector<2x32xf32>
    %383 = vector.extract_strided_slice %364 {offsets = [0, 64], sizes = [2, 32], strides = [1, 1]} : vector<2x96xf32> to vector<2x32xf32>
    %384 = vector.extract_strided_slice %365 {offsets = [0, 64], sizes = [2, 32], strides = [1, 1]} : vector<2x96xf32> to vector<2x32xf32>
    %385 = arith.addf %384, %9 : vector<2x32xf32>
    %386 = arith.mulf %374, %385 : vector<2x32xf32>
    %387 = arith.addf %383, %386 : vector<2x32xf32>
    %388 = math.tanh %387 : vector<2x32xf32>
    %cst_49 = arith.constant 1.000000e+00 : f32
    %389 = vector.broadcast %cst_49 : f32 to vector<2x32xf32>
    %390 = arith.subf %389, %382 : vector<2x32xf32>
    %391 = arith.mulf %390, %388 : vector<2x32xf32>
    %392 = arith.mulf %382, %366 : vector<2x32xf32>
    %393 = arith.addf %391, %392 : vector<2x32xf32>
    %394 = tpu.concatenate %362, %393 in 1 : vector<2x32xf32>, vector<2x32xf32> -> vector<2x64xf32>
    %cst_50 = arith.constant dense<0.000000e+00> : vector<2x192xf32>
    %395 = tpu.matmul %394, %1, %cst_50 {dimension_numbers = #tpu.dot_dimension_numbers<[1], [0], [0], [1], [0, 0, 1, 1], [], []>} : vector<2x64xf32>, vector<64x192xf32>, vector<2x192xf32> -> vector<2x192xf32>
    %396 = vector.extract_strided_slice %0 {offsets = [0, 6, 0], sizes = [2, 1, 96], strides = [1, 1, 1]} : vector<2x8x192xf32> to vector<2x1x96xf32>
    %397 = vector.shape_cast %396 : vector<2x1x96xf32> to vector<2x96xf32>
    %398 = vector.extract_strided_slice %395 {offsets = [0, 0], sizes = [2, 96], strides = [1, 1]} : vector<2x192xf32> to vector<2x96xf32>
    %399 = vector.extract_strided_slice %394 {offsets = [0, 0], sizes = [2, 32], strides = [1, 1]} : vector<2x64xf32> to vector<2x32xf32>
    %400 = vector.extract_strided_slice %397 {offsets = [0, 0], sizes = [2, 32], strides = [1, 1]} : vector<2x96xf32> to vector<2x32xf32>
    %401 = vector.extract_strided_slice %398 {offsets = [0, 0], sizes = [2, 32], strides = [1, 1]} : vector<2x96xf32> to vector<2x32xf32>
    %402 = arith.addf %400, %401 : vector<2x32xf32>
    %403 = arith.negf %402 : vector<2x32xf32>
    %404 = math.exp %403 : vector<2x32xf32>
    %cst_51 = arith.constant 1.000000e+00 : f32
    %405 = vector.broadcast %cst_51 : f32 to vector<2x32xf32>
    %406 = arith.addf %405, %404 : vector<2x32xf32>
    %407 = arith.divf %405, %406 : vector<2x32xf32>
    %408 = vector.extract_strided_slice %397 {offsets = [0, 32], sizes = [2, 32], strides = [1, 1]} : vector<2x96xf32> to vector<2x32xf32>
    %409 = vector.extract_strided_slice %398 {offsets = [0, 32], sizes = [2, 32], strides = [1, 1]} : vector<2x96xf32> to vector<2x32xf32>
    %410 = arith.addf %408, %409 : vector<2x32xf32>
    %411 = arith.negf %410 : vector<2x32xf32>
    %412 = math.exp %411 : vector<2x32xf32>
    %cst_52 = arith.constant 1.000000e+00 : f32
    %413 = vector.broadcast %cst_52 : f32 to vector<2x32xf32>
    %414 = arith.addf %413, %412 : vector<2x32xf32>
    %415 = arith.divf %413, %414 : vector<2x32xf32>
    %416 = vector.extract_strided_slice %397 {offsets = [0, 64], sizes = [2, 32], strides = [1, 1]} : vector<2x96xf32> to vector<2x32xf32>
    %417 = vector.extract_strided_slice %398 {offsets = [0, 64], sizes = [2, 32], strides = [1, 1]} : vector<2x96xf32> to vector<2x32xf32>
    %418 = arith.addf %417, %5 : vector<2x32xf32>
    %419 = arith.mulf %407, %418 : vector<2x32xf32>
    %420 = arith.addf %416, %419 : vector<2x32xf32>
    %421 = math.tanh %420 : vector<2x32xf32>
    %cst_53 = arith.constant 1.000000e+00 : f32
    %422 = vector.broadcast %cst_53 : f32 to vector<2x32xf32>
    %423 = arith.subf %422, %415 : vector<2x32xf32>
    %424 = arith.mulf %423, %421 : vector<2x32xf32>
    %425 = arith.mulf %415, %399 : vector<2x32xf32>
    %426 = arith.addf %424, %425 : vector<2x32xf32>
    %427 = vector.extract_strided_slice %0 {offsets = [0, 1, 96], sizes = [2, 1, 96], strides = [1, 1, 1]} : vector<2x8x192xf32> to vector<2x1x96xf32>
    %428 = vector.shape_cast %427 : vector<2x1x96xf32> to vector<2x96xf32>
    %429 = vector.extract_strided_slice %395 {offsets = [0, 96], sizes = [2, 96], strides = [1, 1]} : vector<2x192xf32> to vector<2x96xf32>
    %430 = vector.extract_strided_slice %394 {offsets = [0, 32], sizes = [2, 32], strides = [1, 1]} : vector<2x64xf32> to vector<2x32xf32>
    %431 = vector.extract_strided_slice %428 {offsets = [0, 0], sizes = [2, 32], strides = [1, 1]} : vector<2x96xf32> to vector<2x32xf32>
    %432 = vector.extract_strided_slice %429 {offsets = [0, 0], sizes = [2, 32], strides = [1, 1]} : vector<2x96xf32> to vector<2x32xf32>
    %433 = arith.addf %431, %432 : vector<2x32xf32>
    %434 = arith.negf %433 : vector<2x32xf32>
    %435 = math.exp %434 : vector<2x32xf32>
    %cst_54 = arith.constant 1.000000e+00 : f32
    %436 = vector.broadcast %cst_54 : f32 to vector<2x32xf32>
    %437 = arith.addf %436, %435 : vector<2x32xf32>
    %438 = arith.divf %436, %437 : vector<2x32xf32>
    %439 = vector.extract_strided_slice %428 {offsets = [0, 32], sizes = [2, 32], strides = [1, 1]} : vector<2x96xf32> to vector<2x32xf32>
    %440 = vector.extract_strided_slice %429 {offsets = [0, 32], sizes = [2, 32], strides = [1, 1]} : vector<2x96xf32> to vector<2x32xf32>
    %441 = arith.addf %439, %440 : vector<2x32xf32>
    %442 = arith.negf %441 : vector<2x32xf32>
    %443 = math.exp %442 : vector<2x32xf32>
    %cst_55 = arith.constant 1.000000e+00 : f32
    %444 = vector.broadcast %cst_55 : f32 to vector<2x32xf32>
    %445 = arith.addf %444, %443 : vector<2x32xf32>
    %446 = arith.divf %444, %445 : vector<2x32xf32>
    %447 = vector.extract_strided_slice %428 {offsets = [0, 64], sizes = [2, 32], strides = [1, 1]} : vector<2x96xf32> to vector<2x32xf32>
    %448 = vector.extract_strided_slice %429 {offsets = [0, 64], sizes = [2, 32], strides = [1, 1]} : vector<2x96xf32> to vector<2x32xf32>
    %449 = arith.addf %448, %9 : vector<2x32xf32>
    %450 = arith.mulf %438, %449 : vector<2x32xf32>
    %451 = arith.addf %447, %450 : vector<2x32xf32>
    %452 = math.tanh %451 : vector<2x32xf32>
    %cst_56 = arith.constant 1.000000e+00 : f32
    %453 = vector.broadcast %cst_56 : f32 to vector<2x32xf32>
    %454 = arith.subf %453, %446 : vector<2x32xf32>
    %455 = arith.mulf %454, %452 : vector<2x32xf32>
    %456 = arith.mulf %446, %430 : vector<2x32xf32>
    %457 = arith.addf %455, %456 : vector<2x32xf32>
    %458 = tpu.concatenate %426, %457 in 1 : vector<2x32xf32>, vector<2x32xf32> -> vector<2x64xf32>
    %cst_57 = arith.constant dense<0.000000e+00> : vector<2x192xf32>
    %459 = tpu.matmul %458, %1, %cst_57 {dimension_numbers = #tpu.dot_dimension_numbers<[1], [0], [0], [1], [0, 0, 1, 1], [], []>} : vector<2x64xf32>, vector<64x192xf32>, vector<2x192xf32> -> vector<2x192xf32>
    %460 = vector.extract_strided_slice %0 {offsets = [0, 7, 0], sizes = [2, 1, 96], strides = [1, 1, 1]} : vector<2x8x192xf32> to vector<2x1x96xf32>
    %461 = vector.shape_cast %460 : vector<2x1x96xf32> to vector<2x96xf32>
    %462 = vector.extract_strided_slice %459 {offsets = [0, 0], sizes = [2, 96], strides = [1, 1]} : vector<2x192xf32> to vector<2x96xf32>
    %463 = vector.extract_strided_slice %458 {offsets = [0, 0], sizes = [2, 32], strides = [1, 1]} : vector<2x64xf32> to vector<2x32xf32>
    %464 = vector.extract_strided_slice %461 {offsets = [0, 0], sizes = [2, 32], strides = [1, 1]} : vector<2x96xf32> to vector<2x32xf32>
    %465 = vector.extract_strided_slice %462 {offsets = [0, 0], sizes = [2, 32], strides = [1, 1]} : vector<2x96xf32> to vector<2x32xf32>
    %466 = arith.addf %464, %465 : vector<2x32xf32>
    %467 = arith.negf %466 : vector<2x32xf32>
    %468 = math.exp %467 : vector<2x32xf32>
    %cst_58 = arith.constant 1.000000e+00 : f32
    %469 = vector.broadcast %cst_58 : f32 to vector<2x32xf32>
    %470 = arith.addf %469, %468 : vector<2x32xf32>
    %471 = arith.divf %469, %470 : vector<2x32xf32>
    %472 = vector.extract_strided_slice %461 {offsets = [0, 32], sizes = [2, 32], strides = [1, 1]} : vector<2x96xf32> to vector<2x32xf32>
    %473 = vector.extract_strided_slice %462 {offsets = [0, 32], sizes = [2, 32], strides = [1, 1]} : vector<2x96xf32> to vector<2x32xf32>
    %474 = arith.addf %472, %473 : vector<2x32xf32>
    %475 = arith.negf %474 : vector<2x32xf32>
    %476 = math.exp %475 : vector<2x32xf32>
    %cst_59 = arith.constant 1.000000e+00 : f32
    %477 = vector.broadcast %cst_59 : f32 to vector<2x32xf32>
    %478 = arith.addf %477, %476 : vector<2x32xf32>
    %479 = arith.divf %477, %478 : vector<2x32xf32>
    %480 = vector.extract_strided_slice %461 {offsets = [0, 64], sizes = [2, 32], strides = [1, 1]} : vector<2x96xf32> to vector<2x32xf32>
    %481 = vector.extract_strided_slice %462 {offsets = [0, 64], sizes = [2, 32], strides = [1, 1]} : vector<2x96xf32> to vector<2x32xf32>
    %482 = arith.addf %481, %5 : vector<2x32xf32>
    %483 = arith.mulf %471, %482 : vector<2x32xf32>
    %484 = arith.addf %480, %483 : vector<2x32xf32>
    %485 = math.tanh %484 : vector<2x32xf32>
    %cst_60 = arith.constant 1.000000e+00 : f32
    %486 = vector.broadcast %cst_60 : f32 to vector<2x32xf32>
    %487 = arith.subf %486, %479 : vector<2x32xf32>
    %488 = arith.mulf %487, %485 : vector<2x32xf32>
    %489 = arith.mulf %479, %463 : vector<2x32xf32>
    %490 = arith.addf %488, %489 : vector<2x32xf32>
    %491 = vector.extract_strided_slice %0 {offsets = [0, 0, 96], sizes = [2, 1, 96], strides = [1, 1, 1]} : vector<2x8x192xf32> to vector<2x1x96xf32>
    %492 = vector.shape_cast %491 : vector<2x1x96xf32> to vector<2x96xf32>
    %493 = vector.extract_strided_slice %459 {offsets = [0, 96], sizes = [2, 96], strides = [1, 1]} : vector<2x192xf32> to vector<2x96xf32>
    %494 = vector.extract_strided_slice %458 {offsets = [0, 32], sizes = [2, 32], strides = [1, 1]} : vector<2x64xf32> to vector<2x32xf32>
    %495 = vector.extract_strided_slice %492 {offsets = [0, 0], sizes = [2, 32], strides = [1, 1]} : vector<2x96xf32> to vector<2x32xf32>
    %496 = vector.extract_strided_slice %493 {offsets = [0, 0], sizes = [2, 32], strides = [1, 1]} : vector<2x96xf32> to vector<2x32xf32>
    %497 = arith.addf %495, %496 : vector<2x32xf32>
    %498 = arith.negf %497 : vector<2x32xf32>
    %499 = math.exp %498 : vector<2x32xf32>
    %cst_61 = arith.constant 1.000000e+00 : f32
    %500 = vector.broadcast %cst_61 : f32 to vector<2x32xf32>
    %501 = arith.addf %500, %499 : vector<2x32xf32>
    %502 = arith.divf %500, %501 : vector<2x32xf32>
    %503 = vector.extract_strided_slice %492 {offsets = [0, 32], sizes = [2, 32], strides = [1, 1]} : vector<2x96xf32> to vector<2x32xf32>
    %504 = vector.extract_strided_slice %493 {offsets = [0, 32], sizes = [2, 32], strides = [1, 1]} : vector<2x96xf32> to vector<2x32xf32>
    %505 = arith.addf %503, %504 : vector<2x32xf32>
    %506 = arith.negf %505 : vector<2x32xf32>
    %507 = math.exp %506 : vector<2x32xf32>
    %cst_62 = arith.constant 1.000000e+00 : f32
    %508 = vector.broadcast %cst_62 : f32 to vector<2x32xf32>
    %509 = arith.addf %508, %507 : vector<2x32xf32>
    %510 = arith.divf %508, %509 : vector<2x32xf32>
    %511 = vector.extract_strided_slice %492 {offsets = [0, 64], sizes = [2, 32], strides = [1, 1]} : vector<2x96xf32> to vector<2x32xf32>
    %512 = vector.extract_strided_slice %493 {offsets = [0, 64], sizes = [2, 32], strides = [1, 1]} : vector<2x96xf32> to vector<2x32xf32>
    %513 = arith.addf %512, %9 : vector<2x32xf32>
    %514 = arith.mulf %502, %513 : vector<2x32xf32>
    %515 = arith.addf %511, %514 : vector<2x32xf32>
    %516 = math.tanh %515 : vector<2x32xf32>
    %cst_63 = arith.constant 1.000000e+00 : f32
    %517 = vector.broadcast %cst_63 : f32 to vector<2x32xf32>
    %518 = arith.subf %517, %510 : vector<2x32xf32>
    %519 = arith.mulf %518, %516 : vector<2x32xf32>
    %520 = arith.mulf %510, %494 : vector<2x32xf32>
    %521 = arith.addf %519, %520 : vector<2x32xf32>
    %522 = vector.shape_cast %42 : vector<2x32xf32> to vector<2x1x32xf32>
    %523 = vector.shape_cast %106 : vector<2x32xf32> to vector<2x1x32xf32>
    %524 = vector.shape_cast %170 : vector<2x32xf32> to vector<2x1x32xf32>
    %525 = vector.shape_cast %234 : vector<2x32xf32> to vector<2x1x32xf32>
    %526 = vector.shape_cast %298 : vector<2x32xf32> to vector<2x1x32xf32>
    %527 = vector.shape_cast %362 : vector<2x32xf32> to vector<2x1x32xf32>
    %528 = vector.shape_cast %426 : vector<2x32xf32> to vector<2x1x32xf32>
    %529 = vector.shape_cast %490 : vector<2x32xf32> to vector<2x1x32xf32>
    %530 = tpu.concatenate %522, %523, %524, %525, %526, %527, %528, %529 in 1 : vector<2x1x32xf32>, vector<2x1x32xf32>, vector<2x1x32xf32>, vector<2x1x32xf32>, vector<2x1x32xf32>, vector<2x1x32xf32>, vector<2x1x32xf32>, vector<2x1x32xf32> -> vector<2x8x32xf32>
    %531 = vector.shape_cast %521 : vector<2x32xf32> to vector<2x1x32xf32>
    %532 = vector.shape_cast %457 : vector<2x32xf32> to vector<2x1x32xf32>
    %533 = vector.shape_cast %393 : vector<2x32xf32> to vector<2x1x32xf32>
    %534 = vector.shape_cast %329 : vector<2x32xf32> to vector<2x1x32xf32>
    %535 = vector.shape_cast %265 : vector<2x32xf32> to vector<2x1x32xf32>
    %536 = vector.shape_cast %201 : vector<2x32xf32> to vector<2x1x32xf32>
    %537 = vector.shape_cast %137 : vector<2x32xf32> to vector<2x1x32xf32>
    %538 = vector.shape_cast %73 : vector<2x32xf32> to vector<2x1x32xf32>
    %539 = tpu.concatenate %531, %532, %533, %534, %535, %536, %537, %538 in 1 : vector<2x1x32xf32>, vector<2x1x32xf32>, vector<2x1x32xf32>, vector<2x1x32xf32>, vector<2x1x32xf32>, vector<2x1x32xf32>, vector<2x1x32xf32>, vector<2x1x32xf32> -> vector<2x8x32xf32>
    %540 = tpu.concatenate %530, %539 in 2 : vector<2x8x32xf32>, vector<2x8x32xf32> -> vector<2x8x64xf32>
    %541 = vector.shape_cast %540 : vector<2x8x64xf32> to vector<16x64xf32>
    %c0_64 = arith.constant 0 : index
    %c0_65 = arith.constant 0 : index
    %542 = vector.load %arg4[%c0_64, %c0_65] : memref<1x64xf32, #tpu.memory_space<vmem>>, vector<1x64xf32>
    %c0_66 = arith.constant 0 : index
    %c0_67 = arith.constant 0 : index
    %543 = vector.load %arg5[%c0_66, %c0_67] : memref<1x64xf32, #tpu.memory_space<vmem>>, vector<1x64xf32>
    %cst_68 = arith.constant dense<0.000000e+00> : vector<16xf32>
    %544 = vector.multi_reduction <add>, %541, %cst_68 [1] : vector<16x64xf32> to vector<16xf32>
    %545 = vector.shape_cast %544 : vector<16xf32> to vector<16x1xf32>
    %cst_69 = arith.constant 6.400000e+01 : f32
    %546 = vector.broadcast %cst_69 : f32 to vector<16x1xf32>
    %547 = arith.divf %545, %546 : vector<16x1xf32>
    %548 = vector.broadcast %547 : vector<16x1xf32> to vector<16x64xf32>
    %549 = arith.subf %541, %548 : vector<16x64xf32>
    %550 = arith.mulf %549, %549 : vector<16x64xf32>
    %cst_70 = arith.constant dense<0.000000e+00> : vector<16xf32>
    %551 = vector.multi_reduction <add>, %550, %cst_70 [1] : vector<16x64xf32> to vector<16xf32>
    %552 = vector.shape_cast %551 : vector<16xf32> to vector<16x1xf32>
    %cst_71 = arith.constant 6.400000e+01 : f32
    %553 = vector.broadcast %cst_71 : f32 to vector<16x1xf32>
    %554 = arith.divf %552, %553 : vector<16x1xf32>
    %555 = vector.broadcast %547 : vector<16x1xf32> to vector<16x64xf32>
    %556 = arith.subf %541, %555 : vector<16x64xf32>
    %cst_72 = arith.constant 9.99999974E-6 : f32
    %557 = vector.broadcast %cst_72 : f32 to vector<16x1xf32>
    %558 = arith.addf %554, %557 : vector<16x1xf32>
    %559 = math.rsqrt %558 : vector<16x1xf32>
    %560 = vector.broadcast %559 : vector<16x1xf32> to vector<16x64xf32>
    %561 = arith.mulf %556, %560 : vector<16x64xf32>
    %562 = vector.broadcast %542 : vector<1x64xf32> to vector<16x64xf32>
    %563 = arith.mulf %561, %562 : vector<16x64xf32>
    %564 = vector.broadcast %543 : vector<1x64xf32> to vector<16x64xf32>
    %565 = arith.addf %563, %564 : vector<16x64xf32>
    %c0_73 = arith.constant 0 : index
    %c0_74 = arith.constant 0 : index
    %566 = vector.load %arg6[%c0_73, %c0_74] : memref<64x128xf32, #tpu.memory_space<vmem>>, vector<64x128xf32>
    %cst_75 = arith.constant dense<0.000000e+00> : vector<16x128xf32>
    %567 = tpu.matmul %565, %566, %cst_75 {dimension_numbers = #tpu.dot_dimension_numbers<[1], [0], [0], [1], [0, 0, 1, 1], [], []>} : vector<16x64xf32>, vector<64x128xf32>, vector<16x128xf32> -> vector<16x128xf32>
    %c0_76 = arith.constant 0 : index
    %c0_77 = arith.constant 0 : index
    %568 = vector.load %arg7[%c0_76, %c0_77] : memref<1x128xf32, #tpu.memory_space<vmem>>, vector<1x128xf32>
    %569 = vector.broadcast %568 : vector<1x128xf32> to vector<16x128xf32>
    %570 = arith.addf %567, %569 : vector<16x128xf32>
    %571 = vector.extract_strided_slice %570 {offsets = [0, 0], sizes = [16, 64], strides = [1, 1]} : vector<16x128xf32> to vector<16x64xf32>
    %572 = vector.shape_cast %571 : vector<16x64xf32> to vector<2x8x64xf32>
    %573 = vector.extract_strided_slice %570 {offsets = [0, 64], sizes = [16, 64], strides = [1, 1]} : vector<16x128xf32> to vector<16x64xf32>
    %574 = vector.shape_cast %573 : vector<16x64xf32> to vector<2x8x64xf32>
    %575 = vector.shape_cast %565 : vector<16x64xf32> to vector<2x8x64xf32>
    "tpu.trace_start"() <{level = 10 : i32, message = "bqd,bkd->bqk"}> : () -> ()
    %cst_78 = arith.constant dense<0.000000e+00> : vector<2x8x8xf32>
    %576 = tpu.matmul %572, %574, %cst_78 {dimension_numbers = #tpu.dot_dimension_numbers<[2], [2], [1], [1], [0, 0, 0, 1, 1, 1], [0], [0]>} : vector<2x8x64xf32>, vector<2x8x64xf32>, vector<2x8x8xf32> -> vector<2x8x8xf32>
    "tpu.trace_stop"() : () -> ()
    %cst_79 = arith.constant 1.250000e-01 : f32
    %577 = vector.broadcast %cst_79 : f32 to vector<2x8x8xf32>
    %578 = arith.mulf %576, %577 : vector<2x8x8xf32>
    %c0_80 = arith.constant 0 : index
    %c0_81 = arith.constant 0 : index
    %579 = vector.load %arg1[%c0_80, %c0_81] : memref<2x8xf32, #tpu.memory_space<vmem>>, vector<2x8xf32>
    %580 = vector.shape_cast %579 : vector<2x8xf32> to vector<2x8x1xf32>
    %cst_82 = arith.constant 5.000000e-01 : f32
    %581 = vector.broadcast %cst_82 : f32 to vector<2x8x1xf32>
    %582 = arith.cmpf ogt, %580, %581 : vector<2x8x1xf32>
    %cst_83 = arith.constant -1.000000e+05 : f32
    %583 = vector.shape_cast %582 : vector<2x8x1xi1> to vector<2x8x1xi1>
    %584 = vector.broadcast %583 : vector<2x8x1xi1> to vector<2x8x8xi1>
    %585 = vector.broadcast %cst_83 : f32 to vector<2x8x8xf32>
    %586 = arith.select %584, %578, %585 : vector<2x8x8xi1>, vector<2x8x8xf32>
    %cst_84 = arith.constant dense<0xFF800000> : vector<2x8xf32>
    %587 = vector.multi_reduction <maximumf>, %586, %cst_84 [2] : vector<2x8x8xf32> to vector<2x8xf32>
    %588 = vector.shape_cast %587 : vector<2x8xf32> to vector<2x8x1xf32>
    %589 = vector.broadcast %588 : vector<2x8x1xf32> to vector<2x8x8xf32>
    %590 = arith.subf %586, %589 : vector<2x8x8xf32>
    %591 = math.exp %590 : vector<2x8x8xf32>
    %cst_85 = arith.constant dense<0.000000e+00> : vector<2x8xf32>
    %592 = vector.multi_reduction <add>, %591, %cst_85 [2] : vector<2x8x8xf32> to vector<2x8xf32>
    %593 = vector.shape_cast %592 : vector<2x8xf32> to vector<2x8x1xf32>
    %594 = vector.broadcast %593 : vector<2x8x1xf32> to vector<2x8x8xf32>
    %595 = arith.divf %591, %594 : vector<2x8x8xf32>
    "tpu.trace_start"() <{level = 10 : i32, message = "bqk,bkd->bqd"}> : () -> ()
    %cst_86 = arith.constant dense<0.000000e+00> : vector<2x8x64xf32>
    %596 = tpu.matmul %595, %575, %cst_86 {dimension_numbers = #tpu.dot_dimension_numbers<[2], [1], [1], [2], [0, 0, 0, 1, 1, 2], [0], [0]>} : vector<2x8x8xf32>, vector<2x8x64xf32>, vector<2x8x64xf32> -> vector<2x8x64xf32>
    "tpu.trace_stop"() : () -> ()
    %597 = tpu.concatenate %596, %540 in 2 : vector<2x8x64xf32>, vector<2x8x64xf32> -> vector<2x8x128xf32>
    %598 = vector.shape_cast %597 : vector<2x8x128xf32> to vector<16x128xf32>
    %c0_87 = arith.constant 0 : index
    %c0_88 = arith.constant 0 : index
    %599 = vector.load %arg8[%c0_87, %c0_88] : memref<1x128xf32, #tpu.memory_space<vmem>>, vector<1x128xf32>
    %c0_89 = arith.constant 0 : index
    %c0_90 = arith.constant 0 : index
    %600 = vector.load %arg9[%c0_89, %c0_90] : memref<1x128xf32, #tpu.memory_space<vmem>>, vector<1x128xf32>
    %cst_91 = arith.constant dense<0.000000e+00> : vector<16xf32>
    %601 = vector.multi_reduction <add>, %598, %cst_91 [1] : vector<16x128xf32> to vector<16xf32>
    %602 = vector.shape_cast %601 : vector<16xf32> to vector<16x1xf32>
    %cst_92 = arith.constant 1.280000e+02 : f32
    %603 = vector.broadcast %cst_92 : f32 to vector<16x1xf32>
    %604 = arith.divf %602, %603 : vector<16x1xf32>
    %605 = vector.broadcast %604 : vector<16x1xf32> to vector<16x128xf32>
    %606 = arith.subf %598, %605 : vector<16x128xf32>
    %607 = arith.mulf %606, %606 : vector<16x128xf32>
    %cst_93 = arith.constant dense<0.000000e+00> : vector<16xf32>
    %608 = vector.multi_reduction <add>, %607, %cst_93 [1] : vector<16x128xf32> to vector<16xf32>
    %609 = vector.shape_cast %608 : vector<16xf32> to vector<16x1xf32>
    %cst_94 = arith.constant 1.280000e+02 : f32
    %610 = vector.broadcast %cst_94 : f32 to vector<16x1xf32>
    %611 = arith.divf %609, %610 : vector<16x1xf32>
    %612 = vector.broadcast %604 : vector<16x1xf32> to vector<16x128xf32>
    %613 = arith.subf %598, %612 : vector<16x128xf32>
    %cst_95 = arith.constant 9.99999974E-6 : f32
    %614 = vector.broadcast %cst_95 : f32 to vector<16x1xf32>
    %615 = arith.addf %611, %614 : vector<16x1xf32>
    %616 = math.rsqrt %615 : vector<16x1xf32>
    %617 = vector.broadcast %616 : vector<16x1xf32> to vector<16x128xf32>
    %618 = arith.mulf %613, %617 : vector<16x128xf32>
    %619 = vector.broadcast %599 : vector<1x128xf32> to vector<16x128xf32>
    %620 = arith.mulf %618, %619 : vector<16x128xf32>
    %621 = vector.broadcast %600 : vector<1x128xf32> to vector<16x128xf32>
    %622 = arith.addf %620, %621 : vector<16x128xf32>
    %c0_96 = arith.constant 0 : index
    %c0_97 = arith.constant 0 : index
    %623 = vector.load %arg10[%c0_96, %c0_97] : memref<128x128xf32, #tpu.memory_space<vmem>>, vector<128x128xf32>
    %cst_98 = arith.constant dense<0.000000e+00> : vector<16x128xf32>
    %624 = tpu.matmul %622, %623, %cst_98 {dimension_numbers = #tpu.dot_dimension_numbers<[1], [0], [0], [1], [0, 0, 1, 1], [], []>} : vector<16x128xf32>, vector<128x128xf32>, vector<16x128xf32> -> vector<16x128xf32>
    %c0_99 = arith.constant 0 : index
    %c0_100 = arith.constant 0 : index
    %625 = vector.load %arg11[%c0_99, %c0_100] : memref<1x128xf32, #tpu.memory_space<vmem>>, vector<1x128xf32>
    %626 = vector.broadcast %625 : vector<1x128xf32> to vector<16x128xf32>
    %627 = arith.addf %624, %626 : vector<16x128xf32>
    %628 = vector.shape_cast %627 : vector<16x128xf32> to vector<2x8x128xf32>
    %cst_101 = arith.constant dense<0xFF800000> : vector<8x128xf32>
    %629 = vector.multi_reduction <maximumf>, %628, %cst_101 [0] : vector<2x8x128xf32> to vector<8x128xf32>
    %630 = vector.shape_cast %629 : vector<8x128xf32> to vector<1x8x128xf32>
    %631 = vector.broadcast %630 : vector<1x8x128xf32> to vector<2x8x128xf32>
    %632 = arith.subf %628, %631 : vector<2x8x128xf32>
    %633 = math.exp %632 : vector<2x8x128xf32>
    %cst_102 = arith.constant dense<0.000000e+00> : vector<8x128xf32>
    %634 = vector.multi_reduction <add>, %633, %cst_102 [0] : vector<2x8x128xf32> to vector<8x128xf32>
    %635 = vector.shape_cast %634 : vector<8x128xf32> to vector<1x8x128xf32>
    %636 = vector.broadcast %635 : vector<1x8x128xf32> to vector<2x8x128xf32>
    %637 = arith.divf %633, %636 : vector<2x8x128xf32>
    %c0_103 = arith.constant 0 : index
    %c0_104 = arith.constant 0 : index
    %c0_105 = arith.constant 0 : index
    %638 = vector.load %arg12[%c0_103, %c0_104, %c0_105] : memref<2x8x128xf32, #tpu.memory_space<vmem>>, vector<2x8x128xf32>
    tpu.vector_store %arg12[%c0_103, %c0_104, %c0_105], %637 {strides = array<i32>} : memref<2x8x128xf32, #tpu.memory_space<vmem>>, vector<2x8x128xf32>,
    return
  }
}

</mosaic_0001>

<bundles_post_ra>
// kernel: net_forward.2
= control target key start
LH: loop header
LB: loop body
LE: loop exit
PB: predicated region body
PF: predicated region fallthrough
CT: control target
= control target key end

     0   :  { %s767_s15 = smov 0   ;;  %s866_s0 = inlined_call_operand.vmem [shape: bf16[16,16,32], index: 0, kind: input, shape index: {}]   ;;  %s867_s1 = inlined_call_operand.vmem [shape: f32[16,16], index: 1, kind: input, shape index: {}]   ;;  %s868_s2 = inlined_call_operand.vmem [shape: bf16[32,192], index: 2, kind: input, shape index: {}]   ;;  %s869_s3 = inlined_call_operand.vmem [shape: f32[1,192], index: 3, kind: input, shape index: {}]   ;;  %s870_s4 = inlined_call_operand.vmem [shape: f32[16,192], index: 4, kind: output, shape index: {}]  }
   0x1 LB: > { %s773_s16 = sadd.s32 4294967295, %s739_s15   ;;  %p661_p0 = scmp.ge.s32.totalorder %s739_s15, 1  ;;  %s739_s15 = sphi %s767_s15, %s14_s15  }
   0x2   : > { %p173_p1 = scmp.lt.s32.totalorder %s739_s15, 3 }
   0x4   : > { %p174_p2 = pnand %p661_p0, %p173_p1 }
   0x5   : > { %p211_p3 = scmp.lt.s32.totalorder (!%p174_p2), %s773_s16, 1  ;;  %v254_v0 = vlaneseq (!%p174_p2)  ;;  %vm431_vm0 = vcmask (!%p174_p2), 130048   ;;  %v725_v20 = vld [vmem:[%s868_s2 + $0x4] ss:$8 sps:$4 sm:$0xff] (!%p174_p2)   ;;  %v727_v21 = vld [vmem:[%s868_s2] ss:$8 sps:$4 sm:$0xff] (!%p174_p2)  }
   0x6   : > { %177 = sbr.rel (%p174_p2) target bundleno = 425 (0x1a9), region = 36  ;;  %v728_v22 = vld [vmem:[%s868_s2 + $0x14] ss:$8 sps:$4 sm:$0xff] (!%p174_p2)   ;;  %546 = vmatprep.subr.bf16.mxu0 (!%p174_p2), %v725_v20  ;;  %v741_v23 = vmov (!%p174_p2), 0   ;;  %v730_v24 = vld [vmem:[%s868_s2 + $0x10] ss:$8 sps:$4 sm:$0xff] (!%p174_p2)  }
   0x7   : > { %v781_v1 = vshrl.u32 (!%p174_p2), %v254_v0, 7  ;;  %578 = vmatprep.mubr.bf16.mxu0 (!%p174_p2), %v741_v23  ;;  %547 = vmatpush1.bf16.msra.mxu0 (!%p174_p2), %v727_v21  ;;  %s662_s30 = sshll.u32 (!%p174_p2), %s773_s16, 3  ;;  %vm358_vm1 = vcmask (!%p174_p2), 261120   ;;  %vm502_vm2 = vcmask (!%p174_p2), 1041409   ;;  %vm505_vm3 = vcmask (!%p174_p2), 1042434  }
   0x8   : > { %548 = vmatprep.subr.bf16.mxu0 (!%p174_p2), %v728_v22  ;;  %p205_p4 = scmp.lt.s32.totalorder (!%p174_p2), %s662_s30, 15  ;;  %vm508_vm4 = vcmask (!%p174_p2), 1043459   ;;  %vm511_vm5 = vcmask (!%p174_p2), 1044484   ;;  %vm514_vm6 = vcmask (!%p174_p2), 1045509   ;;  %vm517_vm7 = vcmask (!%p174_p2), 1046534  }
   0x9   : > { %v267_v2 = vsub.s32 (!%p174_p2), 1, %v781_v1  ;;  %v278_v3 = vsub.s32 (!%p174_p2), 2, %v781_v1  ;;  %v256_v8 = vsub.s32 (!%p174_p2), 0, %v781_v1  ;;  %v289_v10 = vsub.s32 (!%p174_p2), 3, %v781_v1 }
   0xa   : > { %v300_v12 = vsub.s32 (!%p174_p2), 4, %v781_v1  ;;  %v311_v14 = vsub.s32 (!%p174_p2), 5, %v781_v1  ;;  %v322_v16 = vsub.s32 (!%p174_p2), 6, %v781_v1  ;;  %v333_v18 = vsub.s32 (!%p174_p2), 7, %v781_v1 }
   0xb   : > { %549 = vmatpush1.bf16.msra.mxu0 (!%p174_p2), %v730_v24  ;;  %vm520_vm8 = vcmask (!%p174_p2), 1047559   ;;  %vm588_vm9 = vcmask (!%p174_p2), 523264  }
   0xd   : > { %s779_s17 = scalar_select %p211_p3, %s773_s16, 1 }
   0xe   : > { %s872_s30 = smov (!%p205_p4, %s662_s30), 15 }
   0xf   : > { %s665_s18 = sshll.u32 %s779_s17, 3  ;;  %s675_s5 = sshll.u32 %s872_s30, 3 }
  0x10   : > { %s214_s21 = scalar_lea.vmem %s867_s1, %s665_s18  ;;  %s815_s8 = scalar_lea.vmem %s866_s0, %s675_s5 }
  0x11   : > { %v253_v4 = vld [vmem:[%s214_s21] sm:$0xff]  ;;  %v710_v27 = vld [vmem:[%s815_s8 + $0x10] sm:$0xff]   ;;  %v711_v38 = vld [vmem:[%s815_s8 + $0x18] sm:$0xff]   ;;  %s676_s11 = sshll.u32 %s779_s17, 4 }
  0x12   : > { %v432_v5 = vsel %vm431_vm0, %v253_v4, 0.0  ;;  %v268_v6 = vrot.slane %v253_v4, %v267_v2  ;;  %v279_v7 = vrot.slane %v253_v4, %v278_v3  ;;  %v257_v9 = vrot.slane %v253_v4, %v256_v8  ;;  %v678_v28 = vld [vmem:[%s815_s8] sm:$0xff]   ;;  %v709_v51 = vld [vmem:[%s815_s8 + $0x8] sm:$0xff]   ;;  %s219_s14 = scalar_lea.vmem %s870_s4, %s676_s11 }
  0x13   : > { %433 = vadd.xlane.f32.xlu0 %v432_v5  ;;  %v290_v11 = vrot.slane %v253_v4, %v289_v10  ;;  %v301_v13 = vrot.slane %v253_v4, %v300_v12  ;;  %v312_v15 = vrot.slane %v253_v4, %v311_v14  ;;  %v323_v17 = vrot.slane %v253_v4, %v322_v16  ;;  %v712_v55 = vld [vmem:[%s815_s8 + $0x20] sm:$0xff]  }
  0x14   : > { %274 = vbcast.lane.b32.xlu1 %v268_v6, 264  ;;  %v334_v19 = vrot.slane %v253_v4, %v333_v18  ;;  %v687_v30 = vunpack.c.l.bf16 %v710_v27  ;;  %v688_v31 = vunpack.c.h.bf16 %v710_v27  ;;  %v679_v32 = vunpack.c.l.bf16 %v678_v28 }
  0x15   : > { %v680_v37 = vunpack.c.h.bf16 %v678_v28  ;;  %v691_v40 = vunpack.c.l.bf16 %v711_v38  ;;  %v692_v50 = vunpack.c.h.bf16 %v711_v38  ;;  %v684_v56 = vunpack.c.h.bf16 %v709_v51 }
  0x16   : > { %v683_v61 = vunpack.c.l.bf16 %v709_v51  ;;  %v696_v62 = vunpack.c.h.bf16 %v712_v55  ;;  %v695_v12 = vunpack.c.l.bf16 %v712_v55 }
  0x18   : > { %281 = vbcast.lane.b32.xlu1 %v279_v7, 256 }
  0x1c   : > { %285 = vbcast.lane.b32.xlu1 %v279_v7, 264 }
  0x20   : > { %259 = vbcast.lane.b32.xlu1 %v257_v9, 256 }
  0x24   : > { %263 = vbcast.lane.b32.xlu1 %v257_v9, 264 }
  0x28   : > { %292 = vbcast.lane.b32.xlu1 %v290_v11, 256 }
  0x29   : > { %270 = vbcast.lane.b32.xlu0 %v268_v6, 256  ;;  %v713_v6 = vld [vmem:[%s815_s8 + $0x28] sm:$0xff]  }
  0x2a   : > { %v700_v14 = vunpack.c.h.bf16 %v713_v6 }
  0x2c   : > { %296 = vbcast.lane.b32.xlu1 %v290_v11, 264 }
  0x2d   : > { %303 = vbcast.lane.b32.xlu0 %v301_v13, 256 }
  0x30   : > { %307 = vbcast.lane.b32.xlu1 %v301_v13, 264 }
  0x31   : > { %314 = vbcast.lane.b32.xlu0 %v312_v15, 256 }
  0x34   : > { %318 = vbcast.lane.b32.xlu1 %v312_v15, 264 }
  0x35   : > { %325 = vbcast.lane.b32.xlu0 %v323_v17, 256 }
  0x38   : > { %329 = vbcast.lane.b32.xlu1 %v323_v17, 264 }
  0x39   : > { %336 = vbcast.lane.b32.xlu0 %v334_v19, 256 }
  0x3c   : > { %340 = vbcast.lane.b32.xlu1 %v334_v19, 264  ;;  %v714_v19 = vld [vmem:[%s815_s8 + $0x30] sm:$0xff]  }
  0x86   : > { %v275_v25 = vpop.permute.xlu1 %274 }
  0x87   : > { %v345_v7 = vmul.f32 %v684_v56, %v275_v25  ;;  %v699_v25 = vunpack.c.l.bf16 %v713_v6 }
  0x89   : > { %v369_v20 = vsel %vm358_vm1, %v345_v7, 0.0 }
  0x8a   : > { %v282_v26 = vpop.permute.xlu1 %281 }
  0x8b   : > { %v346_v34 = vmul.f32 %v687_v30, %v282_v26 }
  0x8d   : > { %v377_v41 = vsel %vm358_vm1, %v346_v34, 0.0  ;;  %v715_v34 = vld [vmem:[%s815_s8 + $0x38] sm:$0xff]  }
  0x8e   : > { %v286_v29 = vpop.permute.xlu1 %285  ;;  %v707_v56 = vunpack.c.l.bf16 %v715_v34 }
  0x8f   : > { %v347_v35 = vmul.f32 %v688_v31, %v286_v29  ;;  %v704_v29 = vunpack.c.h.bf16 %v714_v19 }
  0x91   : > { %v378_v42 = vsel %vm358_vm1, %v347_v35, 0.0 }
  0x92   : > { %v260_v33 = vpop.permute.xlu1 %259  ;;  %v379_v46 = vadd.f32 %v378_v42, %v377_v41 }
  0x93   : > { %v342_v36 = vmul.f32 %v679_v32, %v260_v33 }
  0x94   : > { %v380_v52 = vrot.slane %v379_v46, 4 }
  0x95   : > { %v359_v43 = vsel %vm358_vm1, %v342_v36, 0.0 }
  0x96   : > { %v264_v39 = vpop.permute.xlu1 %263  ;;  %v381_v63 = vadd.f32 %v380_v52, %v379_v46 }
  0x97   : > { %v343_v44 = vmul.f32 %v680_v37, %v264_v39 }
  0x98   : > { %v382_v15 = vrot.slane %v381_v63, 2 }
  0x99   : > { %v360_v45 = vsel %vm358_vm1, %v343_v44, 0.0  ;;  %v708_v44 = vunpack.c.h.bf16 %v715_v34 }
  0x9a   : > { %v361_v47 = vadd.f32 %v360_v45, %v359_v43  ;;  %v293_v48 = vpop.permute.xlu1 %292  ;;  %v383_v30 = vadd.f32 %v382_v15, %v381_v63 }
  0x9b   : > { %v348_v49 = vmul.f32 %v691_v40, %v293_v48  ;;  %v703_v40 = vunpack.c.l.bf16 %v714_v19 }
  0x9c   : > { %v362_v53 = vrot.slane %v361_v47, 4  ;;  %v384_v45 = vrot.slane %v383_v30, 1 }
  0x9d   : > { %v386_v57 = vsel %vm358_vm1, %v348_v49, 0.0 }
  0x9e   : > { %v297_v54 = vpop.permute.xlu1 %296  ;;  %v363_v0 = vadd.f32 %v362_v53, %v361_v47 }
  0x9f   : > { %v349_v58 = vmul.f32 %v692_v50, %v297_v54 }
  0xa0   : > { %v434_v59 = vpop.xlane.xlu0 %433  ;;  %v364_v16 = vrot.slane %v363_v0, 2 }
  0xa1   : > { %v387_v60 = vsel %vm358_vm1, %v349_v58, 0.0  ;;  %v435_v4 = vadd.f32 1e-05, %v434_v59 }
  0xa2   : > { %v388_v3 = vadd.f32 %v387_v60, %v386_v57  ;;  %v308_v5 = vpop.permute.xlu1 %307  ;;  %v365_v31 = vadd.f32 %v364_v16, %v363_v0 }
  0xa3   : > { %v351_v13 = vmul.f32 %v696_v62, %v308_v5  ;;  %731 = vrcp.f32 %v435_v4 }
  0xa4   : > { %v389_v9 = vrot.slane %v388_v3, 4  ;;  %v271_v10 = vpop.permute.xlu0 %270  ;;  %v366_v46 = vrot.slane %v365_v31, 1 }
  0xa5   : > { %v344_v11 = vmul.f32 %v683_v61, %v271_v10  ;;  %v396_v27 = vsel %vm358_vm1, %v351_v13, 0.0  ;;  %v385_v61 = vadd.f32 %v384_v45, %v383_v30 }
  0xa6   : > { %v390_v17 = vadd.f32 %v389_v9, %v388_v3  ;;  %v319_v18 = vpop.permute.xlu1 %318  ;;  %v367_v62 = vadd.f32 %v366_v46, %v365_v31 }
  0xa7   : > { %v368_v21 = vsel %vm358_vm1, %v344_v11, 0.0  ;;  %v353_v28 = vmul.f32 %v700_v14, %v319_v18 }
  0xa8   : > { %v391_v22 = vrot.slane %v390_v17, 2  ;;  %v370_v23 = vadd.f32 %v369_v20, %v368_v21  ;;  %v304_v24 = vpop.permute.xlu0 %303 }
  0xa9   : > { %v350_v26 = vmul.f32 %v695_v12, %v304_v24  ;;  %v405_v42 = vsel %vm358_vm1, %v353_v28, 0.0 }
  0xaa   : > { %v371_v32 = vrot.slane %v370_v23, 4  ;;  %v330_v33 = vpop.permute.xlu1 %329  ;;  %v392_v35 = vadd.f32 %v391_v22, %v390_v17 }
  0xab   : > { %v395_v36 = vsel %vm358_vm1, %v350_v26, 0.0  ;;  %v355_v43 = vmul.f32 %v704_v29, %v330_v33 }
  0xac   : > { %v372_v37 = vadd.f32 %v371_v32, %v370_v23  ;;  %v397_v38 = vadd.f32 %v396_v27, %v395_v36  ;;  %v315_v39 = vpop.permute.xlu0 %314  ;;  %v393_v49 = vrot.slane %v392_v35, 1 }
  0xad   : > { %v352_v41 = vmul.f32 %v699_v25, %v315_v39  ;;  %v837_v52 = vpop.eup %731  ;;  %v414_v59 = vsel %vm358_vm1, %v355_v43, 0.0 }
  0xae   : > { %v373_v47 = vrot.slane %v372_v37, 2  ;;  %v341_v48 = vpop.permute.xlu1 %340  ;;  %v398_v50 = vrot.slane %v397_v38, 4  ;;  %v394_v3 = vadd.f32 %v393_v49, %v392_v35  ;;  %v439_v6 = vrot.slane %v837_v52, 2 }
  0xaf   : > { %v404_v51 = vsel %vm358_vm1, %v352_v41, 0.0  ;;  %v357_v60 = vmul.f32 %v708_v44, %v341_v48  ;;  %v438_v7 = vrot.slane %v837_v52, 1  ;;  %v440_v16 = vrot.slane %v837_v52, 3 }
  0xb0   : > { %v374_v53 = vadd.f32 %v373_v47, %v372_v37  ;;  %v406_v54 = vadd.f32 %v405_v42, %v404_v51  ;;  %v326_v55 = vpop.permute.xlu0 %325  ;;  %v399_v57 = vadd.f32 %v398_v50, %v397_v38  ;;  %v453_v20 = vmul.f32 %v837_v52, %v367_v62 }
  0xb1   : > { %v354_v58 = vmul.f32 %v703_v40, %v326_v55  ;;  %v423_v15 = vsel %vm358_vm1, %v357_v60, 0.0  ;;  %v455_v23 = vmul.f32 %v439_v6, %v385_v61  ;;  %v441_v28 = vrot.slane %v837_v52, 4 }
  0xb2   : > { %v375_v63 = vrot.slane %v374_v53, 1  ;;  %v407_v0 = vrot.slane %v406_v54, 4  ;;  %v400_v4 = vrot.slane %v399_v57, 2  ;;  %v456_v30 = vmul.f32 %v440_v16, %v394_v3 }
  0xb3   : > { %v413_v5 = vsel %vm358_vm1, %v354_v58, 0.0  ;;  %v442_v36 = vrot.slane %v837_v52, 5  ;;  %v463_v37 = vpack.c.bf16 %v455_v23, %v455_v23  ;;  %v461_v38 = vpack.c.bf16 %v453_v20, %v453_v20 }
  0xb4   : > { %v376_v9 = vadd.f32 %v375_v63, %v374_v53  ;;  %v408_v10 = vadd.f32 %v407_v0, %v406_v54  ;;  %v415_v11 = vadd.f32 %v414_v59, %v413_v5  ;;  %v337_v12 = vpop.permute.xlu0 %336  ;;  %v401_v13 = vadd.f32 %v400_v4, %v399_v57 }
  0xb5   : > { %v356_v14 = vmul.f32 %v707_v56, %v337_v12  ;;  %v464_v42 = vpack.c.bf16 %v456_v30, %v456_v30  ;;  %v443_v48 = vrot.slane %v837_v52, 6  ;;  %v495_v49 = vunpack.c.l.b16 %v463_v37 }
  0xb6   : > { %v454_v17 = vmul.f32 %v438_v7, %v376_v9  ;;  %v409_v18 = vrot.slane %v408_v10, 2  ;;  %v416_v19 = vrot.slane %v415_v11, 4  ;;  %v402_v21 = vrot.slane %v401_v13, 1 }
  0xb7   : > { %v422_v22 = vsel %vm358_vm1, %v356_v14, 0.0  ;;  %v493_v50 = vunpack.c.l.b16 %v461_v38  ;;  %v496_v58 = vunpack.c.l.b16 %v464_v42  ;;  %v504_v60 = vrot.slane %v495_v49, 6 }
  0xb8   : > { %v462_v24 = vpack.c.bf16 %v454_v17, %v454_v17  ;;  %v410_v25 = vadd.f32 %v409_v18, %v408_v10  ;;  %v417_v26 = vadd.f32 %v416_v19, %v415_v11  ;;  %v424_v27 = vadd.f32 %v423_v15, %v422_v22  ;;  %v473_v19 = vld [vmem:[%s869_s3] sm:$0x3] }
  0xb9   : > { %v403_v29 = vadd.f32 %v402_v21, %v401_v13  ;;  %v444_v63 = vrot.slane %v837_v52, 7  ;;  %v507_v6 = vrot.slane %v496_v58, 5  ;;  %v478_v20 = vrot.slane %v473_v19, %v256_v8 }
  0xba   : > { %v494_v31 = vunpack.c.l.b16 %v462_v24  ;;  %v411_v32 = vrot.slane %v410_v25, 1  ;;  %v418_v33 = vrot.slane %v417_v26, 2  ;;  %v425_v34 = vrot.slane %v424_v27, 4 }
  0xbb   : > { %v457_v35 = vmul.f32 %v441_v28, %v403_v29  ;;  %v482_v21 = vrot.slane %v473_v19, %v267_v2 }
  0xbc   : > { %v412_v39 = vadd.f32 %v411_v32, %v410_v25  ;;  %v419_v40 = vadd.f32 %v418_v33, %v417_v26  ;;  %v426_v41 = vadd.f32 %v425_v34, %v424_v27  ;;  %v501_v43 = vrot.slane %v494_v31, 7 }
  0xbd   : > { %v465_v47 = vpack.c.bf16 %v457_v35, %v457_v35 }
  0xbe   : > { %v458_v44 = vmul.f32 %v442_v36, %v412_v39  ;;  %v420_v45 = vrot.slane %v419_v40, 1  ;;  %v427_v46 = vrot.slane %v426_v41, 2  ;;  %v503_v55 = vsel %vm502_vm2, %v501_v43, %v493_v50 }
  0xbf   : > { %v497_v59 = vunpack.c.l.b16 %v465_v47  ;;  %v506_v3 = vsel %vm505_vm3, %v504_v60, %v503_v55 }
  0xc0   : > { %v466_v51 = vpack.c.bf16 %v458_v44, %v458_v44  ;;  %v421_v53 = vadd.f32 %v420_v45, %v419_v40  ;;  %v428_v54 = vadd.f32 %v427_v46, %v426_v41  ;;  %v509_v11 = vsel %vm508_vm4, %v507_v6, %v506_v3 }
  0xc1   : > { %v510_v7 = vrot.slane %v497_v59, 4 }
  0xc2   : > { %v459_v56 = vmul.f32 %v443_v48, %v421_v53  ;;  %v429_v57 = vrot.slane %v428_v54, 1  ;;  %v498_v61 = vunpack.c.l.b16 %v466_v51 }
  0xc3   : > { %v512_v14 = vsel %vm511_vm5, %v510_v7, %v509_v11 }
  0xc4   : > { %v467_v62 = vpack.c.bf16 %v459_v56, %v459_v56  ;;  %v430_v0 = vadd.f32 %v429_v57, %v428_v54  ;;  %v513_v9 = vrot.slane %v498_v61, 3 }
  0xc6   : > { %v499_v4 = vunpack.c.l.b16 %v467_v62  ;;  %v460_v5 = vmul.f32 %v444_v63, %v430_v0  ;;  %v515_v15 = vsel %vm514_vm6, %v513_v9, %v512_v14 }
  0xc8   : > { %v468_v10 = vpack.c.bf16 %v460_v5, %v460_v5  ;;  %v516_v12 = vrot.slane %v499_v4, 2 }
  0xca   : > { %v500_v13 = vunpack.c.l.b16 %v468_v10  ;;  %v518_v16 = vsel %vm517_vm7, %v516_v12, %v515_v15 }
  0xcc   : > { %v519_v52 = vrot.slane %v500_v13, 1 }
  0xce   : > { %v521_v17 = vsel %vm520_vm8, %v519_v52, %v518_v16 }
  0xcf   : > { %v522_v18 = vpack.c.b16 %v521_v17, %v521_v17 }
  0xd1   : > { %672 = vmatmul.mubr.msk.bf16.vlgmr.msra.gmra.mrb[0].mxu0 %vm358_vm1, %v522_v18 }
 0x1a4   : > { %v580_v22 = vpop.f32.mrb[0].mxu0 }
 0x1a5   : > { %v581_v23 = vadd.f32 %v580_v22, %v478_v20  ;;  %v582_v24 = vpop.f32.mrb[1].mxu0 }
 0x1a6   : > { %v583_v25 = vadd.f32 %v582_v24, %v482_v21  ;;  %v584_v26 = vpop.f32.mrb[2].mxu0 }
 0x1a7   : > { %587 = vst [vmem:[%s219_s14] sm:$0xff] %v581_v23  ;;  %v585_v27 = vpop.f32.mrb[3].mxu0 }
 0x1a8   : > { %589 = vst.msk [vmem:[%s219_s14 + $0x8] sm:$0xff] %vm588_vm9, %v583_v25 }
 0x1a9 PF: > { %s14_s15 = sadd.s32 1, %s739_s15  }
 0x1aa   : > { %p11_p5 = scmp.ge.s32.totalorder %s14_s15, 4  }
 0x1ac   :  { %13 = sbr.rel (!%p11_p5) target bundleno = 1 (0x1), region = 69 }

// kernel: net_forward.3
= control target key start
LH: loop header
LB: loop body
LE: loop exit
PB: predicated region body
PF: predicated region fallthrough
CT: control target
= control target key end

     0   :  { %v3351_v7 = vmov 0.0   ;;  %s3352_s15 = smov 64   ;;  %s4304_s0 = inlined_call_operand.vmem [shape: f32[2,8,192], index: 0, kind: input, shape index: {}]   ;;  %s4305_s1 = inlined_call_operand.vmem [shape: f32[2,8], index: 1, kind: input, shape index: {}]   ;;  %s4306_s2 = inlined_call_operand.vmem [shape: f32[64,192], index: 2, kind: input, shape index: {}]   ;;  %s4307_s3 = inlined_call_operand.vmem [shape: f32[1,64], index: 3, kind: input, shape index: {}]   ;;  %s4308_s4 = inlined_call_operand.vmem [shape: f32[1,64], index: 4, kind: input, shape index: {}]   ;;  %s4309_s5 = inlined_call_operand.vmem [shape: f32[1,64], index: 5, kind: input, shape index: {}]   ;;  %s4310_s6 = inlined_call_operand.vmem [shape: f32[64,128], index: 6, kind: input, shape index: {}]   ;;  %s4311_s7 = inlined_call_operand.vmem [shape: f32[1,128], index: 7, kind: input, shape index: {}]   ;;  %s4312_s8 = inlined_call_operand.vmem [shape: f32[1,128], index: 8, kind: input, shape index: {}]   ;;  %s4313_s9 = inlined_call_operand.vmem [shape: f32[1,128], index: 9, kind: input, shape index: {}]   ;;  %s4314_s10 = inlined_call_operand.vmem [shape: f32[128,128], index: 10, kind: input, shape index: {}]   ;;  %s4315_s11 = inlined_call_operand.vmem [shape: f32[1,128], index: 11, kind: input, shape index: {}]   ;;  %s4316_s12 = inlined_call_operand.hbm [shape: f32[2,8,128], index: 12, kind: output, shape index: {}]  }
   0x1   :  { %v47_v0 = vld [vmem:[%s4306_s2 + $0x8] sm:$0xff]  ;;  %v49_v1 = vld [vmem:[%s4306_s2 + $0x18] sm:$0xff]  ;;  %v46_v2 = vld [vmem:[%s4306_s2] sm:$0xff]  ;;  %137 = vmatprep.mubr.f32.mxu1 %v3351_v7  ;;  %605 = vmatprep.mubr.f32.mxu0 %v3351_v7 }
   0x2   :  { %v3433_v3 = vpack.c.bf16 %v49_v1, %v47_v0  ;;  %v48_v4 = vld [vmem:[%s4306_s2 + $0x10] sm:$0xff]  ;;  %v51_v5 = vld [vmem:[%s4306_s2 + $0x28] sm:$0xff]  ;;  %v53_v6 = vld [vmem:[%s4306_s2 + $0x38] sm:$0xff] }
   0x3   :  { %v3446_v8 = vpack.c.bf16 %v48_v4, %v46_v2  ;;  %v3448_v9 = vpack.c.bf16 %v53_v6, %v51_v5  ;;  %v50_v10 = vld [vmem:[%s4306_s2 + $0x20] sm:$0xff]  ;;  %v52_v11 = vld [vmem:[%s4306_s2 + $0x30] sm:$0xff]  ;;  %v55_v12 = vld [vmem:[%s4306_s2 + $0x48] sm:$0xff] }
   0x4   :  { %2861 = vmatprep.subr.bf16.mxu1 %v3433_v3  ;;  %v57_v13 = vld [vmem:[%s4306_s2 + $0x58] sm:$0xff]  ;;  %2893 = vmatprep.subr.bf16.mxu0 %v3433_v3  ;;  %v3465_v14 = vpack.c.bf16 %v52_v11, %v50_v10  ;;  %v54_v16 = vld [vmem:[%s4306_s2 + $0x40] sm:$0xff]  ;;  %v56_v17 = vld [vmem:[%s4306_s2 + $0x50] sm:$0xff] }
   0x5   :  { %2863 = vmatpush1.bf16.msra.mxu1 %v3446_v8  ;;  %2895 = vmatpush1.bf16.msra.mxu0 %v3446_v8  ;;  %v3469_v15 = vpack.c.bf16 %v57_v13, %v55_v12  ;;  %v3480_v18 = vld [vmem:[%s4307_s3] ss:$0 sm:$0xff]  ;;  %v59_v19 = vld [vmem:[%s4306_s2 + $0x68] sm:$0xff]  ;;  %v61_v20 = vld [vmem:[%s4306_s2 + $0x78] sm:$0xff] }
   0x6   :  { %2865 = vmatprep.subr.bf16.mxu1 %v3448_v9  ;;  %2897 = vmatprep.subr.bf16.mxu0 %v3448_v9 }
   0x7   :  { %162 = vrot.lane.b32.xlu0 %v3480_v18, %s3352_s15 }
   0x8   :  { %17 = vsyncpa [#allocation3], 0  ;;  %v3492_v21 = vpack.c.bf16 %v56_v17, %v54_v16  ;;  %v3496_v22 = vpack.c.bf16 %v61_v20, %v59_v19  ;;  %v58_v23 = vld [vmem:[%s4306_s2 + $0x60] sm:$0xff]  ;;  %v60_v24 = vld [vmem:[%s4306_s2 + $0x70] sm:$0xff]  ;;  %s3353_s27 = smov 96   ;;  %vm282_vm0 = vcmask 1041409  }
   0x9   :  { %2867 = vmatpush1.bf16.msra.mxu1 %v3465_v14  ;;  %2899 = vmatpush1.bf16.msra.mxu0 %v3465_v14  ;;  %v3506_v25 = vpack.c.bf16 %v60_v24, %v58_v23  ;;  %v3539_v35 = vld [vmem:[%s4304_s0 + $0x10] sm:$0xff]  ;;  %v3544_v36 = vld [vmem:[%s4304_s0] sm:$0xff]  ;;  %v3560_v2 = vld [vmem:[%s4304_s0 + $0x8] sm:$0xff]  ;;  %s3354_s28 = smov 32   ;;  %vm295_vm1 = vcmask 261120   ;;  %vm69_vm2 = vcmask 523264  }
   0xa   :  { %2869 = vmatprep.subr.bf16.mxu1 %v3469_v15  ;;  %2901 = vmatprep.subr.bf16.mxu0 %v3469_v15  ;;  %v3567_v11 = vld [vmem:[%s4304_s0 + $0x18] sm:$0xff]  ;;  %vm523_vm3 = vcmask 1042434   ;;  %vm1960_vm4 = vcmask 1040384   ;;  %vm1963_vm5 = vcmask 1041408   ;;  %vm766_vm6 = vcmask 1043459  }
   0xb   :  { %vm1966_vm7 = vcmask 1042432   ;;  %vm1006_vm8 = vcmask 1044484   ;;  %vm1969_vm9 = vcmask 1043456   ;;  %vm1245_vm10 = vcmask 1045509  }
   0xc   :  { %vm1972_vm11 = vcmask 1044480   ;;  %vm1488_vm12 = vcmask 1046534   ;;  %vm1975_vm13 = vcmask 1045504   ;;  %vm1727_vm14 = vcmask 1047559  }
   0xd   :  { %2871 = vmatpush1.bf16.msra.mxu1 %v3492_v21  ;;  %2903 = vmatpush1.bf16.msra.mxu0 %v3492_v21  ;;  %vm1978_vm15 = vcmask 1046528  }
   0xe   :  { %2873 = vmatprep.subr.bf16.mxu1 %v3496_v22  ;;  %2905 = vmatprep.subr.bf16.mxu0 %v3496_v22 }
  0x11   :  { %2875 = vmatpush1.bf16.msra.mxu1 %v3506_v25  ;;  %2907 = vmatpush1.bf16.msra.mxu0 %v3506_v25 }
  0x12   :  { %2877 = vmatprep.subr.bf16.mxu1 %v3433_v3  ;;  %2925 = vmatprep.subr.bf16.mxu0 %v3433_v3 }
  0x14   :  { %138 = vmatmul.mubr.f32.vlgmr.msra.gmra.mrb[0].mxu1 %v3351_v7 }
  0x15   :  { %2879 = vmatpush1.bf16.msra.mxu1 %v3446_v8  ;;  %364 = vmatprep.mubr.f32.mxu1 %v3351_v7 }
  0x16   :  { %2881 = vmatprep.subr.bf16.mxu1 %v3448_v9 }
  0x19   :  { %2883 = vmatpush1.bf16.msra.mxu1 %v3465_v14 }
  0x1a   :  { %2885 = vmatprep.subr.bf16.mxu1 %v3469_v15 }
  0x1d   :  { %2887 = vmatpush1.bf16.msra.mxu1 %v3492_v21 }
  0x1e   :  { %2889 = vmatprep.subr.bf16.mxu1 %v3496_v22 }
  0x21   :  { %2891 = vmatpush1.bf16.msra.mxu1 %v3506_v25 }
  0x22   :  { %2909 = vmatprep.subr.bf16.mxu1 %v3433_v3 }
  0x79   :  { %v3525_v26 = vpop.permute.xlu0 %162 }
  0xe7   :  { %v139_v27 = vpop.f32.mrb[0].mxu1 }
  0xe8   :  { %v165_v28 = vadd.f32 %v3525_v26, %v139_v27  ;;  %v3528_v29 = vpop.f32.mrb[1].mxu1  ;;  %v145_v34 = vrot.slane %v139_v27, 1  ;;  %v204_v38 = vrot.slane %v139_v27, 2  ;;  %v148_v40 = vadd.f32 %v139_v27, %v3544_v36 }
  0xe9   :  { %v239_v30 = vadd.f32 %v3480_v18, %v3528_v29  ;;  %v221_v27 = vrot.slane %v3528_v29, 1 }
  0xea   :  { %v167_v31 = vrot.slane %v165_v28, 1  ;;  %v149_v37 = vadd.f32 %v145_v34, %v3539_v35  ;;  %v206_v39 = vadd.f32 %v145_v34, %v3544_v36  ;;  %v207_v42 = vadd.f32 %v204_v38, %v3539_v35 }
  0xeb   :  { %v241_v32 = vrot.slane %v239_v30, 1  ;;  %v242_v33 = vrot.slane %v239_v30, 2  ;;  %v2681_v44 = vmul.f32 -1.442695, %v148_v40  ;;  %v225_v30 = vadd.f32 %v221_v27, %v3560_v2 }
  0xec   :  { %170 = vrot.lane.b32.xlu0 %v167_v31, %s3352_s15  ;;  %v2682_v41 = vmul.f32 -1.442695, %v149_v37  ;;  %v2683_v43 = vmul.f32 -1.442695, %v206_v39  ;;  %v2684_v45 = vmul.f32 -1.442695, %v207_v42 }
  0xed   :  { %243 = vrot.lane.b32.xlu1 %v241_v32, %s3352_s15  ;;  %v2685_v32 = vmul.f32 -1.442695, %v225_v30 }
  0xee   :  { %3044 = vpow2.f32 %v2682_v41 }
  0xef   :  { %3046 = vpow2.f32 %v2683_v43 }
  0xf0   :  { %168 = vrot.lane.b32.xlu0 %v165_v28, %s3352_s15  ;;  %3048 = vpow2.f32 %v2681_v44  ;;  %v222_v28 = vrot.slane %v3528_v29, 2 }
  0xf1   :  { %245 = vrot.lane.b32.xlu1 %v242_v33, %s3352_s15  ;;  %3050 = vpow2.f32 %v2684_v45 }
  0xf2   :  { %v226_v31 = vadd.f32 %v222_v28, %v3567_v11 }
  0xf4   :  { %v2686_v33 = vmul.f32 -1.442695, %v226_v31 }
  0xf8   :  { %v3045_v46 = vpop.eup %3044 }
  0xf9   :  { %v3047_v47 = vpop.eup %3046  ;;  %v157_v48 = vadd.f32 1.0, %v3045_v46 }
  0xfa   :  { %v3049_v49 = vpop.eup %3048  ;;  %v214_v50 = vadd.f32 1.0, %v3047_v47 }
  0xfb   :  { %v3051_v51 = vpop.eup %3050  ;;  %v156_v52 = vadd.f32 1.0, %v3049_v49  ;;  %3052 = vrcp.f32 %v157_v48 }
  0xfc   :  { %v215_v53 = vadd.f32 1.0, %v3051_v51  ;;  %3054 = vrcp.f32 %v214_v50 }
  0xfd   :  { %3056 = vrcp.f32 %v156_v52 }
  0xfe   :  { %3058 = vrcp.f32 %v215_v53 }
 0x105   :  { %v3053_v54 = vpop.eup %3052 }
 0x106   :  { %v3055_v55 = vpop.eup %3054  ;;  %v189_v41 = vsub.f32 1.0, %v3053_v54  ;;  %v201_v46 = vmul.f32 0.0, %v3053_v54 }
 0x107   :  { %v3550_v60 = vpop.eup %3056 }
 0x108   :  { %v3059_v61 = vpop.eup %3058  ;;  %v188_v52 = vsub.f32 1.0, %v3550_v60 }
 0x15e   :  { %v171_v56 = vpop.permute.xlu0 %170 }
 0x15f   :  { %v244_v57 = vpop.permute.xlu1 %243  ;;  %v175_v58 = vmul.f32 %v3053_v54, %v171_v56 }
 0x160   :  { %v249_v59 = vmul.f32 %v3055_v55, %v244_v57 }
 0x161   :  { %180 = vrot.lane.b32.xlu1 %v175_v58, %s3352_s15  ;;  %v200_v58 = vmul.f32 0.0, %v3550_v60 }
 0x162   :  { %253 = vrot.lane.b32.xlu0 %v249_v59, %s3352_s15  ;;  %v169_v62 = vpop.permute.xlu0 %168 }
 0x163   :  { %v246_v63 = vpop.permute.xlu1 %245  ;;  %v174_v0 = vmul.f32 %v3550_v60, %v169_v62 }
 0x164   :  { %v250_v1 = vmul.f32 %v3059_v61, %v246_v63 }
 0x166   :  { %255 = vrot.lane.b32.xlu1 %v250_v1, %s3352_s15  ;;  %178 = vrot.lane.b32.xlu0 %v174_v0, %s3352_s15 }
 0x1d3   :  { %v181_v4 = vpop.permute.xlu1 %180 }
 0x1d4   :  { %v254_v5 = vpop.permute.xlu0 %253  ;;  %v185_v6 = vadd.f32 %v181_v4, %v3539_v35 }
 0x1d5   :  { %v259_v10 = vadd.f32 %v254_v5, %v3560_v2 }
 0x1d6   :  { %3060 = vtanh.f32 %v185_v6 }
 0x1d7   :  { %3062 = vtanh.f32 %v259_v10 }
 0x1d8   :  { %v256_v12 = vpop.permute.xlu1 %255  ;;  %v179_v13 = vpop.permute.xlu0 %178 }
 0x1d9   :  { %v260_v16 = vadd.f32 %v256_v12, %v3567_v11  ;;  %v184_v17 = vadd.f32 %v179_v13, %v3544_v36 }
 0x1db   :  { %3064 = vtanh.f32 %v260_v16 }
 0x1dc   :  { %3066 = vtanh.f32 %v184_v17 }
 0x1dd   :  { %3068 = vpow2.f32 %v2685_v32 }
 0x1de   :  { %3070 = vpow2.f32 %v2686_v33 }
 0x1e0   :  { %v3061_v19 = vpop.eup %3060 }
 0x1e1   :  { %v3063_v20 = vpop.eup %3062  ;;  %194 = vrot.lane.b32.xlu1 %v3061_v19, %s3353_s27 }
 0x1e2   :  { %267 = vrot.lane.b32.xlu0 %v3063_v20, %s3353_s27 }
 0x1e5   :  { %v3065_v23 = vpop.eup %3064 }
 0x1e6   :  { %v3067_v24 = vpop.eup %3066  ;;  %269 = vrot.lane.b32.xlu1 %v3065_v23, %s3353_s27 }
 0x1e7   :  { %192 = vrot.lane.b32.xlu0 %v3067_v24, %s3353_s27  ;;  %v3069_v34 = vpop.eup %3068 }
 0x1e8   :  { %v3071_v37 = vpop.eup %3070  ;;  %v233_v38 = vadd.f32 1.0, %v3069_v34 }
 0x1e9   :  { %v234_v39 = vadd.f32 1.0, %v3071_v37 }
 0x1ea   :  { %3072 = vrcp.f32 %v233_v38 }
 0x1eb   :  { %3074 = vrcp.f32 %v234_v39 }
 0x1f4   :  { %v3073_v40 = vpop.eup %3072 }
 0x1f5   :  { %v3075_v42 = vpop.eup %3074  ;;  %v263_v44 = vsub.f32 1.0, %v3073_v40  ;;  %v275_v48 = vmul.f32 0.0, %v3073_v40 }
 0x1f6   :  { %v264_v49 = vsub.f32 1.0, %v3075_v42  ;;  %v276_v55 = vmul.f32 0.0, %v3075_v42 }
 0x253   :  { %v195_v43 = vpop.permute.xlu1 %194 }
 0x254   :  { %v199_v29 = vmul.f32 %v195_v43, %v189_v41  ;;  %v268_v45 = vpop.permute.xlu0 %267 }
 0x255   :  { %v273_v47 = vmul.f32 %v268_v45, %v263_v44 }
 0x256   :  { %v3579_v50 = vadd.f32 %v201_v46, %v199_v29 }
 0x257   :  { %v3582_v53 = vadd.f32 %v275_v48, %v273_v47 }
 0x258   :  { %v270_v51 = vpop.permute.xlu1 %269  ;;  %v281_v54 = vrot.slane %v3579_v50, 7 }
 0x259   :  { %v274_v56 = vmul.f32 %v270_v51, %v264_v49  ;;  %v193_v57 = vpop.permute.xlu0 %192  ;;  %v289_v63 = vrot.slane %v3582_v53, 7 }
 0x25a   :  { %v198_v59 = vmul.f32 %v193_v57, %v188_v52 }
 0x25b   :  { %v3585_v61 = vadd.f32 %v276_v55, %v274_v56 }
 0x25c   :  { %v3588_v62 = vadd.f32 %v200_v58, %v198_v59 }
 0x25d   :  { %v290_v0 = vrot.slane %v3585_v61, 6 }
 0x25e   :  { %v283_v1 = vsel %vm282_vm0, %v281_v54, %v3588_v62 }
 0x25f   :  { %284 = vrot.lane.b32.xlu1 %v283_v1, %s3353_s27  ;;  %v291_v4 = vsel %vm282_vm0, %v290_v0, %v289_v63  ;;  %vm3355_vm0 = vmmov 0  }
 0x260   :  { %292 = vrot.lane.b32.xlu0 %v291_v4, %s3354_s28 }
 0x2d1   :  { %v285_v60 = vpop.permute.xlu1 %284 }
 0x2d2   :  { %v293_v5 = vpop.permute.xlu0 %292 }
 0x2d3   :  { %v3596_v6 = vsel %vm295_vm1, %v285_v60, %v293_v5 }
 0x2d4   :  { %2687 = vmatmul.mubr.msk.f32.vlgmr.msra.gmra.mrb[2].mxu1 %vm69_vm2, %v3596_v6  ;;  %v508_v63 = vrot.slane %v3596_v6, 2  ;;  %v509_v0 = vrot.slane %v3596_v6, 3 }
 0x2d5   :  { %2911 = vmatpush1.bf16.msra.mxu1 %v3446_v8  ;;  %848 = vmatprep.mubr.f32.mxu1 %v3351_v7 }
 0x2d6   :  { %2913 = vmatprep.subr.bf16.mxu1 %v3448_v9 }
 0x2d9   :  { %2915 = vmatpush1.bf16.msra.mxu1 %v3465_v14 }
 0x2da   :  { %2917 = vmatprep.subr.bf16.mxu1 %v3469_v15 }
 0x2dd   :  { %2919 = vmatpush1.bf16.msra.mxu1 %v3492_v21 }
 0x2de   :  { %2921 = vmatprep.subr.bf16.mxu1 %v3496_v22 }
 0x2e1   :  { %2923 = vmatpush1.bf16.msra.mxu1 %v3506_v25 }
 0x2e2   :  { %2941 = vmatprep.subr.bf16.mxu1 %v3433_v3 }
 0x3a7   :  { %v366_v10 = vpop.f32.mrb[2].mxu1 }
 0x3a8   :  { %v3609_v12 = vpop.f32.mrb[3].mxu1  ;;  %v389_v16 = vadd.f32 %v366_v10, %v3525_v26  ;;  %v435_v23 = vrot.slane %v366_v10, 2  ;;  %v376_v24 = vadd.f32 %v366_v10, %v3539_v35  ;;  %v436_v27 = vrot.slane %v366_v10, 3 }
 0x3a9   :  { %v472_v13 = vadd.f32 %v3480_v18, %v3609_v12  ;;  %v372_v28 = vrot.slane %v366_v10, 7 }
 0x3aa   :  { %394 = vrot.lane.b32.xlu1 %v389_v16, %s3352_s15  ;;  %v391_v20 = vrot.slane %v389_v16, 7  ;;  %v439_v30 = vadd.f32 %v435_v23, %v3544_v36  ;;  %v2689_v31 = vmul.f32 -1.442695, %v376_v24  ;;  %v440_v32 = vadd.f32 %v436_v27, %v3539_v35 }
 0x3ab   :  { %v474_v17 = vrot.slane %v472_v13, 2  ;;  %v475_v19 = vrot.slane %v472_v13, 3  ;;  %v375_v33 = vadd.f32 %v372_v28, %v3544_v36  ;;  %v424_v27 = vrot.slane %v3596_v6, 7 }
 0x3ac   :  { %v2690_v34 = vmul.f32 -1.442695, %v439_v30  ;;  %3076 = vpow2.f32 %v2689_v31  ;;  %v2691_v37 = vmul.f32 -1.442695, %v440_v32  ;;  %v454_v28 = vrot.slane %v3609_v12, 2 }
 0x3ad   :  { %476 = vrot.lane.b32.xlu0 %v474_v17, %s3352_s15  ;;  %v2688_v38 = vmul.f32 -1.442695, %v375_v33  ;;  %v455_v30 = vrot.slane %v3609_v12, 3 }
 0x3ae   :  { %478 = vrot.lane.b32.xlu1 %v475_v19, %s3352_s15  ;;  %3078 = vpow2.f32 %v2690_v34  ;;  %v458_v31 = vadd.f32 %v454_v28, %v3560_v2 }
 0x3af   :  { %3080 = vpow2.f32 %v2691_v37  ;;  %v459_v32 = vadd.f32 %v455_v30, %v3567_v11 }
 0x3b0   :  { %3082 = vpow2.f32 %v2688_v38  ;;  %v2692_v33 = vmul.f32 -1.442695, %v458_v31 }
 0x3b1   :  { %392 = vrot.lane.b32.xlu0 %v391_v20, %s3352_s15  ;;  %v2693_v34 = vmul.f32 -1.442695, %v459_v32 }
 0x3b6   :  { %v3077_v39 = vpop.eup %3076 }
 0x3b7   :  { %v384_v41 = vadd.f32 1.0, %v3077_v39 }
 0x3b8   :  { %v3079_v40 = vpop.eup %3078 }
 0x3b9   :  { %v3081_v42 = vpop.eup %3080  ;;  %v447_v43 = vadd.f32 1.0, %v3079_v40  ;;  %3084 = vrcp.f32 %v384_v41 }
 0x3ba   :  { %v3083_v44 = vpop.eup %3082  ;;  %v448_v29 = vadd.f32 1.0, %v3081_v42 }
 0x3bb   :  { %v383_v45 = vadd.f32 1.0, %v3083_v44  ;;  %3086 = vrcp.f32 %v447_v43 }
 0x3bc   :  { %3088 = vrcp.f32 %v448_v29 }
 0x3bd   :  { %3090 = vrcp.f32 %v383_v45 }
 0x3c3   :  { %v3622_v46 = vpop.eup %3084 }
 0x3c4   :  { %v413_v29 = vsub.f32 1.0, %v3622_v46 }
 0x3c5   :  { %v3087_v49 = vpop.eup %3086 }
 0x3c6   :  { %v3089_v55 = vpop.eup %3088 }
 0x3c7   :  { %v3627_v58 = vpop.eup %3090 }
 0x41c   :  { %v395_v47 = vpop.permute.xlu1 %394 }
 0x41d   :  { %v399_v48 = vmul.f32 %v3622_v46, %v395_v47 }
 0x41f   :  { %v477_v51 = vpop.permute.xlu0 %476  ;;  %404 = vrot.lane.b32.xlu1 %v399_v48, %s3352_s15 }
 0x420   :  { %v482_v52 = vmul.f32 %v3087_v49, %v477_v51  ;;  %v479_v56 = vpop.permute.xlu1 %478 }
 0x421   :  { %v483_v57 = vmul.f32 %v3089_v55, %v479_v56 }
 0x422   :  { %486 = vrot.lane.b32.xlu0 %v482_v52, %s3352_s15 }
 0x423   :  { %v393_v59 = vpop.permute.xlu0 %392  ;;  %488 = vrot.lane.b32.xlu1 %v483_v57, %s3352_s15 }
 0x424   :  { %v398_v54 = vmul.f32 %v3627_v58, %v393_v59 }
 0x426   :  { %402 = vrot.lane.b32.xlu0 %v398_v54, %s3352_s15 }
 0x427   :  { %510 = vrot.lane.b32.xlu1 %v508_v63, %s3353_s27 }
 0x42a   :  { %427 = vrot.lane.b32.xlu0 %v3596_v6, %s3354_s28 }
 0x42e   :  { %512 = vrot.lane.b32.xlu0 %v509_v0, %s3353_s27 }
 0x491   :  { %v405_v1 = vpop.permute.xlu1 %404 }
 0x492   :  { %v409_v4 = vadd.f32 %v405_v1, %v3539_v35  ;;  %v412_v1 = vsub.f32 1.0, %v3627_v58 }
 0x494   :  { %v487_v60 = vpop.permute.xlu0 %486  ;;  %3092 = vtanh.f32 %v409_v4 }
 0x495   :  { %v492_v5 = vadd.f32 %v487_v60, %v3560_v2  ;;  %v489_v10 = vpop.permute.xlu1 %488 }
 0x496   :  { %v493_v13 = vadd.f32 %v489_v10, %v3567_v11 }
 0x497   :  { %3094 = vtanh.f32 %v492_v5 }
 0x498   :  { %v403_v16 = vpop.permute.xlu0 %402  ;;  %3096 = vtanh.f32 %v493_v13 }
 0x499   :  { %v408_v17 = vadd.f32 %v403_v16, %v3544_v36  ;;  %v511_v41 = vpop.permute.xlu1 %510 }
 0x49b   :  { %3098 = vtanh.f32 %v408_v17 }
 0x49c   :  { %3100 = vpow2.f32 %v2692_v33  ;;  %v428_v40 = vpop.permute.xlu0 %427 }
 0x49d   :  { %3102 = vpow2.f32 %v2693_v34  ;;  %v432_v55 = vmul.f32 %v3622_v46, %v428_v40 }
 0x49e   :  { %v3093_v19 = vpop.eup %3092 }
 0x49f   :  { %418 = vrot.lane.b32.xlu1 %v3093_v19, %s3353_s27 }
 0x4a0   :  { %v513_v44 = vpop.permute.xlu0 %512 }
 0x4a1   :  { %v3095_v20 = vpop.eup %3094 }
 0x4a2   :  { %v3097_v23 = vpop.eup %3096 }
 0x4a3   :  { %502 = vrot.lane.b32.xlu0 %v3097_v23, %s3353_s27  ;;  %500 = vrot.lane.b32.xlu1 %v3095_v20, %s3353_s27 }
 0x4a5   :  { %v3099_v24 = vpop.eup %3098 }
 0x4a6   :  { %v3101_v37 = vpop.eup %3100 }
 0x4a7   :  { %425 = vrot.lane.b32.xlu0 %v424_v27, %s3354_s28  ;;  %416 = vrot.lane.b32.xlu1 %v3099_v24, %s3353_s27  ;;  %v3103_v38 = vpop.eup %3102  ;;  %v466_v39 = vadd.f32 1.0, %v3101_v37 }
 0x4a8   :  { %v467_v6 = vadd.f32 1.0, %v3103_v38 }
 0x4a9   :  { %3104 = vrcp.f32 %v466_v39 }
 0x4aa   :  { %3106 = vrcp.f32 %v467_v6 }
 0x4b3   :  { %v3105_v42 = vpop.eup %3104 }
 0x4b4   :  { %v3107_v43 = vpop.eup %3106  ;;  %v496_v47 = vsub.f32 1.0, %v3105_v42  ;;  %v516_v49 = vmul.f32 %v3105_v42, %v511_v41 }
 0x4b5   :  { %v497_v48 = vsub.f32 1.0, %v3107_v43  ;;  %v517_v56 = vmul.f32 %v3107_v43, %v513_v44 }
 0x511   :  { %v419_v12 = vpop.permute.xlu1 %418 }
 0x512   :  { %v423_v45 = vmul.f32 %v419_v12, %v413_v29 }
 0x514   :  { %v3654_v54 = vadd.f32 %v432_v55, %v423_v45 }
 0x515   :  { %v501_v51 = vpop.permute.xlu1 %500  ;;  %v503_v52 = vpop.permute.xlu0 %502 }
 0x516   :  { %v506_v57 = vmul.f32 %v501_v51, %v496_v47  ;;  %v507_v59 = vmul.f32 %v503_v52, %v497_v48  ;;  %v522_v16 = vrot.slane %v3654_v54, 7 }
 0x518   :  { %v3656_v63 = vadd.f32 %v516_v49, %v506_v57  ;;  %v3658_v0 = vadd.f32 %v517_v56, %v507_v59 }
 0x519   :  { %v417_v4 = vpop.permute.xlu1 %416  ;;  %v426_v60 = vpop.permute.xlu0 %425 }
 0x51a   :  { %v530_v5 = vrot.slane %v3656_v63, 5  ;;  %v531_v10 = vrot.slane %v3658_v0, 4  ;;  %v422_v13 = vmul.f32 %v417_v4, %v412_v1  ;;  %v431_v46 = vmul.f32 %v3627_v58, %v426_v60 }
 0x51c   :  { %v3665_v17 = vadd.f32 %v431_v46, %v422_v13  ;;  %v532_v19 = vsel %vm523_vm3, %v531_v10, %v530_v5 }
 0x51d   :  { %533 = vrot.lane.b32.xlu0 %v532_v19, %s3354_s28 }
 0x51e   :  { %v524_v20 = vsel %vm523_vm3, %v522_v16, %v3665_v17  ;;  %vm2333_vm3 = vcmask 64512  }
 0x51f   :  { %525 = vrot.lane.b32.xlu1 %v524_v20, %s3353_s27 }
 0x58f   :  { %v534_v23 = vpop.permute.xlu0 %533 }
 0x591   :  { %v526_v24 = vpop.permute.xlu1 %525 }
 0x592   :  { %v3671_v27 = vsel %vm295_vm1, %v526_v24, %v534_v23 }
 0x593   :  { %v538_v28 = vrot.slane %v3671_v27, 1 }
 0x595   :  { %2694 = vmatmul.mubr.msk.f32.vlgmr.msra.gmra.mrb[0].mxu0 %vm69_vm2, %v538_v28 }
 0x596   :  { %2927 = vmatpush1.bf16.msra.mxu0 %v3446_v8  ;;  %1087 = vmatprep.mubr.f32.mxu0 %v3351_v7 }
 0x597   :  { %2929 = vmatprep.subr.bf16.mxu0 %v3448_v9 }
 0x59a   :  { %2931 = vmatpush1.bf16.msra.mxu0 %v3465_v14 }
 0x59b   :  { %2933 = vmatprep.subr.bf16.mxu0 %v3469_v15 }
 0x59e   :  { %2935 = vmatpush1.bf16.msra.mxu0 %v3492_v21 }
 0x59f   :  { %2937 = vmatprep.subr.bf16.mxu0 %v3496_v22 }
 0x5a2   :  { %2939 = vmatpush1.bf16.msra.mxu0 %v3506_v25 }
 0x5a3   :  { %2957 = vmatprep.subr.bf16.mxu0 %v3433_v3 }
 0x668   :  { %v607_v58 = vpop.f32.mrb[0].mxu0 }
 0x669   :  { %v3684_v30 = vpop.f32.mrb[1].mxu0  ;;  %v631_v32 = vadd.f32 %v607_v58, %v3525_v26  ;;  %v614_v39 = vrot.slane %v607_v58, 7  ;;  %v678_v6 = vrot.slane %v607_v58, 3  ;;  %v613_v40 = vrot.slane %v607_v58, 6 }
 0x66a   :  { %v715_v31 = vadd.f32 %v3480_v18, %v3684_v30  ;;  %v679_v42 = vrot.slane %v607_v58, 4  ;;  %v751_v58 = vrot.slane %v3671_v27, 4 }
 0x66b   :  { %v634_v33 = vrot.slane %v631_v32, 7  ;;  %v633_v38 = vrot.slane %v631_v32, 6  ;;  %v618_v41 = vadd.f32 %v614_v39, %v3539_v35  ;;  %v682_v43 = vadd.f32 %v678_v6, %v3544_v36 }
 0x66c   :  { %v717_v34 = vrot.slane %v715_v31, 3  ;;  %v718_v37 = vrot.slane %v715_v31, 4  ;;  %v617_v44 = vadd.f32 %v613_v40, %v3544_v36  ;;  %v683_v29 = vadd.f32 %v679_v42, %v3539_v35 }
 0x66d   :  { %637 = vrot.lane.b32.xlu1 %v634_v33, %s3352_s15  ;;  %v2696_v12 = vmul.f32 -1.442695, %v618_v41  ;;  %v2697_v45 = vmul.f32 -1.442695, %v682_v43  ;;  %v752_v31 = vrot.slane %v3671_v27, 5 }
 0x66e   :  { %719 = vrot.lane.b32.xlu0 %v717_v34, %s3352_s15  ;;  %v2695_v47 = vmul.f32 -1.442695, %v617_v44  ;;  %v2698_v48 = vmul.f32 -1.442695, %v683_v29  ;;  %v667_v44 = vrot.slane %v3671_v27, 7  ;;  %v697_v29 = vrot.slane %v3684_v30, 3 }
 0x66f   :  { %3108 = vpow2.f32 %v2696_v12 }
 0x670   :  { %3110 = vpow2.f32 %v2697_v45  ;;  %v698_v45 = vrot.slane %v3684_v30, 4 }
 0x671   :  { %721 = vrot.lane.b32.xlu1 %v718_v37, %s3352_s15  ;;  %3112 = vpow2.f32 %v2695_v47  ;;  %v701_v47 = vadd.f32 %v697_v29, %v3560_v2  ;;  %v1961_v29 = vsel %vm1960_vm4, %v3588_v62, %v3665_v17 }
 0x672   :  { %635 = vrot.lane.b32.xlu0 %v633_v38, %s3352_s15  ;;  %3114 = vpow2.f32 %v2698_v48  ;;  %v702_v48 = vadd.f32 %v698_v45, %v3567_v11 }
 0x679   :  { %v3109_v49 = vpop.eup %3108 }
 0x67a   :  { %v3111_v51 = vpop.eup %3110  ;;  %v626_v52 = vadd.f32 1.0, %v3109_v49  ;;  %v2699_v49 = vmul.f32 -1.442695, %v701_v47 }
 0x67b   :  { %v3113_v55 = vpop.eup %3112  ;;  %v690_v56 = vadd.f32 1.0, %v3111_v51  ;;  %v2700_v51 = vmul.f32 -1.442695, %v702_v48 }
 0x67c   :  { %v3115_v57 = vpop.eup %3114  ;;  %v625_v59 = vadd.f32 1.0, %v3113_v55  ;;  %3116 = vrcp.f32 %v626_v52 }
 0x67d   :  { %3118 = vrcp.f32 %v690_v56  ;;  %v691_v1 = vadd.f32 1.0, %v3115_v57 }
 0x67e   :  { %3120 = vrcp.f32 %v625_v59 }
 0x67f   :  { %3122 = vrcp.f32 %v691_v1 }
 0x686   :  { %v3697_v4 = vpop.eup %3116 }
 0x687   :  { %v3119_v60 = vpop.eup %3118 }
 0x688   :  { %v3700_v16 = vpop.eup %3120 }
 0x689   :  { %v3123_v19 = vpop.eup %3122 }
 0x6df   :  { %v638_v5 = vpop.permute.xlu1 %637 }
 0x6e0   :  { %v720_v10 = vpop.permute.xlu0 %719  ;;  %v642_v13 = vmul.f32 %v3697_v4, %v638_v5 }
 0x6e1   :  { %v725_v46 = vmul.f32 %v3119_v60, %v720_v10  ;;  %v656_v60 = vsub.f32 1.0, %v3697_v4 }
 0x6e2   :  { %647 = vrot.lane.b32.xlu1 %v642_v13, %s3352_s15 }
 0x6e3   :  { %729 = vrot.lane.b32.xlu0 %v725_v46, %s3352_s15  ;;  %v722_v20 = vpop.permute.xlu1 %721 }
 0x6e4   :  { %v636_v23 = vpop.permute.xlu0 %635  ;;  %v726_v24 = vmul.f32 %v3123_v19, %v722_v20 }
 0x6e5   :  { %v641_v28 = vmul.f32 %v3700_v16, %v636_v23 }
 0x6e6   :  { %731 = vrot.lane.b32.xlu1 %v726_v24, %s3352_s15  ;;  %v1962_v24 = vsel %vm1960_vm4, %v3579_v50, %v3654_v54 }
 0x6e7   :  { %645 = vrot.lane.b32.xlu0 %v641_v28, %s3352_s15 }
 0x6ea   :  { %753 = vrot.lane.b32.xlu1 %v751_v58, %s3353_s27 }
 0x6eb   :  { %670 = vrot.lane.b32.xlu0 %v3671_v27, %s3354_s28 }
 0x6ef   :  { %755 = vrot.lane.b32.xlu0 %v752_v31, %s3353_s27 }
 0x754   :  { %v648_v32 = vpop.permute.xlu1 %647 }
 0x755   :  { %v730_v33 = vpop.permute.xlu0 %729  ;;  %v652_v34 = vadd.f32 %v648_v32, %v3539_v35 }
 0x756   :  { %v735_v37 = vadd.f32 %v730_v33, %v3560_v2 }
 0x757   :  { %3124 = vtanh.f32 %v652_v34 }
 0x758   :  { %v732_v38 = vpop.permute.xlu1 %731  ;;  %3126 = vtanh.f32 %v735_v37 }
 0x759   :  { %v646_v39 = vpop.permute.xlu0 %645  ;;  %v736_v6 = vadd.f32 %v732_v38, %v3567_v11 }
 0x75a   :  { %v651_v40 = vadd.f32 %v646_v39, %v3544_v36  ;;  %v655_v39 = vsub.f32 1.0, %v3700_v16 }
 0x75b   :  { %3128 = vtanh.f32 %v736_v6 }
 0x75c   :  { %3130 = vtanh.f32 %v651_v40  ;;  %v754_v59 = vpop.permute.xlu1 %753 }
 0x75d   :  { %3132 = vpow2.f32 %v2699_v49  ;;  %v671_v57 = vpop.permute.xlu0 %670 }
 0x75e   :  { %3134 = vpow2.f32 %v2700_v51  ;;  %v675_v13 = vmul.f32 %v3697_v4, %v671_v57 }
 0x761   :  { %v3125_v41 = vpop.eup %3124  ;;  %v756_v5 = vpop.permute.xlu0 %755 }
 0x762   :  { %661 = vrot.lane.b32.xlu1 %v3125_v41, %s3353_s27  ;;  %v3127_v42 = vpop.eup %3126 }
 0x765   :  { %v3129_v43 = vpop.eup %3128 }
 0x766   :  { %745 = vrot.lane.b32.xlu0 %v3129_v43, %s3353_s27  ;;  %743 = vrot.lane.b32.xlu1 %v3127_v42, %s3353_s27  ;;  %v3131_v12 = vpop.eup %3130 }
 0x767   :  { %v3133_v52 = vpop.eup %3132 }
 0x768   :  { %v3135_v55 = vpop.eup %3134  ;;  %v709_v27 = vadd.f32 1.0, %v3133_v52 }
 0x769   :  { %v710_v56 = vadd.f32 1.0, %v3135_v55 }
 0x76a   :  { %668 = vrot.lane.b32.xlu0 %v667_v44, %s3354_s28  ;;  %659 = vrot.lane.b32.xlu1 %v3131_v12, %s3353_s27  ;;  %3136 = vrcp.f32 %v709_v27 }
 0x76b   :  { %3138 = vrcp.f32 %v710_v56 }
 0x774   :  { %v3137_v1 = vpop.eup %3136 }
 0x775   :  { %v3139_v30 = vpop.eup %3138  ;;  %v739_v20 = vsub.f32 1.0, %v3137_v1  ;;  %v759_v28 = vmul.f32 %v3137_v1, %v754_v59 }
 0x776   :  { %v740_v23 = vsub.f32 1.0, %v3139_v30  ;;  %v760_v32 = vmul.f32 %v3139_v30, %v756_v5 }
 0x7d4   :  { %v662_v10 = vpop.permute.xlu1 %661 }
 0x7d5   :  { %v666_v46 = vmul.f32 %v662_v10, %v656_v60 }
 0x7d7   :  { %v677_v19 = vadd.f32 %v675_v13, %v666_v46 }
 0x7d8   :  { %v744_v58 = vpop.permute.xlu1 %743  ;;  %v746_v31 = vpop.permute.xlu0 %745 }
 0x7d9   :  { %v3733_v33 = vsel %vm1963_vm5, %v1962_v24, %v677_v19  ;;  %v749_v34 = vmul.f32 %v744_v58, %v739_v20  ;;  %v750_v37 = vmul.f32 %v746_v31, %v740_v23  ;;  %v765_v43 = vrot.slane %v677_v19, 7 }
 0x7db   :  { %v3735_v38 = vadd.f32 %v759_v28, %v749_v34  ;;  %v3737_v4 = vadd.f32 %v760_v32, %v750_v37 }
 0x7dc   :  { %v660_v6 = vpop.permute.xlu1 %659  ;;  %v669_v40 = vpop.permute.xlu0 %668 }
 0x7dd   :  { %v773_v50 = vrot.slane %v3735_v38, 3  ;;  %v774_v54 = vrot.slane %v3737_v4, 2  ;;  %v665_v41 = vmul.f32 %v660_v6, %v655_v39  ;;  %v674_v42 = vmul.f32 %v3700_v16, %v669_v40 }
 0x7df   :  { %v676_v44 = vadd.f32 %v674_v42, %v665_v41  ;;  %v775_v12 = vsel %vm766_vm6, %v774_v54, %v773_v50 }
 0x7e0   :  { %776 = vrot.lane.b32.xlu0 %v775_v12, %s3354_s28 }
 0x7e1   :  { %v3748_v45 = vsel %vm1963_vm5, %v1961_v29, %v676_v44  ;;  %v767_v47 = vsel %vm766_vm6, %v765_v43, %v676_v44 }
 0x7e2   :  { %768 = vrot.lane.b32.xlu1 %v767_v47, %s3353_s27 }
 0x852   :  { %v777_v48 = vpop.permute.xlu0 %776 }
 0x854   :  { %v769_v49 = vpop.permute.xlu1 %768 }
 0x855   :  { %v3752_v51 = vsel %vm295_vm1, %v769_v49, %v777_v48 }
 0x856   :  { %v781_v16 = vrot.slane %v3752_v51, 2  ;;  %v992_v48 = vrot.slane %v3752_v51, 6  ;;  %v910_v49 = vrot.slane %v3752_v51, 7 }
 0x858   :  { %2701 = vmatmul.mubr.msk.f32.vlgmr.msra.gmra.mrb[4].mxu1 %vm69_vm2, %v781_v16 }
 0x859   :  { %2943 = vmatpush1.bf16.msra.mxu1 %v3446_v8  ;;  %1327 = vmatprep.mubr.f32.mxu1 %v3351_v7 }
 0x85a   :  { %2945 = vmatprep.subr.bf16.mxu1 %v3448_v9 }
 0x85d   :  { %2947 = vmatpush1.bf16.msra.mxu1 %v3465_v14 }
 0x85e   :  { %2949 = vmatprep.subr.bf16.mxu1 %v3469_v15 }
 0x861   :  { %2951 = vmatpush1.bf16.msra.mxu1 %v3492_v21 }
 0x862   :  { %2953 = vmatprep.subr.bf16.mxu1 %v3496_v22 }
 0x865   :  { %2955 = vmatpush1.bf16.msra.mxu1 %v3506_v25 }
 0x866   :  { %2973 = vmatprep.subr.bf16.mxu1 %v3433_v3 }
 0x92b   :  { %v850_v62 = vpop.f32.mrb[4].mxu1 }
 0x92c   :  { %v874_v17 = vadd.f32 %v850_v62, %v3525_v26  ;;  %v3766_v52 = vpop.f32.mrb[5].mxu1  ;;  %v857_v3 = vrot.slane %v850_v62, 6  ;;  %v921_v1 = vrot.slane %v850_v62, 4  ;;  %v856_v60 = vrot.slane %v850_v62, 5 }
 0x92d   :  { %v956_v55 = vadd.f32 %v3480_v18, %v3766_v52 }
 0x92e   :  { %v877_v27 = vrot.slane %v874_v17, 6  ;;  %v876_v57 = vrot.slane %v874_v17, 5  ;;  %v861_v30 = vadd.f32 %v857_v3, %v3539_v35  ;;  %v923_v5 = vadd.f32 %v921_v1, %v3544_v36 }
 0x92f   :  { %v958_v56 = vrot.slane %v956_v55, 4  ;;  %v959_v59 = vrot.slane %v956_v55, 5  ;;  %v860_v18 = vadd.f32 %v856_v60, %v3544_v36  ;;  %v924_v13 = vadd.f32 %v856_v60, %v3539_v35 }
 0x930   :  { %880 = vrot.lane.b32.xlu1 %v877_v27, %s3352_s15  ;;  %v2703_v10 = vmul.f32 -1.442695, %v861_v30  ;;  %v2704_v46 = vmul.f32 -1.442695, %v923_v5  ;;  %v939_v60 = vrot.slane %v3766_v52, 5 }
 0x931   :  { %960 = vrot.lane.b32.xlu0 %v958_v56, %s3352_s15  ;;  %v2702_v19 = vmul.f32 -1.442695, %v860_v18  ;;  %v2705_v20 = vmul.f32 -1.442695, %v924_v13 }
 0x932   :  { %3140 = vpow2.f32 %v2703_v10  ;;  %v943_v5 = vadd.f32 %v939_v60, %v3567_v11 }
 0x933   :  { %3142 = vpow2.f32 %v2704_v46 }
 0x934   :  { %878 = vrot.lane.b32.xlu1 %v876_v57, %s3352_s15  ;;  %3144 = vpow2.f32 %v2702_v19  ;;  %v2707_v10 = vmul.f32 -1.442695, %v943_v5 }
 0x935   :  { %962 = vrot.lane.b32.xlu0 %v959_v59, %s3352_s15  ;;  %3146 = vpow2.f32 %v2705_v20 }
 0x93c   :  { %v3141_v23 = vpop.eup %3140 }
 0x93d   :  { %v3143_v24 = vpop.eup %3142  ;;  %v869_v28 = vadd.f32 1.0, %v3141_v23 }
 0x93e   :  { %v3145_v58 = vpop.eup %3144  ;;  %v931_v31 = vadd.f32 1.0, %v3143_v24 }
 0x93f   :  { %v3147_v32 = vpop.eup %3146  ;;  %v868_v34 = vadd.f32 1.0, %v3145_v58  ;;  %3148 = vrcp.f32 %v869_v28 }
 0x940   :  { %v932_v37 = vadd.f32 1.0, %v3147_v32  ;;  %3150 = vrcp.f32 %v931_v31 }
 0x941   :  { %3152 = vrcp.f32 %v868_v34 }
 0x942   :  { %3154 = vrcp.f32 %v932_v37 }
 0x949   :  { %v3149_v39 = vpop.eup %3148 }
 0x94a   :  { %v3151_v6 = vpop.eup %3150  ;;  %v899_v28 = vsub.f32 1.0, %v3149_v39 }
 0x94b   :  { %v3778_v42 = vpop.eup %3152 }
 0x94c   :  { %v3155_v43 = vpop.eup %3154 }
 0x9a2   :  { %v881_v40 = vpop.permute.xlu1 %880 }
 0x9a3   :  { %v961_v50 = vpop.permute.xlu0 %960  ;;  %v885_v54 = vmul.f32 %v3149_v39, %v881_v40 }
 0x9a4   :  { %v966_v41 = vmul.f32 %v3151_v6, %v961_v50 }
 0x9a5   :  { %890 = vrot.lane.b32.xlu1 %v885_v54, %s3352_s15 }
 0x9a6   :  { %970 = vrot.lane.b32.xlu0 %v966_v41, %s3352_s15  ;;  %v879_v44 = vpop.permute.xlu1 %878 }
 0x9a7   :  { %v963_v12 = vpop.permute.xlu0 %962  ;;  %v884_v29 = vmul.f32 %v3778_v42, %v879_v44 }
 0x9a8   :  { %v967_v47 = vmul.f32 %v3155_v43, %v963_v12 }
 0x9a9   :  { %888 = vrot.lane.b32.xlu1 %v884_v29, %s3352_s15 }
 0x9aa   :  { %972 = vrot.lane.b32.xlu0 %v967_v47, %s3352_s15 }
 0x9ae   :  { %913 = vrot.lane.b32.xlu0 %v3752_v51, %s3354_s28 }
 0x9b2   :  { %993 = vrot.lane.b32.xlu0 %v992_v48, %s3353_s27 }
 0x9b6   :  { %911 = vrot.lane.b32.xlu0 %v910_v49, %s3354_s28 }
 0x9ba   :  { %995 = vrot.lane.b32.xlu0 %v910_v49, %s3353_s27 }
 0xa17   :  { %v891_v16 = vpop.permute.xlu1 %890 }
 0xa18   :  { %v895_v62 = vadd.f32 %v891_v16, %v3539_v35  ;;  %v971_v17 = vpop.permute.xlu0 %970 }
 0xa19   :  { %v976_v56 = vadd.f32 %v971_v17, %v3560_v2 }
 0xa1a   :  { %3156 = vtanh.f32 %v895_v62 }
 0xa1b   :  { %v889_v55 = vpop.permute.xlu1 %888 }
 0xa1c   :  { %v894_v27 = vadd.f32 %v889_v55, %v3544_v36  ;;  %v973_v57 = vpop.permute.xlu0 %972  ;;  %v938_v36 = vrot.slane %v3766_v52, 4 }
 0xa1d   :  { %v977_v59 = vadd.f32 %v973_v57, %v3567_v11  ;;  %v898_v11 = vsub.f32 1.0, %v3778_v42 }
 0xa1e   :  { %3158 = vtanh.f32 %v894_v27  ;;  %v942_v30 = vadd.f32 %v938_v36, %v3560_v2  ;;  %v3843_v36 = vld [vmem:[%s4307_s3] ss:$0 sm:$0xff] }
 0xa1f   :  { %3160 = vtanh.f32 %v976_v56 }
 0xa20   :  { %3162 = vtanh.f32 %v977_v59  ;;  %v2706_v18 = vmul.f32 -1.442695, %v942_v30  ;;  %v914_v19 = vpop.permute.xlu0 %913 }
 0xa21   :  { %v918_v31 = vmul.f32 %v3149_v39, %v914_v19  ;;  %v3854_v19 = vld [vmem:[%s4304_s0 + $0x10] sm:$0xff] }
 0xa22   :  { %3164 = vpow2.f32 %v2706_v18 }
 0xa23   :  { %3166 = vpow2.f32 %v2707_v10 }
 0xa24   :  { %v3157_v51 = vpop.eup %3156  ;;  %v994_v24 = vpop.permute.xlu0 %993 }
 0xa25   :  { %904 = vrot.lane.b32.xlu1 %v3157_v51, %s3353_s27 }
 0xa28   :  { %v3159_v3 = vpop.eup %3158  ;;  %v912_v32 = vpop.permute.xlu0 %911 }
 0xa29   :  { %902 = vrot.lane.b32.xlu1 %v3159_v3, %s3353_s27  ;;  %v3161_v35 = vpop.eup %3160  ;;  %v917_v6 = vmul.f32 %v3778_v42, %v912_v32 }
 0xa2a   :  { %v3163_v1 = vpop.eup %3162 }
 0xa2c   :  { %v3165_v13 = vpop.eup %3164  ;;  %v996_v42 = vpop.permute.xlu0 %995 }
 0xa2d   :  { %984 = vrot.lane.b32.xlu1 %v3161_v35, %s3353_s27  ;;  %v950_v46 = vadd.f32 1.0, %v3165_v13  ;;  %v3167_v20 = vpop.eup %3166 }
 0xa2e   :  { %v951_v23 = vadd.f32 1.0, %v3167_v20 }
 0xa2f   :  { %3168 = vrcp.f32 %v950_v46 }
 0xa30   :  { %3170 = vrcp.f32 %v951_v23 }
 0xa31   :  { %986 = vrot.lane.b32.xlu1 %v3163_v1, %s3353_s27 }
 0xa39   :  { %v3169_v34 = vpop.eup %3168 }
 0xa3a   :  { %v980_v43 = vsub.f32 1.0, %v3169_v34  ;;  %v3171_v39 = vpop.eup %3170  ;;  %v999_v12 = vmul.f32 %v3169_v34, %v994_v24  ;;  %v3860_v24 = vld [vmem:[%s4304_s0] sm:$0xff] }
 0xa3b   :  { %v981_v49 = vsub.f32 1.0, %v3171_v39  ;;  %v1000_v62 = vmul.f32 %v3171_v39, %v996_v42 }
 0xa97   :  { %v905_v58 = vpop.permute.xlu1 %904 }
 0xa98   :  { %v909_v52 = vmul.f32 %v905_v58, %v899_v28 }
 0xa9a   :  { %v920_v2 = vadd.f32 %v918_v31, %v909_v52 }
 0xa9b   :  { %v903_v37 = vpop.permute.xlu1 %902 }
 0xa9c   :  { %v3808_v40 = vsel %vm1966_vm7, %v3733_v33, %v920_v2  ;;  %v908_v50 = vmul.f32 %v903_v37, %v898_v11  ;;  %v1005_v54 = vrot.slane %v920_v2, 7 }
 0xa9e   :  { %v919_v41 = vadd.f32 %v917_v6, %v908_v50 }
 0xa9f   :  { %v985_v44 = vpop.permute.xlu1 %984 }
 0xaa0   :  { %v3812_v29 = vsel %vm1966_vm7, %v3748_v45, %v919_v41  ;;  %v990_v47 = vmul.f32 %v985_v44, %v980_v43  ;;  %v1007_v48 = vsel %vm1006_vm8, %v1005_v54, %v919_v41 }
 0xaa1   :  { %1008 = vrot.lane.b32.xlu1 %v1007_v48, %s3353_s27 }
 0xaa2   :  { %v3816_v33 = vadd.f32 %v999_v12, %v990_v47 }
 0xaa3   :  { %v987_v16 = vpop.permute.xlu1 %986 }
 0xaa4   :  { %v991_v17 = vmul.f32 %v987_v16, %v981_v49  ;;  %v1013_v55 = vrot.slane %v3816_v33, 1 }
 0xaa6   :  { %v3819_v27 = vadd.f32 %v1000_v62, %v991_v17 }
 0xaa8   :  { %v1014_v45 = vsel %vm1006_vm8, %v3819_v27, %v1013_v55 }
 0xaa9   :  { %1015 = vrot.lane.b32.xlu0 %v1014_v45, %s3354_s28 }
 0xb13   :  { %v1009_v56 = vpop.permute.xlu1 %1008 }
 0xb1b   :  { %v1016_v57 = vpop.permute.xlu0 %1015 }
 0xb1c   :  { %v3825_v59 = vsel %vm295_vm1, %v1009_v56, %v1016_v57 }
 0xb1d   :  { %v1020_v51 = vrot.slane %v3825_v59, 3  ;;  %v1231_v57 = vrot.slane %v3825_v59, 1 }
 0xb1f   :  { %2708 = vmatmul.mubr.msk.f32.vlgmr.msra.gmra.mrb[2].mxu0 %vm69_vm2, %v1020_v51 }
 0xb20   :  { %2959 = vmatpush1.bf16.msra.mxu0 %v3446_v8  ;;  %1570 = vmatprep.mubr.f32.mxu0 %v3351_v7 }
 0xb21   :  { %2961 = vmatprep.subr.bf16.mxu0 %v3448_v9 }
 0xb24   :  { %2963 = vmatpush1.bf16.msra.mxu0 %v3465_v14 }
 0xb25   :  { %2965 = vmatprep.subr.bf16.mxu0 %v3469_v15 }
 0xb28   :  { %2967 = vmatpush1.bf16.msra.mxu0 %v3492_v21 }
 0xb29   :  { %2969 = vmatprep.subr.bf16.mxu0 %v3496_v22 }
 0xb2c   :  { %2971 = vmatpush1.bf16.msra.mxu0 %v3506_v25 }
 0xbf2   :  { %v1089_v3 = vpop.f32.mrb[2].mxu0 }
 0xbf3   :  { %v1113_v35 = vadd.f32 %v1089_v3, %v3525_v26  ;;  %v3838_v1 = vpop.f32.mrb[3].mxu0  ;;  %v1096_v13 = vrot.slane %v1089_v3, 5  ;;  %v1095_v46 = vrot.slane %v1089_v3, 4  ;;  %v1160_v23 = vrot.slane %v1089_v3, 6 }
 0xbf4   :  { %v1195_v60 = vadd.f32 %v3843_v36, %v3838_v1 }
 0xbf5   :  { %v1116_v30 = vrot.slane %v1113_v35, 5  ;;  %v1115_v10 = vrot.slane %v1113_v35, 4  ;;  %v1100_v20 = vadd.f32 %v3854_v19, %v1096_v13  ;;  %v1162_v28 = vadd.f32 %v3860_v24, %v1096_v13 }
 0xbf6   :  { %v1197_v5 = vrot.slane %v1195_v60, 5  ;;  %v1198_v18 = vrot.slane %v1195_v60, 6  ;;  %v1099_v58 = vadd.f32 %v3860_v24, %v1095_v46  ;;  %v1163_v52 = vadd.f32 %v3854_v19, %v1160_v23  ;;  %v3885_v60 = vld [vmem:[%s4304_s0 + $0x8] sm:$0xff] }
 0xbf7   :  { %1119 = vrot.lane.b32.xlu1 %v1116_v30, %s3352_s15  ;;  %v2710_v31 = vmul.f32 -1.442695, %v1100_v20  ;;  %v2711_v32 = vmul.f32 -1.442695, %v1162_v28 }
 0xbf8   :  { %1199 = vrot.lane.b32.xlu0 %v1197_v5, %s3352_s15  ;;  %v2709_v2 = vmul.f32 -1.442695, %v1099_v58  ;;  %v2712_v11 = vmul.f32 -1.442695, %v1163_v52  ;;  %v1149_v58 = vrot.slane %v3825_v59, 7  ;;  %v1177_v52 = vrot.slane %v3838_v1, 5 }
 0xbf9   :  { %3172 = vpow2.f32 %v2710_v31 }
 0xbfa   :  { %3174 = vpow2.f32 %v2711_v32  ;;  %v1178_v32 = vrot.slane %v3838_v1, 6 }
 0xbfb   :  { %1201 = vrot.lane.b32.xlu1 %v1198_v18, %s3352_s15  ;;  %3176 = vpow2.f32 %v2709_v2  ;;  %v1181_v2 = vadd.f32 %v3885_v60, %v1177_v52 }
 0xbfc   :  { %1117 = vrot.lane.b32.xlu0 %v1115_v10, %s3352_s15  ;;  %3178 = vpow2.f32 %v2712_v11  ;;  %v3891_v10 = vld [vmem:[%s4304_s0 + $0x18] sm:$0xff] }
 0xbfd   :  { %v1182_v11 = vadd.f32 %v3891_v10, %v1178_v32 }
 0xc03   :  { %v3173_v34 = vpop.eup %3172 }
 0xc04   :  { %v3175_v37 = vpop.eup %3174  ;;  %v1108_v6 = vadd.f32 1.0, %v3173_v34  ;;  %v2713_v34 = vmul.f32 -1.442695, %v1181_v2 }
 0xc05   :  { %v3177_v50 = vpop.eup %3176  ;;  %v1170_v54 = vadd.f32 1.0, %v3175_v37  ;;  %v2714_v37 = vmul.f32 -1.442695, %v1182_v11 }
 0xc06   :  { %v3179_v41 = vpop.eup %3178  ;;  %v1107_v43 = vadd.f32 1.0, %v3177_v50  ;;  %3180 = vrcp.f32 %v1108_v6 }
 0xc07   :  { %v1171_v39 = vadd.f32 1.0, %v3179_v41  ;;  %3182 = vrcp.f32 %v1170_v54 }
 0xc08   :  { %3184 = vrcp.f32 %v1107_v43 }
 0xc09   :  { %3186 = vrcp.f32 %v1171_v39 }
 0xc10   :  { %v3865_v44 = vpop.eup %3180 }
 0xc11   :  { %v3183_v12 = vpop.eup %3182 }
 0xc12   :  { %v3868_v16 = vpop.eup %3184 }
 0xc13   :  { %v3187_v62 = vpop.eup %3186 }
 0xc69   :  { %v1120_v47 = vpop.permute.xlu1 %1119 }
 0xc6a   :  { %v1200_v48 = vpop.permute.xlu0 %1199  ;;  %v1124_v42 = vmul.f32 %v3865_v44, %v1120_v47 }
 0xc6b   :  { %v1205_v49 = vmul.f32 %v3183_v12, %v1200_v48  ;;  %v1138_v12 = vsub.f32 1.0, %v3865_v44 }
 0xc6c   :  { %1129 = vrot.lane.b32.xlu1 %v1124_v42, %s3352_s15 }
 0xc6d   :  { %1209 = vrot.lane.b32.xlu0 %v1205_v49, %s3352_s15  ;;  %v1202_v17 = vpop.permute.xlu1 %1201 }
 0xc6e   :  { %v1118_v55 = vpop.permute.xlu0 %1117  ;;  %v1206_v45 = vmul.f32 %v3187_v62, %v1202_v17 }
 0xc6f   :  { %v1123_v56 = vmul.f32 %v3868_v16, %v1118_v55 }
 0xc70   :  { %1211 = vrot.lane.b32.xlu1 %v1206_v45, %s3352_s15 }
 0xc71   :  { %1127 = vrot.lane.b32.xlu0 %v1123_v56, %s3352_s15 }
 0xc74   :  { %1232 = vrot.lane.b32.xlu1 %v3825_v59, %s3353_s27 }
 0xc75   :  { %1152 = vrot.lane.b32.xlu0 %v3825_v59, %s3354_s28 }
 0xc79   :  { %1234 = vrot.lane.b32.xlu0 %v1231_v57, %s3353_s27 }
 0xcde   :  { %v1130_v51 = vpop.permute.xlu1 %1129 }
 0xcdf   :  { %v1210_v3 = vpop.permute.xlu0 %1209  ;;  %v1134_v35 = vadd.f32 %v3854_v19, %v1130_v51 }
 0xce0   :  { %v1215_v30 = vadd.f32 %v3885_v60, %v1210_v3 }
 0xce1   :  { %3188 = vtanh.f32 %v1134_v35 }
 0xce2   :  { %v1212_v5 = vpop.permute.xlu1 %1211  ;;  %3190 = vtanh.f32 %v1215_v30 }
 0xce3   :  { %v1128_v18 = vpop.permute.xlu0 %1127  ;;  %v1216_v13 = vadd.f32 %v3891_v10, %v1212_v5 }
 0xce4   :  { %v1133_v46 = vadd.f32 %v3860_v24, %v1128_v18 }
 0xce5   :  { %3192 = vtanh.f32 %v1216_v13 }
 0xce6   :  { %3194 = vtanh.f32 %v1133_v46  ;;  %v1233_v43 = vpop.permute.xlu1 %1232 }
 0xce7   :  { %3196 = vpow2.f32 %v2713_v34  ;;  %v1153_v41 = vpop.permute.xlu0 %1152 }
 0xce8   :  { %3198 = vpow2.f32 %v2714_v37  ;;  %v1157_v42 = vmul.f32 %v3865_v44, %v1153_v41  ;;  %v1137_v44 = vsub.f32 1.0, %v3868_v16 }
 0xceb   :  { %v3189_v20 = vpop.eup %3188  ;;  %v1235_v47 = vpop.permute.xlu0 %1234 }
 0xcec   :  { %1143 = vrot.lane.b32.xlu1 %v3189_v20, %s3353_s27  ;;  %v3191_v23 = vpop.eup %3190 }
 0xcef   :  { %v3193_v28 = vpop.eup %3192 }
 0xcf0   :  { %1225 = vrot.lane.b32.xlu0 %v3193_v28, %s3353_s27  ;;  %1223 = vrot.lane.b32.xlu1 %v3191_v23, %s3353_s27  ;;  %v3195_v31 = vpop.eup %3194 }
 0xcf1   :  { %v3197_v6 = vpop.eup %3196 }
 0xcf2   :  { %v3199_v50 = vpop.eup %3198  ;;  %v1189_v59 = vadd.f32 1.0, %v3197_v6 }
 0xcf3   :  { %v1190_v54 = vadd.f32 1.0, %v3199_v50 }
 0xcf4   :  { %1150 = vrot.lane.b32.xlu0 %v1149_v58, %s3354_s28  ;;  %1141 = vrot.lane.b32.xlu1 %v3195_v31, %s3353_s27  ;;  %3200 = vrcp.f32 %v1189_v59 }
 0xcf5   :  { %3202 = vrcp.f32 %v1190_v54 }
 0xcfe   :  { %v3201_v39 = vpop.eup %3200 }
 0xcff   :  { %v3203_v1 = vpop.eup %3202  ;;  %v1219_v17 = vsub.f32 1.0, %v3201_v39  ;;  %v1238_v45 = vmul.f32 %v3201_v39, %v1233_v43 }
 0xd00   :  { %v1220_v55 = vsub.f32 1.0, %v3203_v1  ;;  %v1239_v51 = vmul.f32 %v3203_v1, %v1235_v47 }
 0xd5e   :  { %v1144_v48 = vpop.permute.xlu1 %1143 }
 0xd5f   :  { %v1148_v49 = vmul.f32 %v1144_v48, %v1138_v12 }
 0xd61   :  { %v1159_v62 = vadd.f32 %v1157_v42, %v1148_v49 }
 0xd62   :  { %v1224_v56 = vpop.permute.xlu1 %1223  ;;  %v1226_v57 = vpop.permute.xlu0 %1225 }
 0xd63   :  { %v3909_v3 = vsel %vm1969_vm9, %v3808_v40, %v1159_v62  ;;  %v1229_v35 = vmul.f32 %v1224_v56, %v1219_v17  ;;  %v1230_v30 = vmul.f32 %v1226_v57, %v1220_v55  ;;  %v1244_v40 = vrot.slane %v1159_v62, 7 }
 0xd65   :  { %v3911_v5 = vadd.f32 %v1238_v45, %v1229_v35  ;;  %v3913_v18 = vadd.f32 %v1239_v51, %v1230_v30 }
 0xd66   :  { %v1142_v13 = vpop.permute.xlu1 %1141  ;;  %v1151_v46 = vpop.permute.xlu0 %1150 }
 0xd67   :  { %v1252_v20 = vrot.slane %v3911_v5, 7  ;;  %v1253_v23 = vrot.slane %v3913_v18, 6  ;;  %v1147_v28 = vmul.f32 %v1142_v13, %v1137_v44  ;;  %v1156_v58 = vmul.f32 %v3868_v16, %v1151_v46 }
 0xd69   :  { %v1158_v31 = vadd.f32 %v1156_v58, %v1147_v28  ;;  %v1254_v52 = vsel %vm1245_vm10, %v1253_v23, %v1252_v20 }
 0xd6a   :  { %1255 = vrot.lane.b32.xlu0 %v1254_v52, %s3354_s28 }
 0xd6b   :  { %v3922_v32 = vsel %vm1969_vm9, %v3812_v29, %v1158_v31  ;;  %v1246_v2 = vsel %vm1245_vm10, %v1244_v40, %v1158_v31 }
 0xd6c   :  { %1247 = vrot.lane.b32.xlu1 %v1246_v2, %s3353_s27 }
 0xddc   :  { %v1256_v11 = vpop.permute.xlu0 %1255 }
 0xdde   :  { %v1248_v34 = vpop.permute.xlu1 %1247 }
 0xddf   :  { %v3926_v37 = vsel %vm295_vm1, %v1248_v34, %v1256_v11 }
 0xde0   :  { %v1260_v6 = vrot.slane %v3926_v37, 4  ;;  %v1473_v2 = vrot.slane %v3926_v37, 2  ;;  %v1474_v11 = vrot.slane %v3926_v37, 3 }
 0xde2   :  { %2715 = vmatmul.mubr.msk.f32.vlgmr.msra.gmra.mrb[6].mxu1 %vm69_vm2, %v1260_v6 }
 0xde3   :  { %2975 = vmatpush1.bf16.msra.mxu1 %v3446_v8  ;;  %1809 = vmatprep.mubr.f32.mxu1 %v3351_v7 }
 0xde4   :  { %2977 = vmatprep.subr.bf16.mxu1 %v3448_v9 }
 0xde7   :  { %2979 = vmatpush1.bf16.msra.mxu1 %v3465_v14 }
 0xde8   :  { %2981 = vmatprep.subr.bf16.mxu1 %v3469_v15 }
 0xdeb   :  { %2983 = vmatpush1.bf16.msra.mxu1 %v3492_v21 }
 0xdec   :  { %2985 = vmatprep.subr.bf16.mxu1 %v3496_v22 }
 0xdef   :  { %2987 = vmatpush1.bf16.msra.mxu1 %v3506_v25 }
 0xdf0   :  { %2805 = vmatprep.subr.mxu1 %v3351_v7 }
 0xeb5   :  { %v1329_v29 = vpop.f32.mrb[6].mxu1 }
 0xeb6   :  { %v3939_v16 = vpop.f32.mrb[7].mxu1  ;;  %v1353_v9 = vadd.f32 %v1329_v29, %v3525_v26  ;;  %v1336_v22 = vrot.slane %v1329_v29, 4  ;;  %v1400_v25 = vrot.slane %v1329_v29, 6  ;;  %v1335_v59 = vrot.slane %v1329_v29, 3 }
 0xeb7   :  { %v1437_v8 = vadd.f32 %v3843_v36, %v3939_v16  ;;  %v1401_v41 = vrot.slane %v1329_v29, 7 }
 0xeb8   :  { %v1356_v50 = vrot.slane %v1353_v9, 4  ;;  %v1355_v21 = vrot.slane %v1353_v9, 3  ;;  %v1340_v54 = vadd.f32 %v3854_v19, %v1336_v22  ;;  %v1404_v43 = vadd.f32 %v3860_v24, %v1400_v25 }
 0xeb9   :  { %v1439_v14 = vrot.slane %v1437_v8, 6  ;;  %v1440_v15 = vrot.slane %v1437_v8, 7  ;;  %v1339_v39 = vadd.f32 %v3860_v24, %v1335_v59  ;;  %v1405_v1 = vadd.f32 %v3854_v19, %v1401_v41 }
 0xeba   :  { %1359 = vrot.lane.b32.xlu1 %v1356_v50, %s3352_s15  ;;  %v2717_v12 = vmul.f32 -1.442695, %v1340_v54  ;;  %v2718_v47 = vmul.f32 -1.442695, %v1404_v43  ;;  %v1389_v59 = vrot.slane %v3926_v37, 7  ;;  %v1419_v41 = vrot.slane %v3939_v16, 6 }
 0xebb   :  { %1441 = vrot.lane.b32.xlu0 %v1439_v14, %s3352_s15  ;;  %v2716_v48 = vmul.f32 -1.442695, %v1339_v39  ;;  %v2719_v42 = vmul.f32 -1.442695, %v1405_v1  ;;  %v1420_v43 = vrot.slane %v3939_v16, 7 }
 0xebc   :  { %3204 = vpow2.f32 %v2717_v12  ;;  %v1423_v39 = vadd.f32 %v3885_v60, %v1419_v41 }
 0xebd   :  { %3206 = vpow2.f32 %v2718_v47  ;;  %v1424_v12 = vadd.f32 %v3891_v10, %v1420_v43 }
 0xebe   :  { %1443 = vrot.lane.b32.xlu1 %v1440_v15, %s3352_s15  ;;  %3208 = vpow2.f32 %v2716_v48  ;;  %v2720_v1 = vmul.f32 -1.442695, %v1423_v39 }
 0xebf   :  { %1357 = vrot.lane.b32.xlu0 %v1355_v21, %s3352_s15  ;;  %3210 = vpow2.f32 %v2719_v42  ;;  %v2721_v47 = vmul.f32 -1.442695, %v1424_v12 }
 0xec6   :  { %v3205_v49 = vpop.eup %3204 }
 0xec7   :  { %v3207_v62 = vpop.eup %3206  ;;  %v1348_v17 = vadd.f32 1.0, %v3205_v49 }
 0xec8   :  { %v3209_v55 = vpop.eup %3208  ;;  %v1412_v45 = vadd.f32 1.0, %v3207_v62 }
 0xec9   :  { %v3211_v56 = vpop.eup %3210  ;;  %v1347_v57 = vadd.f32 1.0, %v3209_v55  ;;  %3212 = vrcp.f32 %v1348_v17 }
 0xeca   :  { %3214 = vrcp.f32 %v1412_v45  ;;  %v1413_v51 = vadd.f32 1.0, %v3211_v56 }
 0xecb   :  { %3216 = vrcp.f32 %v1347_v57 }
 0xecc   :  { %3218 = vrcp.f32 %v1413_v51 }
 0xed3   :  { %v3952_v35 = vpop.eup %3212 }
 0xed4   :  { %v3215_v30 = vpop.eup %3214  ;;  %v1378_v45 = vsub.f32 1.0, %v3952_v35 }
 0xed5   :  { %v3955_v23 = vpop.eup %3216 }
 0xed6   :  { %v3219_v28 = vpop.eup %3218 }
 0xf2c   :  { %v1360_v44 = vpop.permute.xlu1 %1359 }
 0xf2d   :  { %v1442_v13 = vpop.permute.xlu0 %1441  ;;  %v1364_v46 = vmul.f32 %v3952_v35, %v1360_v44 }
 0xf2e   :  { %v1447_v20 = vmul.f32 %v3215_v30, %v1442_v13 }
 0xf2f   :  { %1369 = vrot.lane.b32.xlu1 %v1364_v46, %s3352_s15 }
 0xf30   :  { %1451 = vrot.lane.b32.xlu0 %v1447_v20, %s3352_s15  ;;  %v1444_v58 = vpop.permute.xlu1 %1443 }
 0xf31   :  { %v1358_v40 = vpop.permute.xlu0 %1357  ;;  %v1448_v31 = vmul.f32 %v3219_v28, %v1444_v58 }
 0xf32   :  { %v1363_v52 = vmul.f32 %v3955_v23, %v1358_v40 }
 0xf33   :  { %1453 = vrot.lane.b32.xlu1 %v1448_v31, %s3352_s15 }
 0xf34   :  { %1367 = vrot.lane.b32.xlu0 %v1363_v52, %s3352_s15 }
 0xf37   :  { %1475 = vrot.lane.b32.xlu1 %v1473_v2, %s3353_s27 }
 0xf38   :  { %1392 = vrot.lane.b32.xlu0 %v3926_v37, %s3354_s28 }
 0xf3c   :  { %1477 = vrot.lane.b32.xlu0 %v1474_v11, %s3353_s27 }
 0xfa1   :  { %v1370_v34 = vpop.permute.xlu1 %1369 }
 0xfa2   :  { %v1452_v6 = vpop.permute.xlu0 %1451  ;;  %v1374_v29 = vadd.f32 %v3854_v19, %v1370_v34 }
 0xfa3   :  { %v1457_v8 = vadd.f32 %v3885_v60, %v1452_v6 }
 0xfa4   :  { %3220 = vtanh.f32 %v1374_v29 }
 0xfa5   :  { %v1454_v9 = vpop.permute.xlu1 %1453  ;;  %3222 = vtanh.f32 %v1457_v8 }
 0xfa6   :  { %v1368_v50 = vpop.permute.xlu0 %1367  ;;  %v1458_v14 = vadd.f32 %v3891_v10, %v1454_v9 }
 0xfa7   :  { %v1373_v15 = vadd.f32 %v3860_v24, %v1368_v50 }
 0xfa8   :  { %3224 = vtanh.f32 %v1458_v14 }
 0xfa9   :  { %3226 = vtanh.f32 %v1373_v15  ;;  %v1476_v17 = vpop.permute.xlu1 %1475 }
 0xfaa   :  { %3228 = vpow2.f32 %v2720_v1  ;;  %v1393_v62 = vpop.permute.xlu0 %1392 }
 0xfab   :  { %3230 = vpow2.f32 %v2721_v47  ;;  %v1397_v51 = vmul.f32 %v3952_v35, %v1393_v62  ;;  %v1377_v35 = vsub.f32 1.0, %v3955_v23 }
 0xfae   :  { %v3221_v21 = vpop.eup %3220  ;;  %v1478_v56 = vpop.permute.xlu0 %1477 }
 0xfaf   :  { %1383 = vrot.lane.b32.xlu1 %v3221_v21, %s3353_s27  ;;  %v3223_v22 = vpop.eup %3222 }
 0xfb2   :  { %v3225_v25 = vpop.eup %3224 }
 0xfb3   :  { %1467 = vrot.lane.b32.xlu0 %v3225_v25, %s3353_s27  ;;  %1465 = vrot.lane.b32.xlu1 %v3223_v22, %s3353_s27  ;;  %v3227_v54 = vpop.eup %3226 }
 0xfb4   :  { %v3229_v48 = vpop.eup %3228 }
 0xfb5   :  { %v3231_v42 = vpop.eup %3230  ;;  %v1431_v37 = vadd.f32 1.0, %v3229_v48 }
 0xfb6   :  { %v1432_v49 = vadd.f32 1.0, %v3231_v42 }
 0xfb7   :  { %1390 = vrot.lane.b32.xlu0 %v1389_v59, %s3354_s28  ;;  %1381 = vrot.lane.b32.xlu1 %v3227_v54, %s3353_s27  ;;  %3232 = vrcp.f32 %v1431_v37 }
 0xfb8   :  { %3234 = vrcp.f32 %v1432_v49 }
 0xfc1   :  { %v3233_v55 = vpop.eup %3232 }
 0xfc2   :  { %v3235_v16 = vpop.eup %3234  ;;  %v1461_v13 = vsub.f32 1.0, %v3233_v55  ;;  %v1481_v20 = vmul.f32 %v3233_v55, %v1476_v17 }
 0xfc3   :  { %v1462_v46 = vsub.f32 1.0, %v3235_v16  ;;  %v1482_v40 = vmul.f32 %v3235_v16, %v1478_v56 }
0x1021   :  { %v1384_v57 = vpop.permute.xlu1 %1383 }
0x1022   :  { %v1388_v30 = vmul.f32 %v1384_v57, %v1378_v45 }
0x1024   :  { %v1399_v44 = vadd.f32 %v1397_v51, %v1388_v30 }
0x1025   :  { %v1466_v28 = vpop.permute.xlu1 %1465  ;;  %v1468_v58 = vpop.permute.xlu0 %1467 }
0x1026   :  { %v3986_v31 = vsel %vm1972_vm11, %v3909_v3, %v1399_v44  ;;  %v1471_v52 = vmul.f32 %v1466_v28, %v1461_v13  ;;  %v1472_v2 = vmul.f32 %v1468_v58, %v1462_v46  ;;  %v1487_v3 = vrot.slane %v1399_v44, 7 }
0x1028   :  { %v3988_v11 = vadd.f32 %v1481_v20, %v1471_v52  ;;  %v3990_v34 = vadd.f32 %v1482_v40, %v1472_v2 }
0x1029   :  { %v1382_v6 = vpop.permute.xlu1 %1381  ;;  %v1391_v29 = vpop.permute.xlu0 %1390 }
0x102a   :  { %v1495_v8 = vrot.slane %v3988_v11, 5  ;;  %v1496_v9 = vrot.slane %v3990_v34, 4  ;;  %v1387_v50 = vmul.f32 %v1382_v6, %v1377_v35  ;;  %v1396_v14 = vmul.f32 %v3955_v23, %v1391_v29 }
0x102c   :  { %v1398_v15 = vadd.f32 %v1396_v14, %v1387_v50  ;;  %v1497_v21 = vsel %vm1488_vm12, %v1496_v9, %v1495_v8 }
0x102d   :  { %1498 = vrot.lane.b32.xlu0 %v1497_v21, %s3354_s28 }
0x102e   :  { %v3999_v22 = vsel %vm1972_vm11, %v3922_v32, %v1398_v15  ;;  %v1489_v25 = vsel %vm1488_vm12, %v1487_v3, %v1398_v15 }
0x102f   :  { %1490 = vrot.lane.b32.xlu1 %v1489_v25, %s3353_s27 }
0x109f   :  { %v1499_v59 = vpop.permute.xlu0 %1498 }
0x10a1   :  { %v1491_v54 = vpop.permute.xlu1 %1490 }
0x10a2   :  { %v4003_v41 = vsel %vm295_vm1, %v1491_v54, %v1499_v59 }
0x10a3   :  { %v1503_v43 = vrot.slane %v4003_v41, 5  ;;  %v1713_v25 = vrot.slane %v4003_v41, 4 }
0x10a5   :  { %2722 = vmatmul.mubr.msk.f32.vlgmr.msra.gmra.mrb[4].mxu0 %vm69_vm2, %v1503_v43 }
0x1178   :  { %v1572_v23 = vpop.f32.mrb[4].mxu0 }
0x1179   :  { %v1596_v39 = vadd.f32 %v1572_v23, %v3525_v26  ;;  %v4008_v12 = vpop.f32.mrb[5].mxu0  ;;  %v1579_v42 = vrot.slane %v1572_v23, 3  ;;  %v1643_v37 = vrot.slane %v1572_v23, 7  ;;  %v1578_v62 = vrot.slane %v1572_v23, 2 }
0x117a   :  { %v1678_v32 = vadd.f32 %v3843_v36, %v4008_v12  ;;  %v1647_v45 = vadd.f32 %v3854_v19, %v1572_v23 }
0x117b   :  { %v1599_v1 = vrot.slane %v1596_v39, 3  ;;  %v1598_v48 = vrot.slane %v1596_v39, 2  ;;  %v1583_v49 = vadd.f32 %v3854_v19, %v1579_v42  ;;  %v1646_v17 = vadd.f32 %v3860_v24, %v1643_v37 }
0x117c   :  { %v1680_v47 = vrot.slane %v1678_v32, 7  ;;  %v1582_v16 = vadd.f32 %v3860_v24, %v1578_v62  ;;  %v2726_v57 = vmul.f32 -1.442695, %v1647_v45  ;;  %v1665_v45 = vadd.f32 %v3891_v10, %v4008_v12 }
0x117d   :  { %1602 = vrot.lane.b32.xlu1 %v1599_v1, %s3352_s15  ;;  %v2724_v55 = vmul.f32 -1.442695, %v1583_v49  ;;  %v2725_v56 = vmul.f32 -1.442695, %v1646_v17  ;;  %v1632_v49 = vrot.slane %v4003_v41, 7  ;;  %v1661_v17 = vrot.slane %v4008_v12, 7 }
0x117e   :  { %1681 = vrot.lane.b32.xlu0 %v1680_v47, %s3352_s15  ;;  %v2723_v51 = vmul.f32 -1.442695, %v1582_v16 }
0x117f   :  { %3236 = vpow2.f32 %v2724_v55  ;;  %v1664_v55 = vadd.f32 %v3885_v60, %v1661_v17 }
0x1180   :  { %3238 = vpow2.f32 %v2725_v56  ;;  %v2728_v56 = vmul.f32 -1.442695, %v1665_v45 }
0x1181   :  { %1683 = vrot.lane.b32.xlu1 %v1678_v32, %s3352_s15  ;;  %3240 = vpow2.f32 %v2726_v57  ;;  %v2727_v16 = vmul.f32 -1.442695, %v1664_v55 }
0x1182   :  { %1600 = vrot.lane.b32.xlu0 %v1598_v48, %s3352_s15  ;;  %3242 = vpow2.f32 %v2723_v51 }
0x1189   :  { %v3237_v30 = vpop.eup %3236 }
0x118a   :  { %v3239_v44 = vpop.eup %3238  ;;  %v1591_v13 = vadd.f32 1.0, %v3237_v30 }
0x118b   :  { %v3241_v46 = vpop.eup %3240  ;;  %v1654_v20 = vadd.f32 1.0, %v3239_v44 }
0x118c   :  { %v3243_v28 = vpop.eup %3242  ;;  %3244 = vrcp.f32 %v1591_v13  ;;  %v1655_v58 = vadd.f32 1.0, %v3241_v46 }
0x118d   :  { %v1590_v40 = vadd.f32 1.0, %v3243_v28  ;;  %3246 = vrcp.f32 %v1654_v20 }
0x118e   :  { %3248 = vrcp.f32 %v1655_v58 }
0x118f   :  { %3250 = vrcp.f32 %v1590_v40 }
0x1196   :  { %v4020_v52 = vpop.eup %3244 }
0x1197   :  { %v3247_v35 = vpop.eup %3246  ;;  %v1621_v20 = vsub.f32 1.0, %v4020_v52 }
0x1198   :  { %v3249_v9 = vpop.eup %3248 }
0x1199   :  { %v4025_v14 = vpop.eup %3250 }
0x11ef   :  { %v1603_v2 = vpop.permute.xlu1 %1602 }
0x11f0   :  { %v1607_v6 = vmul.f32 %v4020_v52, %v1603_v2  ;;  %v1682_v29 = vpop.permute.xlu0 %1681 }
0x11f1   :  { %v1687_v8 = vmul.f32 %v3247_v35, %v1682_v29 }
0x11f2   :  { %1612 = vrot.lane.b32.xlu1 %v1607_v6, %s3352_s15 }
0x11f3   :  { %v1684_v50 = vpop.permute.xlu1 %1683  ;;  %1691 = vrot.lane.b32.xlu0 %v1687_v8, %s3352_s15 }
0x11f4   :  { %v1688_v3 = vmul.f32 %v3249_v9, %v1684_v50  ;;  %v1601_v15 = vpop.permute.xlu0 %1600 }
0x11f5   :  { %v1606_v21 = vmul.f32 %v4025_v14, %v1601_v15 }
0x11f6   :  { %1693 = vrot.lane.b32.xlu1 %v1688_v3, %s3352_s15 }
0x11f7   :  { %1610 = vrot.lane.b32.xlu0 %v1606_v21, %s3352_s15 }
0x11fa   :  { %1714 = vrot.lane.b32.xlu1 %v1713_v25, %s3353_s27 }
0x11fb   :  { %1635 = vrot.lane.b32.xlu0 %v4003_v41, %s3354_s28 }
0x11ff   :  { %1716 = vrot.lane.b32.xlu0 %v1503_v43, %s3353_s27 }
0x1264   :  { %v1613_v59 = vpop.permute.xlu1 %1612 }
0x1265   :  { %v1617_v54 = vadd.f32 %v3854_v19, %v1613_v59  ;;  %v1692_v23 = vpop.permute.xlu0 %1691 }
0x1266   :  { %v1697_v39 = vadd.f32 %v3885_v60, %v1692_v23 }
0x1267   :  { %3252 = vtanh.f32 %v1617_v54 }
0x1268   :  { %v1694_v32 = vpop.permute.xlu1 %1693  ;;  %3254 = vtanh.f32 %v1697_v39 }
0x1269   :  { %v1698_v1 = vadd.f32 %v3891_v10, %v1694_v32  ;;  %v1611_v47 = vpop.permute.xlu0 %1610 }
0x126a   :  { %v1616_v48 = vadd.f32 %v3860_v24, %v1611_v47 }
0x126b   :  { %3256 = vtanh.f32 %v1698_v1 }
0x126c   :  { %3258 = vtanh.f32 %v1616_v48  ;;  %v1715_v13 = vpop.permute.xlu1 %1714 }
0x126d   :  { %3260 = vpow2.f32 %v2727_v16  ;;  %v1636_v44 = vpop.permute.xlu0 %1635 }
0x126e   :  { %3262 = vpow2.f32 %v2728_v56  ;;  %v1640_v12 = vmul.f32 %v4020_v52, %v1636_v44  ;;  %v1620_v52 = vsub.f32 1.0, %v4025_v14 }
0x1271   :  { %v3253_v42 = vpop.eup %3252  ;;  %v1717_v58 = vpop.permute.xlu0 %1716 }
0x1272   :  { %1626 = vrot.lane.b32.xlu1 %v3253_v42, %s3353_s27  ;;  %v3255_v43 = vpop.eup %3254 }
0x1275   :  { %v3257_v37 = vpop.eup %3256 }
0x1276   :  { %1707 = vrot.lane.b32.xlu0 %v3257_v37, %s3353_s27  ;;  %1705 = vrot.lane.b32.xlu1 %v3255_v43, %s3353_s27  ;;  %v3259_v62 = vpop.eup %3258 }
0x1277   :  { %v3261_v57 = vpop.eup %3260 }
0x1278   :  { %v3263_v51 = vpop.eup %3262  ;;  %v1672_v30 = vadd.f32 1.0, %v3261_v57 }
0x1279   :  { %v1673_v41 = vadd.f32 1.0, %v3263_v51 }
0x127a   :  { %1633 = vrot.lane.b32.xlu0 %v1632_v49, %s3354_s28  ;;  %1624 = vrot.lane.b32.xlu1 %v3259_v62, %s3353_s27  ;;  %3264 = vrcp.f32 %v1672_v30 }
0x127b   :  { %3266 = vrcp.f32 %v1673_v41 }
0x1284   :  { %v3265_v46 = vpop.eup %3264 }
0x1285   :  { %v3267_v28 = vpop.eup %3266  ;;  %v1701_v6 = vsub.f32 1.0, %v3265_v46  ;;  %v1720_v8 = vmul.f32 %v3265_v46, %v1715_v13 }
0x1286   :  { %v1702_v29 = vsub.f32 1.0, %v3267_v28  ;;  %v1721_v3 = vmul.f32 %v3267_v28, %v1717_v58 }
0x12e4   :  { %v1627_v40 = vpop.permute.xlu1 %1626 }
0x12e5   :  { %v1631_v2 = vmul.f32 %v1627_v40, %v1621_v20 }
0x12e7   :  { %v1642_v35 = vadd.f32 %v1640_v12, %v1631_v2 }
0x12e8   :  { %v1706_v9 = vpop.permute.xlu1 %1705  ;;  %v1708_v50 = vpop.permute.xlu0 %1707 }
0x12e9   :  { %v1711_v15 = vmul.f32 %v1706_v9, %v1701_v6  ;;  %v1712_v21 = vmul.f32 %v1708_v50, %v1702_v29  ;;  %v4053_v25 = vsel %vm1975_vm13, %v3986_v31, %v1642_v35  ;;  %v1726_v42 = vrot.slane %v1642_v35, 7 }
0x12eb   :  { %v4055_v59 = vadd.f32 %v1720_v8, %v1711_v15  ;;  %v4057_v54 = vadd.f32 %v1721_v3, %v1712_v21 }
0x12ec   :  { %v1625_v23 = vpop.permute.xlu1 %1624  ;;  %v1634_v39 = vpop.permute.xlu0 %1633 }
0x12ed   :  { %v1734_v32 = vrot.slane %v4055_v59, 3  ;;  %v1735_v1 = vrot.slane %v4057_v54, 2  ;;  %v1630_v47 = vmul.f32 %v1625_v23, %v1620_v52  ;;  %v1639_v48 = vmul.f32 %v4025_v14, %v1634_v39 }
0x12ef   :  { %v1641_v43 = vadd.f32 %v1639_v48, %v1630_v47  ;;  %v1736_v31 = vsel %vm1727_vm14, %v1735_v1, %v1734_v32 }
0x12f0   :  { %1737 = vrot.lane.b32.xlu0 %v1736_v31, %s3354_s28 }
0x12f1   :  { %v1728_v37 = vsel %vm1727_vm14, %v1726_v42, %v1641_v43  ;;  %v4066_v49 = vsel %vm1975_vm13, %v3999_v22, %v1641_v43 }
0x12f2   :  { %1729 = vrot.lane.b32.xlu1 %v1728_v37, %s3353_s27 }
0x1362   :  { %v1738_v62 = vpop.permute.xlu0 %1737 }
0x1364   :  { %v1730_v17 = vpop.permute.xlu1 %1729 }
0x1365   :  { %v1740_v55 = vsel %vm295_vm1, %v1730_v17, %v1738_v62 }
0x1366   :  { %v1742_v45 = vrot.slane %v1740_v55, 6  ;;  %v1871_v31 = vrot.slane %v1740_v55, 7 }
0x1368   :  { %2729 = vmatmul.mubr.msk.f32.vlgmr.msra.gmra.mrb[8].mxu1 %vm69_vm2, %v1742_v45 }
0x1369   :  { %2807 = vmatprep.mubr.msk.f32.mxu1 %vm3355_vm0, %v3351_v7 }
0x143b   :  { %v1811_v14 = vpop.f32.mrb[8].mxu1 }
0x143c   :  { %v4071_v16 = vpop.f32.mrb[9].mxu1  ;;  %v1835_v56 = vadd.f32 %v1811_v14, %v3525_v26  ;;  %v1817_v41 = vrot.slane %v1811_v14, 1  ;;  %v1883_v44 = vadd.f32 %v3860_v24, %v1811_v14  ;;  %v1818_v13 = vrot.slane %v1811_v14, 2 }
0x143d   :  { %v1915_v57 = vadd.f32 %v3843_v36, %v4071_v16 }
0x143e   :  { %v1837_v22 = vrot.slane %v1835_v56, 1  ;;  %v1838_v30 = vrot.slane %v1835_v56, 2  ;;  %v1884_v26 = vadd.f32 %v3854_v19, %v1817_v41  ;;  %v1821_v46 = vadd.f32 %v3860_v24, %v1817_v41 }
0x143f   :  { %v1917_v51 = vrot.slane %v1915_v57, 1  ;;  %1918 = vrot.lane.b32.xlu1 %v1915_v57, %s3352_s15  ;;  %v2732_v36 = vmul.f32 -1.442695, %v1883_v44  ;;  %v1822_v20 = vadd.f32 %v3854_v19, %v1818_v13  ;;  %v1898_v44 = vrot.slane %v4071_v16, 1 }
0x1440   :  { %v2733_v28 = vmul.f32 -1.442695, %v1884_v26  ;;  %v2730_v58 = vmul.f32 -1.442695, %v1821_v46 }
0x1441   :  { %1920 = vrot.lane.b32.xlu0 %v1917_v51, %s3352_s15  ;;  %3268 = vpow2.f32 %v2732_v36  ;;  %v2731_v40 = vmul.f32 -1.442695, %v1822_v20 }
0x1442   :  { %3270 = vpow2.f32 %v2733_v28 }
0x1443   :  { %1839 = vrot.lane.b32.xlu1 %v1837_v22, %s3352_s15  ;;  %3272 = vpow2.f32 %v2730_v58 }
0x1444   :  { %3274 = vpow2.f32 %v2731_v40 }
0x1445   :  { %1841 = vrot.lane.b32.xlu0 %v1838_v30, %s3352_s15 }
0x144b   :  { %v3269_v12 = vpop.eup %3268 }
0x144c   :  { %v3271_v2 = vpop.eup %3270  ;;  %v1891_v35 = vadd.f32 1.0, %v3269_v12 }
0x144d   :  { %v3273_v6 = vpop.eup %3272  ;;  %v1892_v29 = vadd.f32 1.0, %v3271_v2 }
0x144e   :  { %v3275_v8 = vpop.eup %3274  ;;  %v1829_v9 = vadd.f32 1.0, %v3273_v6  ;;  %3276 = vrcp.f32 %v1891_v35 }
0x144f   :  { %v1830_v50 = vadd.f32 1.0, %v3275_v8  ;;  %3278 = vrcp.f32 %v1892_v29 }
0x1450   :  { %3280 = vrcp.f32 %v1829_v9 }
0x1451   :  { %3282 = vrcp.f32 %v1830_v50 }
0x1458   :  { %v3277_v3 = vpop.eup %3276 }
0x1459   :  { %v3279_v52 = vpop.eup %3278 }
0x145a   :  { %v4085_v32 = vpop.eup %3280 }
0x145b   :  { %v4089_v48 = vpop.eup %3282 }
0x14b1   :  { %v1919_v15 = vpop.permute.xlu1 %1918 }
0x14b2   :  { %v1924_v21 = vmul.f32 %v3277_v3, %v1919_v15 }
0x14b3   :  { %v1921_v23 = vpop.permute.xlu0 %1920 }
0x14b4   :  { %v1925_v39 = vmul.f32 %v3279_v52, %v1921_v23  ;;  %1928 = vrot.lane.b32.xlu1 %v1924_v21, %s3352_s15 }
0x14b5   :  { %v1840_v1 = vpop.permute.xlu1 %1839 }
0x14b6   :  { %v1845_v47 = vmul.f32 %v4085_v32, %v1840_v1  ;;  %1930 = vrot.lane.b32.xlu0 %v1925_v39, %s3352_s15  ;;  %v1859_v39 = vsub.f32 1.0, %v4085_v32 }
0x14b7   :  { %v1842_v42 = vpop.permute.xlu0 %1841 }
0x14b8   :  { %v1846_v43 = vmul.f32 %v4089_v48, %v1842_v42  ;;  %1849 = vrot.lane.b32.xlu1 %v1845_v47, %s3352_s15 }
0x14ba   :  { %1851 = vrot.lane.b32.xlu0 %v1846_v43, %s3352_s15 }
0x14be   :  { %1950 = vrot.lane.b32.xlu0 %v1742_v45, %s3353_s27 }
0x14c2   :  { %1952 = vrot.lane.b32.xlu0 %v1871_v31, %s3353_s27 }
0x14c6   :  { %1872 = vrot.lane.b32.xlu0 %v1871_v31, %s3354_s28 }
0x14ca   :  { %1874 = vrot.lane.b32.xlu0 %v1740_v55, %s3354_s28 }
0x1526   :  { %v1929_v37 = vpop.permute.xlu1 %1928 }
0x1527   :  { %v1934_v62 = vadd.f32 %v3885_v60, %v1929_v37 }
0x1528   :  { %v1931_v17 = vpop.permute.xlu0 %1930 }
0x1529   :  { %3284 = vtanh.f32 %v1934_v62  ;;  %v1935_v14 = vadd.f32 %v3891_v10, %v1931_v17 }
0x152a   :  { %v1850_v56 = vpop.permute.xlu1 %1849 }
0x152b   :  { %3286 = vtanh.f32 %v1935_v14  ;;  %v1855_v57 = vadd.f32 %v3860_v24, %v1850_v56  ;;  %v1901_v24 = vadd.f32 %v3885_v60, %v4071_v16 }
0x152c   :  { %v1852_v51 = vpop.permute.xlu0 %1851 }
0x152d   :  { %3288 = vtanh.f32 %v1855_v57  ;;  %v1856_v45 = vadd.f32 %v3854_v19, %v1852_v51  ;;  %v1902_v19 = vadd.f32 %v3891_v10, %v1898_v44  ;;  %v2734_v13 = vmul.f32 -1.442695, %v1901_v24 }
0x152f   :  { %3290 = vtanh.f32 %v1856_v45  ;;  %v2735_v26 = vmul.f32 -1.442695, %v1902_v19 }
0x1530   :  { %3292 = vpow2.f32 %v2734_v13  ;;  %v1951_v58 = vpop.permute.xlu0 %1950 }
0x1531   :  { %3294 = vpow2.f32 %v2735_v26 }
0x1533   :  { %v3285_v22 = vpop.eup %3284 }
0x1534   :  { %1942 = vrot.lane.b32.xlu1 %v3285_v22, %s3353_s27  ;;  %v1953_v12 = vpop.permute.xlu0 %1952 }
0x1535   :  { %v3287_v55 = vpop.eup %3286 }
0x1537   :  { %v3289_v30 = vpop.eup %3288 }
0x1538   :  { %1944 = vrot.lane.b32.xlu1 %v3287_v55, %s3353_s27  ;;  %v1873_v8 = vpop.permute.xlu0 %1872 }
0x1539   :  { %v3291_v41 = vpop.eup %3290  ;;  %v1878_v42 = vmul.f32 %v4085_v32, %v1873_v8  ;;  %v1860_v32 = vsub.f32 1.0, %v4089_v48 }
0x153a   :  { %v3293_v46 = vpop.eup %3292 }
0x153b   :  { %v1909_v36 = vadd.f32 1.0, %v3293_v46  ;;  %v3295_v20 = vpop.eup %3294 }
0x153c   :  { %1863 = vrot.lane.b32.xlu1 %v3289_v30, %s3353_s27  ;;  %v1910_v28 = vadd.f32 1.0, %v3295_v20  ;;  %v1875_v31 = vpop.permute.xlu0 %1874  ;;  %v2059_v20 = vld [vmem:[%s4310_s6 + $0x8] sm:$0xff] }
0x153d   :  { %3296 = vrcp.f32 %v1909_v36  ;;  %v2058_v36 = vld [vmem:[%s4310_s6] sm:$0xff] }
0x153e   :  { %3298 = vrcp.f32 %v1910_v28  ;;  %v2988_v28 = vpack.c.bf16 %v2059_v20, %v2058_v36 }
0x1540   :  { %1865 = vrot.lane.b32.xlu1 %v3291_v41, %s3353_s27  ;;  %2989 = vmatprep.subr.bf16.mxu0 %v2988_v28 }
0x1541   :  { %2991 = vmatpush3.bf16.msra.mxu0 %v2988_v28 }
0x1547   :  { %v3297_v40 = vpop.eup %3296 }
0x1548   :  { %v1938_v2 = vsub.f32 1.0, %v3297_v40  ;;  %v3299_v35 = vpop.eup %3298  ;;  %v1956_v29 = vmul.f32 %v3297_v40, %v1951_v58  ;;  %v2060_v58 = vld [vmem:[%s4310_s6 + $0x10] sm:$0xff]  ;;  %v2061_v40 = vld [vmem:[%s4310_s6 + $0x18] sm:$0xff] }
0x1549   :  { %v1939_v10 = vsub.f32 1.0, %v3299_v35  ;;  %v1957_v50 = vmul.f32 %v3299_v35, %v1953_v12  ;;  %v2992_v12 = vpack.c.bf16 %v2061_v40, %v2060_v58  ;;  %v2063_v35 = vld [vmem:[%s4310_s6 + $0x28] sm:$0xff] }
0x154b   :  { %2993 = vmatprep.subr.bf16.mxu0 %v2992_v12 }
0x154c   :  { %2995 = vmatpush3.bf16.msra.mxu0 %v2992_v12 }
0x15a6   :  { %v1943_v6 = vpop.permute.xlu1 %1942 }
0x15a7   :  { %v1948_v60 = vmul.f32 %v1943_v6, %v1938_v2  ;;  %v2062_v2 = vld [vmem:[%s4310_s6 + $0x20] sm:$0xff]  ;;  %v2064_v6 = vld [vmem:[%s4310_s6 + $0x30] sm:$0xff] }
0x15a9   :  { %v1958_v16 = vadd.f32 %v1956_v29, %v1948_v60  ;;  %v2996_v29 = vpack.c.bf16 %v2063_v35, %v2062_v2  ;;  %v2065_v60 = vld [vmem:[%s4310_s6 + $0x38] sm:$0xff] }
0x15aa   :  { %v1945_v9 = vpop.permute.xlu1 %1944 }
0x15ab   :  { %v1981_v3 = vsel %vm1960_vm4, %v1958_v16, %v4055_v59  ;;  %v1949_v15 = vmul.f32 %v1945_v9, %v1939_v10  ;;  %v3000_v16 = vpack.c.bf16 %v2065_v60, %v2064_v6  ;;  %2997 = vmatprep.subr.bf16.mxu0 %v2996_v29 }
0x15ac   :  { %v1983_v21 = vsel %vm1963_vm5, %v1981_v3, %v3988_v11  ;;  %2999 = vmatpush3.bf16.msra.mxu0 %v2996_v29 }
0x15ad   :  { %v1985_v52 = vsel %vm1966_vm7, %v1983_v21, %v3911_v5  ;;  %v1959_v23 = vadd.f32 %v1957_v50, %v1949_v15  ;;  %3001 = vmatprep.subr.bf16.mxu0 %v3000_v16 }
0x15ae   :  { %v1864_v1 = vpop.permute.xlu1 %1863  ;;  %v1987_v47 = vsel %vm1969_vm9, %v1985_v52, %v3816_v33  ;;  %v2736_v52 = vld [vmem:[%s4308_s4] ss:$0 sm:$0xff] }
0x15af   :  { %v1982_v59 = vsel %vm1960_vm4, %v1959_v23, %v4057_v54  ;;  %v1869_v43 = vmul.f32 %v1864_v1, %v1859_v39  ;;  %v1989_v11 = vsel %vm1972_vm11, %v1987_v47, %v3735_v38  ;;  %v2737_v39 = vld [vmem:[%s4309_s5] ss:$0 sm:$0xff] }
0x15b0   :  { %v1984_v5 = vsel %vm1963_vm5, %v1982_v59, %v3990_v34  ;;  %v1991_v37 = vsel %vm1975_vm13, %v1989_v11, %v3656_v63  ;;  %v1879_v34 = vmul.f32 %v4089_v48, %v1875_v31  ;;  %3003 = vmatpush3.bf16.msra.mxu0 %v3000_v16  ;;  %v2738_v31 = vld [vmem:[%s4311_s7] ss:$0 sm:$0xff] }
0x15b1   :  { %v1986_v62 = vsel %vm1966_vm7, %v1984_v5, %v3913_v18  ;;  %v1880_v33 = vadd.f32 %v1878_v42, %v1869_v43  ;;  %v1993_v54 = vsel %vm1978_vm15, %v1991_v37, %v3582_v53  ;;  %v2311_v5 = vlaneseq }
0x15b2   :  { %v1866_v17 = vpop.permute.xlu1 %1865  ;;  %2005 = vrot.lane.b32.xlu0 %v1993_v54, %s3354_s28  ;;  %v1988_v38 = vsel %vm1969_vm9, %v1986_v62, %v3819_v27 }
0x15b3   :  { %v1870_v14 = vmul.f32 %v1866_v17, %v1860_v32  ;;  %v1979_v63 = vsel %vm1978_vm15, %v4066_v49, %v1880_v33  ;;  %v1990_v18 = vsel %vm1972_vm11, %v1988_v38, %v3737_v4  ;;  %v2312_v32 = vshrl.u32 %v2311_v5, 7  ;;  %v2310_v17 = vld [vmem:[%s4305_s1] sm:$0x3]  ;;  %v2558_v5 = vld [vmem:[%s4314_s10 + $0x28] sm:$0xff] }
0x15b4   :  { %1997 = vrot.lane.b32.xlu1 %v1979_v63, %s3353_s27  ;;  %v1992_v53 = vsel %vm1975_vm13, %v1990_v18, %v3658_v0 }
0x15b5   :  { %v1881_v56 = vadd.f32 %v1879_v34, %v1870_v14  ;;  %v1994_v57 = vsel %vm1978_vm15, %v1992_v53, %v3585_v61  ;;  %v2313_v38 = vsub.s32 0, %v2312_v32  ;;  %v2320_v34 = vsub.s32 1, %v2312_v32 }
0x15b6   :  { %2007 = vrot.lane.b32.xlu0 %v1994_v57, %s3354_s28 }
0x15b7   :  { %v1980_v27 = vsel %vm1978_vm15, %v4053_v25, %v1881_v56  ;;  %v2314_v14 = vrot.slane %v2310_v17, %v2313_v38  ;;  %v2321_v63 = vrot.slane %v2310_v17, %v2320_v34  ;;  %v2562_v17 = vld [vmem:[%s4314_s10 + $0x48] sm:$0xff]  ;;  %v2563_v34 = vld [vmem:[%s4314_s10 + $0x50] sm:$0xff] }
0x15b8   :  { %1999 = vrot.lane.b32.xlu1 %v1980_v27, %s3353_s27 }
0x1624   :  { %v2006_v49 = vpop.permute.xlu0 %2005 }
0x1626   :  { %v1998_v48 = vpop.permute.xlu1 %1997 }
0x1627   :  { %v4151_v4 = vsel %vm295_vm1, %v1998_v48, %v2006_v49 }
0x1628   :  { %v2015_v51 = vsel %vm69_vm2, %v4151_v4, 0.0  ;;  %v2008_v0 = vpop.permute.xlu0 %2007 }
0x1629   :  { %2016 = vadd.xlane.f32.xlu1 %v2015_v51 }
0x162a   :  { %v2000_v45 = vpop.permute.xlu1 %1999 }
0x162b   :  { %v4156_v61 = vsel %vm295_vm1, %v2000_v45, %v2008_v0 }
0x162c   :  { %v2018_v22 = vsel %vm69_vm2, %v4156_v61, 0.0 }
0x162d   :  { %2019 = vadd.xlane.f32.xlu0 %v2018_v22 }
0x16b6   :  { %v2017_v25 = vpop.xlane.xlu1 %2016 }
0x16b7   :  { %v2022_v55 = vmul.f32 0.015625, %v2017_v25 }
0x16b9   :  { %v2024_v30 = vsub.f32 %v4151_v4, %v2022_v55 }
0x16ba   :  { %v2020_v41 = vpop.xlane.xlu0 %2019 }
0x16bb   :  { %v2023_v44 = vmul.f32 0.015625, %v2020_v41  ;;  %v2026_v24 = vmul.f32 %v2024_v30, %v2024_v30 }
0x16bd   :  { %v2025_v19 = vsub.f32 %v4156_v61, %v2023_v44  ;;  %v2028_v13 = vsel %vm69_vm2, %v2026_v24, 0.0 }
0x16be   :  { %2029 = vadd.xlane.f32.xlu0 %v2028_v13 }
0x16bf   :  { %v2027_v26 = vmul.f32 %v2025_v19, %v2025_v19 }
0x16c1   :  { %v2031_v46 = vsel %vm69_vm2, %v2027_v26, 0.0 }
0x16c2   :  { %2032 = vadd.xlane.f32.xlu1 %v2031_v46 }
0x174b   :  { %v2030_v10 = vpop.xlane.xlu0 %2029 }
0x174c   :  { %v2034_v8 = vmul.f32 0.015625, %v2030_v10 }
0x174e   :  { %v2036_v9 = vadd.f32 1e-05, %v2034_v8 }
0x174f   :  { %v2033_v50 = vpop.xlane.xlu1 %2032 }
0x1750   :  { %3300 = vrsqrt.f32 %v2036_v9  ;;  %v2035_v3 = vmul.f32 0.015625, %v2033_v50  ;;  %v2553_v50 = vld [vmem:[%s4314_s10] sm:$0xff] }
0x1752   :  { %v2037_v15 = vadd.f32 1e-05, %v2035_v3  ;;  %v2555_v3 = vld [vmem:[%s4314_s10 + $0x10] sm:$0xff] }
0x1754   :  { %3302 = vrsqrt.f32 %v2037_v15 }
0x175a   :  { %v3301_v21 = vpop.eup %3300 }
0x175b   :  { %v2040_v23 = vmul.f32 %v3301_v21, %v2024_v30  ;;  %v2556_v21 = vld [vmem:[%s4314_s10 + $0x18] sm:$0xff] }
0x175d   :  { %v2048_v1 = vmul.f32 %v2736_v52, %v2040_v23 }
0x175e   :  { %v3303_v47 = vpop.eup %3302 }
0x175f   :  { %v2041_v42 = vmul.f32 %v3303_v47, %v2025_v19  ;;  %v2056_v59 = vadd.f32 %v2737_v39, %v2048_v1 }
0x1761   :  { %v2049_v43 = vmul.f32 %v2736_v52, %v2041_v42  ;;  %2802 = vmatprep.mubr.msk.f32.mxu0 %vm69_vm2, %v2056_v59  ;;  %v3008_v52 = vpack.c.bf16 %v2556_v21, %v2555_v3 }
0x1763   :  { %v4195_v11 = vadd.f32 %v2737_v39, %v2049_v43 }
0x1765   :  { %2803 = vmatmul.mubr.msk.f32.vlgmr.msra.gmra.mrb[6].mxu0 %vm69_vm2, %v4195_v11 }
0x1838   :  { %v2804_v37 = vpop.f32.mrb[6].mxu0 }
0x1839   :  { %v2151_v62 = vadd.f32 %v2804_v37, %v2738_v31  ;;  %v2145_v33 = vpop.f32.mrb[7].mxu0 }
0x183a   :  { %v2146_v54 = vadd.f32 %v2738_v31, %v2145_v33  ;;  %v2557_v31 = vld [vmem:[%s4314_s10 + $0x20] sm:$0xff]  ;;  %v2560_v33 = vld [vmem:[%s4314_s10 + $0x38] sm:$0xff] }
0x183b   :  { %2232 = vrot.lane.b32.xlu1 %v2151_v62, %s3352_s15  ;;  %v3012_v37 = vpack.c.bf16 %v2558_v5, %v2557_v31 }
0x183c   :  { %2155 = vrot.lane.b32.xlu0 %v2146_v54, %s3352_s15 }
0x183f   :  { %2316 = vbcast.lane.b32.xlu1 %v2314_v14, 256  ;;  %v2564_v14 = vld [vmem:[%s4314_s10 + $0x58] sm:$0xff] }
0x1840   :  { %2323 = vbcast.lane.b32.xlu0 %v2321_v63, 256  ;;  %v3024_v63 = vpack.c.bf16 %v2564_v14, %v2563_v34 }
0x18ad   :  { %v2233_v53 = vpop.permute.xlu1 %2232 }
0x18ae   :  { %v2156_v18 = vpop.permute.xlu0 %2155 }
0x18af   :  { %2806 = vmatpush3.xpose.msk.msra.mxu1 %vm69_vm2, %v2156_v18  ;;  %v2565_v18 = vld [vmem:[%s4314_s10 + $0x60] sm:$0xff] }
0x18b0   :  { %2810 = vmatprep.subr.mxu1 %v3351_v7 }
0x18b1   :  { %v2317_v56 = vpop.permute.xlu1 %2316 }
0x18b2   :  { %2808 = vmatmul.mubr.msk.f32.vlgmr.msra.gmra.mrb[10].mxu1 %vm69_vm2, %v2146_v54  ;;  %vm2325_vm1 = vcmp.gt.f32.partialorder %v2317_v56, 0.5  ;;  %v2324_v48 = vpop.permute.xlu0 %2323  ;;  %v2561_v54 = vld [vmem:[%s4314_s10 + $0x40] sm:$0xff] }
0x18b3   :  { %2811 = vmatpush3.xpose.msk.msra.mxu1 %vm69_vm2, %v2233_v53  ;;  %2812 = vmatprep.mubr.msk.f32.mxu1 %vm3355_vm0, %v3351_v7  ;;  %vm2326_vm4 = vcmp.gt.f32.partialorder %v2324_v48, 0.5  ;;  %v3020_v38 = vpack.c.bf16 %v2562_v17, %v2561_v54  ;;  %v2566_v53 = vld [vmem:[%s4314_s10 + $0x68] sm:$0xff] }
0x18b4   :  { %2815 = vmatprep.subr.mxu1 %v3351_v7  ;;  %v3028_v56 = vpack.c.bf16 %v2566_v53, %v2565_v18 }
0x18b6   :  { %2813 = vmatmul.mubr.msk.f32.vlgmr.msra.gmra.mrb[12].mxu1 %vm69_vm2, %v2151_v62  ;;  %v2559_v62 = vld [vmem:[%s4314_s10 + $0x30] sm:$0xff] }
0x18b7   :  { %2816 = vmatpush3.msra.mxu1 %v2056_v59  ;;  %2817 = vmatprep.mubr.msk.f32.mxu1 %vm3355_vm0, %v3351_v7  ;;  %v3016_v32 = vpack.c.bf16 %v2560_v33, %v2559_v62 }
0x18b8   :  { %2820 = vmatprep.subr.mxu1 %v3351_v7 }
0x1985   :  { %v2227_v57 = vpop.f32.mrb[10].mxu1 }
0x1986   :  { %v2308_v27 = vmul.f32 0.125, %v2227_v57  ;;  %v2809_v49 = vpop.f32.mrb[11].mxu1  ;;  %v2567_v57 = vld [vmem:[%s4314_s10 + $0x70] sm:$0xff] }
0x1988   :  { %v2331_v51 = vsel %vm2325_vm1, %v2308_v27, -100000.0  ;;  %v2568_v27 = vld [vmem:[%s4314_s10 + $0x78] sm:$0xff] }
0x1989   :  { %v2304_v0 = vpop.f32.mrb[12].mxu1  ;;  %v2334_v45 = vsel %vm2333_vm3, %v2331_v51, -inf  ;;  %v3032_v49 = vpack.c.bf16 %v2568_v27, %v2567_v57 }
0x198a   :  { %v2309_v22 = vmul.f32 0.125, %v2304_v0  ;;  %2335 = vmax.xlane.f32.xlu1 %v2334_v45  ;;  %v2814_v25 = vpop.f32.mrb[13].mxu1 }
0x198c   :  { %v2332_v55 = vsel %vm2326_vm4, %v2309_v22, -100000.0 }
0x198d   :  { %v2337_v30 = vsel %vm2333_vm3, %v2332_v55, -inf }
0x198e   :  { %2338 = vmax.xlane.f32.xlu0 %v2337_v30  ;;  %v2747_v30 = vld [vmem:[%s4312_s8] ss:$0 sm:$0xff]  ;;  %s3356_s8 = smov [#allocation2]  }
0x1a17   :  { %v2336_v41 = vpop.xlane.xlu1 %2335 }
0x1a18   :  { %v2340_v44 = vsub.f32 %v2331_v51, %v2336_v41 }
0x1a1a   :  { %v2342_v24 = vmul.f32 1.442695, %v2340_v44  ;;  %v2748_v44 = vld [vmem:[%s4313_s9] ss:$0 sm:$0xff]  ;;  %s2669_s9 = sshll.u32 %s3356_s8, 4  ;;  %s2670_s9 = int_to_ptr.vmem [resolvable:$true] %s2669_s9 }
0x1a1b   :  { %v2339_v19 = vpop.xlane.xlu0 %2338  ;;  %p3332_p1 = scmp.lt.s32.totalorder %s2670_s9, %s2670_s9 }
0x1a1c   :  { %3304 = vpow2.f32 %v2342_v24  ;;  %v2341_v13 = vsub.f32 %v2332_v55, %v2339_v19 }
0x1a1e   :  { %v2344_v26 = vmul.f32 1.442695, %v2341_v13 }
0x1a20   :  { %3306 = vpow2.f32 %v2344_v26 }
0x1a26   :  { %v3305_v46 = vpop.eup %3304 }
0x1a27   :  { %v2346_v36 = vsel %vm2333_vm3, %v3305_v46, 0.0 }
0x1a28   :  { %2347 = vadd.xlane.f32.xlu0 %v2346_v36 }
0x1a2a   :  { %v3307_v20 = vpop.eup %3306 }
0x1a2b   :  { %v2349_v28 = vsel %vm2333_vm3, %v3307_v20, 0.0 }
0x1a2c   :  { %2350 = vadd.xlane.f32.xlu1 %v2349_v28 }
0x1a3d   :  { %2506 = vrot.lane.b32.xlu1 %v4156_v61, %s3352_s15 }
0x1a3e   :  { %2504 = vrot.lane.b32.xlu0 %v4151_v4, %s3352_s15 }
0x1ab5   :  { %v2348_v58 = vpop.xlane.xlu0 %2347 }
0x1ab6   :  { %3308 = vrcp.f32 %v2348_v58 }
0x1ab9   :  { %v2351_v40 = vpop.xlane.xlu1 %2350  ;;  %v2505_v61 = vpop.permute.xlu0 %2504 }
0x1aba   :  { %3310 = vrcp.f32 %v2351_v40 }
0x1abd   :  { %v2507_v16 = vpop.permute.xlu1 %2506 }
0x1ac0   :  { %v3309_v12 = vpop.eup %3308 }
0x1ac1   :  { %v2353_v2 = vmul.f32 %v3309_v12, %v3305_v46 }
0x1ac3   :  { %2818 = vmatmul.mubr.msk.f32.vlgmr.msra.gmra.mrb[14].mxu1 %vm2333_vm3, %v2353_v2 }
0x1ac4   :  { %v3311_v35 = vpop.eup %3310  ;;  %2821 = vmatpush3.msra.mxu1 %v4195_v11  ;;  %2822 = vmatprep.mubr.msk.f32.mxu1 %vm3355_vm0, %v3351_v7  ;;  %v2554_v7 = vld [vmem:[%s4314_s10 + $0x8] sm:$0xff] }
0x1ac5   :  { %v2355_v6 = vmul.f32 %v3311_v35, %v3307_v20  ;;  %v3004_v15 = vpack.c.bf16 %v2554_v7, %v2553_v50  ;;  %v2749_v20 = vld [vmem:[%s4315_s11] ss:$0 sm:$0xff]  ;;  %s3327_s11 = scalar_lea.vmem %s2670_s9, 256 }
0x1ac6   :  { %p3328_p0 = scmp.ne.s32.totalorder %s2670_s9, %s3327_s11  ;;  %p3333_p2 = scmp.lt.s32.totalorder %s3327_s11, %s3327_s11 }
0x1ac7   :  { %2823 = vmatmul.mubr.msk.f32.vlgmr.msra.gmra.mrb[16].mxu1 %vm2333_vm3, %v2355_v6  ;;  %3005 = vmatprep.subr.bf16.mxu0 %v3004_v15 }
0x1ac8   :  { %3007 = vmatpush3.bf16.msra.mxu0 %v3004_v15  ;;  %p3334_p3 = por %p3333_p2, %p3332_p1 }
0x1ac9   :  { %3009 = vmatprep.subr.bf16.mxu0 %v3008_v52 }
0x1aca   :  { %p3335_p4 = pnand %p3334_p3, %p3328_p0 }
0x1acc   :  { %3011 = vmatpush3.bf16.msra.mxu0 %v3008_v52 }
0x1acd   :  { %3013 = vmatprep.subr.bf16.mxu0 %v3012_v37 }
0x1ad0   :  { %3015 = vmatpush3.bf16.msra.mxu0 %v3012_v37 }
0x1ad1   :  { %3017 = vmatprep.subr.bf16.mxu0 %v3016_v32 }
0x1ad4   :  { %3019 = vmatpush3.bf16.msra.mxu0 %v3016_v32 }
0x1ad5   :  { %3021 = vmatprep.subr.bf16.mxu0 %v3020_v38 }
0x1ad8   :  { %3023 = vmatpush3.bf16.msra.mxu0 %v3020_v38 }
0x1ad9   :  { %3025 = vmatprep.subr.bf16.mxu0 %v3024_v63 }
0x1adc   :  { %3027 = vmatpush3.bf16.msra.mxu0 %v3024_v63 }
0x1add   :  { %3029 = vmatprep.subr.bf16.mxu0 %v3028_v56 }
0x1ae0   :  { %3031 = vmatpush3.bf16.msra.mxu0 %v3028_v56 }
0x1ae1   :  { %3033 = vmatprep.subr.bf16.mxu0 %v3032_v49 }
0x1ae4   :  { %3035 = vmatpush3.bf16.msra.mxu0 %v3032_v49 }
0x1b96   :  { %v2425_v29 = vpop.f32.mrb[14].mxu1 }
0x1b97   :  { %v2819_v4 = vpop.f32.mrb[15].mxu1  ;;  %v2510_v60 = vsel %vm69_vm2, %v2425_v29, %v2505_v61 }
0x1b98   :  { %2514 = vadd.xlane.f32.xlu1 %v2510_v60 }
0x1b9a   :  { %v2498_v10 = vpop.f32.mrb[16].mxu1 }
0x1b9b   :  { %v2824_v8 = vpop.f32.mrb[17].mxu1  ;;  %v2511_v9 = vsel %vm69_vm2, %v2498_v10, %v2507_v16 }
0x1b9c   :  { %2516 = vadd.xlane.f32.xlu0 %v2511_v9 }
0x1c25   :  { %v2515_v23 = vpop.xlane.xlu1 %2514 }
0x1c26   :  { %v2519_v39 = vmul.f32 0.0078125, %v2515_v23 }
0x1c28   :  { %v2521_v1 = vsub.f32 %v2510_v60, %v2519_v39 }
0x1c29   :  { %v2517_v47 = vpop.xlane.xlu0 %2516 }
0x1c2a   :  { %v2520_v42 = vmul.f32 0.0078125, %v2517_v47  ;;  %v2523_v59 = vmul.f32 %v2521_v1, %v2521_v1 }
0x1c2c   :  { %v2522_v43 = vsub.f32 %v2511_v9, %v2520_v42  ;;  %2525 = vadd.xlane.f32.xlu0 %v2523_v59 }
0x1c2e   :  { %v2524_v11 = vmul.f32 %v2522_v43, %v2522_v43 }
0x1c30   :  { %2527 = vadd.xlane.f32.xlu1 %v2524_v11 }
0x1cb9   :  { %v2526_v48 = vpop.xlane.xlu0 %2525 }
0x1cba   :  { %v2529_v51 = vmul.f32 0.0078125, %v2526_v48 }
0x1cbc   :  { %v2531_v0 = vadd.f32 1e-05, %v2529_v51 }
0x1cbd   :  { %v2528_v45 = vpop.xlane.xlu1 %2527 }
0x1cbe   :  { %3312 = vrsqrt.f32 %v2531_v0  ;;  %v2530_v22 = vmul.f32 0.0078125, %v2528_v45 }
0x1cc0   :  { %v2532_v25 = vadd.f32 1e-05, %v2530_v22 }
0x1cc2   :  { %3314 = vrsqrt.f32 %v2532_v25 }
0x1cc8   :  { %v3313_v55 = vpop.eup %3312 }
0x1cc9   :  { %v2535_v41 = vmul.f32 %v3313_v55, %v2521_v1 }
0x1ccb   :  { %v2543_v24 = vmul.f32 %v2747_v30, %v2535_v41 }
0x1ccc   :  { %v3315_v19 = vpop.eup %3314 }
0x1ccd   :  { %v2536_v13 = vmul.f32 %v3315_v19, %v2522_v43  ;;  %v2551_v26 = vadd.f32 %v2748_v44, %v2543_v24 }
0x1ccf   :  { %v2544_v46 = vmul.f32 %v2747_v30, %v2536_v13  ;;  %2857 = vmatprep.mubr.f32.mxu0 %v2551_v26 }
0x1cd1   :  { %v2552_v36 = vadd.f32 %v2748_v44, %v2544_v46 }
0x1cd3   :  { %2858 = vmatmul.mubr.f32.vlgmr.msra.gmra.mrb[8].mxu0 %v2552_v36 }
0x1da6   :  { %v2859_v28 = vpop.f32.mrb[8].mxu0 }
0x1da7   :  { %v2648_v58 = vadd.f32 %v2859_v28, %v2749_v20  ;;  %v2642_v40 = vpop.f32.mrb[9].mxu0 }
0x1da8   :  { %v2643_v12 = vadd.f32 %v2749_v20, %v2642_v40 }
0x1daa   :  { %v2651_v2 = vmax.f32 %v2643_v12, %v2648_v58 }
0x1dac   :  { %v2652_v35 = vsub.f32 %v2643_v12, %v2651_v2  ;;  %v2653_v6 = vsub.f32 %v2648_v58, %v2651_v2 }
0x1dae   :  { %v2654_v61 = vmul.f32 1.442695, %v2652_v35  ;;  %v2656_v29 = vmul.f32 1.442695, %v2653_v6 }
0x1db0   :  { %3316 = vpow2.f32 %v2654_v61 }
0x1db1   :  { %3318 = vpow2.f32 %v2656_v29 }
0x1dba   :  { %v3317_v4 = vpop.eup %3316 }
0x1dbb   :  { %v3319_v60 = vpop.eup %3318 }
0x1dbc   :  { %v2658_v16 = vadd.f32 %v3319_v60, %v3317_v4 }
0x1dbe   :  { %3320 = vrcp.f32 %v2658_v16 }
0x1dc8   :  { %v3321_v10 = vpop.eup %3320 }
0x1dc9   :  { %v2660_v8 = vmul.f32 %v3321_v10, %v3317_v4  ;;  %v2661_v9 = vmul.f32 %v3321_v10, %v3319_v60 }
0x1dcb   :  { %2662 = vst [vmem:[#allocation2] sm:$0xff] %v2660_v8  ;;  %2663 = vst [vmem:[#allocation2 + $0x8] sm:$0xff] %v2661_v9 }
0x1dcc   :  { %3338 = shalt.err (!%p3335_p4)
}
0x1dcd   :  { %s3339_s30 = scalar_lea.hbm %s4316_s12, 256 }
0x1dce   :  { %p3340_p5 = scmp.ne.s32.totalorder %s4316_s12, %s3339_s30  ;;  %p3343_p6 = scmp.lt.u32.totalorder %s3339_s30, %s4316_s12 }
0x1dd0   :  { %p3345_p7 = pnand %p3343_p6, %p3340_p5 }
0x1dd2   :  { %3348 = shalt.err (!%p3345_p7)
}
0x1dd3   :  { %s3357_s17 = smov 128   ;;  %s3358_s18 = smov 8  }
0x1dd4   :  { %2675 = dma.vmem_to_hbm [thread:$0]  %s2670_s9, 256, %s4316_s12, [#allocation3], %s3357_s17, %s3357_s17, %s3358_s18  }
0x1dd5   :  { %3349 = dma.done.wait [#allocation3], 256  }
0x1dd6   :  { %3350 = vsyncadd [#allocation3], 4294967040 }
0x1dd7   :  { %2679 = vsyncpa [#allocation3], 1 }

</bundles_post_ra>
